<compile_context>
chip_gen: v6e
topology: v6e:2x2x1
jax: 0.10.0
libtpu: 0.0.40
codegen_flags: <defaults>
</compile_context>

<pallas_src>
import functools
import math

import jax
import jax.numpy as jnp
from jax import lax
from jax.experimental import pallas as pl
from jax.experimental.pallas import tpu as pltpu

_SQRT_2_OVER_PI = math.sqrt(2.0 / math.pi)
_LANE = 128
_SUBLANE = 8
_WEIGHT_TILE_BUDGET = 8 * 1024 * 1024      # bytes per weight tile (x2 when double-buffered)
_VMEM_LIMIT_BYTES = 48 * 1024 * 1024       # leaves headroom inside v7x's 64 MiB VMEM
_WEIGHT_DTYPE = jnp.bfloat16               # HBM weight stream in bf16, f32 accumulation


def _gelu(x):
    return 0.5 * x * (1.0 + jnp.tanh(_SQRT_2_OVER_PI * (x + 0.044715 * x * x * x)))


def _round_up(n, m):
    return ((n + m - 1) // m) * m


def _pick_tm(m):
    if m <= 512:
        return m
    for t in (512, 256, 128, 64, 32, 16, 8):
        if m % t == 0:
            return t
    return m


def _pick_tn(n, k, itemsize, *, prefer_split=False):
    """Largest lane-dense output tile whose (k, tn) weight tile fits the budget."""
    if n <= _LANE:
        return n
    tn = _LANE
    for cand in (2048, 1024, 512, 256, 128):
        if n % cand == 0 and k * cand * itemsize <= _WEIGHT_TILE_BUDGET:
            tn = cand
            break
    if prefer_split and tn == n and n >= 2 * _LANE and (n // 2) % _LANE == 0:
        tn = n // 2   # keep >=2 N blocks so both v7x TensorCores get work
    return tn


# ----------------------------------------------------------------------------
# Single fused linear: y = act(x @ W (+ b)), full-K contraction, no accumulator.
# ----------------------------------------------------------------------------
@functools.lru_cache(maxsize=None)
def _linear_kernel(act, has_bias):
    def epilogue(y, b):
        if has_bias:
            y = y + b
        if act == "gelu":
            y = _gelu(y)
        elif act == "tanh":
            y = jnp.tanh(y)
        return y

    if has_bias:
        def kernel(x_ref, w_ref, b_ref, o_ref):
            y = jnp.dot(x_ref[...], w_ref[...].astype(jnp.float32),
                        preferred_element_type=jnp.float32)
            o_ref[...] = epilogue(y, b_ref[...]).astype(o_ref.dtype)
    else:
        def kernel(x_ref, w_ref, o_ref):
            y = jnp.dot(x_ref[...], w_ref[...].astype(jnp.float32),
                        preferred_element_type=jnp.float32)
            o_ref[...] = epilogue(y, None).astype(o_ref.dtype)
    return kernel


def fused_linear(x, w, b=None, *, act=None):
    """x:(M,K) f32, w:(K,N) (bf16 or f32), b:(N,) f32 or None -> (M,N) f32."""
    M, K = x.shape
    Kw, N = w.shape
    assert K == Kw, (K, Kw)
    tm = _pick_tm(M)
    tn = _pick_tn(N, K, w.dtype.itemsize, prefer_split=True)
    grid = (M // tm, N // tn)

    in_specs = [
        pl.BlockSpec((tm, K), lambda i, j: (i, 0)),    # activations (full K)
        pl.BlockSpec((K, tn), lambda i, j: (0, j)),    # weight column tile
    ]
    args = [x, w]
    if b is not None:
        in_specs.append(pl.BlockSpec((1, tn), lambda i, j: (0, j)))
        args.append(b.reshape(1, N).astype(jnp.float32))

    return pl.pallas_call(
        _linear_kernel(act, b is not None),
        out_shape=jax.ShapeDtypeStruct((M, N), jnp.float32),
        grid_spec=pltpu.PrefetchScalarGridSpec(
            num_scalar_prefetch=0,
            grid=grid,
            in_specs=in_specs,
            out_specs=pl.BlockSpec((tm, tn), lambda i, j: (i, j)),
        ),
        compiler_params=pltpu.CompilerParams(
            dimension_semantics=("parallel", "parallel"),
            vmem_limit_bytes=_VMEM_LIMIT_BYTES),
    )(*args)


# ----------------------------------------------------------------------------
# Fused residual chain: L x [ h = GELU(h @ W_l + b_l) + h ] in ONE pallas_call.
# Grid = (layer, output-column block).  h stays resident in VMEM scratch;
# the new h is built in the (resident) output block and carried between layers.
# ----------------------------------------------------------------------------
@functools.lru_cache(maxsize=None)
def _res_chain_kernel(tn):
    def kernel(h0_ref, w_ref, b_ref, o_ref, h_scr):
        l = pl.program_id(0)
        j = pl.program_id(1)
        n_l = pl.num_programs(0)
        n_j = pl.num_programs(1)

        @pl.when(jnp.logical_and(l == 0, j == 0))
        def _():
            h_scr[...] = h0_ref[...]

        y = jnp.dot(h_scr[...], w_ref[...].astype(jnp.float32),
                    preferred_element_type=jnp.float32)
        y = _gelu(y + b_ref[...])
        off = pl.multiple_of(j * tn, tn)
        y = y + h_scr[:, pl.ds(off, tn)]                  # residual add
        o_ref[:, pl.ds(off, tn)] = y.astype(o_ref.dtype)

        @pl.when(jnp.logical_and(j == n_j - 1, l < n_l - 1))
        def _():
            h_scr[...] = o_ref[...]                       # carry h to next layer
    return kernel


def res_chain(h, w_stack, b_stack):
    """h:(M,N) f32, w_stack:(L,N,N), b_stack:(L,1,N) f32 -> (M,N) f32."""
    M, N = h.shape
    L = w_stack.shape[0]
    assert w_stack.shape == (L, N, N), (w_stack.shape, (L, N, N))
    tn = _pick_tn(N, N, w_stack.dtype.itemsize, prefer_split=True)
    grid = (L, N // tn)

    return pl.pallas_call(
        _res_chain_kernel(tn),
        out_shape=jax.ShapeDtypeStruct((M, N), jnp.float32),
        grid_spec=pltpu.PrefetchScalarGridSpec(
            num_scalar_prefetch=0,
            grid=grid,
            in_specs=[
                pl.BlockSpec((M, N), lambda l, j: (0, 0)),             # h0 (resident)
                pl.BlockSpec((None, N, tn), lambda l, j: (l, 0, j)),   # W_l column tile
                pl.BlockSpec((None, 1, tn), lambda l, j: (l, 0, j)),   # b_l tile
            ],
            out_specs=pl.BlockSpec((M, N), lambda l, j: (0, 0)),       # resident new h
            scratch_shapes=[pltpu.VMEM((M, N), jnp.float32)],
        ),
        compiler_params=pltpu.CompilerParams(
            dimension_semantics=("arbitrary", "arbitrary"),
            vmem_limit_bytes=_VMEM_LIMIT_BYTES),
    )(h, w_stack, b_stack)


# ----------------------------------------------------------------------------
# Parameter preparation (once, outside jit): pad, cast, stack, pre-transpose.
# ----------------------------------------------------------------------------
def prepare_params(p, weight_dtype=_WEIGHT_DTYPE):
    wd = weight_dtype

    def pad_w(w, rows, cols):
        return jnp.pad(w, ((0, rows - w.shape[0]), (0, cols - w.shape[1]))).astype(wd)

    def pad_b(b, cols):
        return jnp.pad(b, (0, cols - b.shape[0])).astype(jnp.float32)

    def stack_block(blocks):
        if not blocks:
            return None
        w = jnp.stack([wb[0] for wb in blocks]).astype(wd)                       # (L,N,N)
        b = jnp.stack([wb[1].reshape(1, -1) for wb in blocks]).astype(jnp.float32)
        return w, b

    n_z, r4 = p["adapter1"][0].shape
    rep, n_out = p["out"][0].shape
    d_exp = p["expander"].shape[0]
    r2 = rep // 2
    assert r4 % _LANE == 0 and r2 % _LANE == 0 and rep % _LANE == 0

    n_z_p = _round_up(n_z, _LANE)
    n_out_p = _round_up(n_out, _LANE)
    d_exp_p = _round_up(d_exp, _LANE)

    pp = {
        "adapter1": (pad_w(p["adapter1"][0], n_z_p, r4), pad_b(p["adapter1"][1], r4)),
        "block1": stack_block(p["block1"]),
        "adapter2": (p["adapter2"][0].astype(wd), p["adapter2"][1].astype(jnp.float32)),
        "block2": stack_block(p["block2"]),
        "adapter3": (p["adapter3"][0].astype(wd), p["adapter3"][1].astype(jnp.float32)),
        "block3": stack_block(p["block3"]),
        "adapter4": (p["adapter4"][0].astype(wd), p["adapter4"][1].astype(jnp.float32)),
        "block4": stack_block(p["block4"]),
        "out": (pad_w(p["out"][0], rep, n_out_p), pad_b(p["out"][1], n_out_p)),
        # pre-transposed + padded expander: final matmul is h @ expander.T
        "expander_t": pad_w(p["expander"].T, n_out_p, d_exp_p),
    }
    meta = dict(n_z=n_z, n_z_p=n_z_p, n_out=n_out, n_out_p=n_out_p,
                d_exp=d_exp, d_exp_p=d_exp_p)
    return pp, meta


def res_generator_forward(x, pp, meta):
    """x: (bs, n_z) f32 -> (bs, d_exp) f32."""
    M, n_z = x.shape
    M_p = _round_up(max(M, _SUBLANE), _SUBLANE)
    x = jnp.pad(x.astype(jnp.float32),
                ((0, M_p - M), (0, meta["n_z_p"] - n_z)))

    h = fused_linear(x, *pp["adapter1"], act="gelu")
    if pp["block1"] is not None:
        h = res_chain(h, *pp["block1"])
    h = fused_linear(h, *pp["adapter2"], act="gelu")
    if pp["block2"] is not None:
        h = res_chain(h, *pp["block2"])
    h = fused_linear(h, *pp["adapter3"], act="gelu")
    if pp["block3"] is not None:
        h = res_chain(h, *pp["block3"])
    h = fused_linear(h, *pp["adapter4"], act="gelu")
    if pp["block4"] is not None:
        h = res_chain(h, *pp["block4"])
    h = fused_linear(h, *pp["out"], act="tanh")
    # x = torch.cat([expander @ x.T]).T  ==  h @ expander.T  (pre-transposed, no bias)
    y = fused_linear(h, pp["expander_t"], None, act=None)
    return y[:M, :meta["d_exp"]]


# ----------------------------------------------------------------------------
# Init + pure-JAX reference (uses identically bf16-rounded weights).
# ----------------------------------------------------------------------------
def init_params(key, n_z, n_out, d_exp, rep_dim=4096, n_block=8):
    """PyTorch-default-style Linear init; weights stored as (in, out), f32."""
    r4, r2 = rep_dim // 4, rep_dim // 2

    def linear(k, fan_in, fan_out):
        kw, kb = jax.random.split(k)
        bound = 1.0 / math.sqrt(fan_in)
        w = jax.random.uniform(kw, (fan_in, fan_out), jnp.float32, -bound, bound)
        b = jax.random.uniform(kb, (fan_out,), jnp.float32, -bound, bound)
        return w, b

    n_lin = 4 + 4 * (n_block - 1) + 1
    keys = iter(jax.random.split(key, n_lin + 1))

    p = {}
    p["adapter1"] = linear(next(keys), n_z, r4)
    p["block1"] = [linear(next(keys), r4, r4) for _ in range(n_block - 1)]
    p["adapter2"] = linear(next(keys), r4, r4)
    p["block2"] = [linear(next(keys), r4, r4) for _ in range(n_block - 1)]
    p["adapter3"] = linear(next(keys), r4, r2)
    p["block3"] = [linear(next(keys), r2, r2) for _ in range(n_block - 1)]
    p["adapter4"] = linear(next(keys), r2, rep_dim)
    p["block4"] = [linear(next(keys), rep_dim, rep_dim) for _ in range(n_block - 1)]
    p["out"] = linear(next(keys), rep_dim, n_out)
    # stands in for handler.constructor (PCA basis), shape (d_exp, n_out)
    p["expander"] = (jax.random.normal(next(keys), (d_exp, n_out), jnp.float32)
                     / math.sqrt(n_out))
    return p


def reference_forward(x, p, weight_dtype=_WEIGHT_DTYPE):
    """Pure-JAX (XLA) reference mirroring the PyTorch forward, for validation."""
    hi = lax.Precision.HIGHEST

    def rw(w):  # same bf16 rounding the kernel's weights see
        return w.astype(weight_dtype).astype(jnp.float32)

    def lin(h, w, b):
        return jnp.dot(h, rw(w), precision=hi) + b

    h = _gelu(lin(x, *p["adapter1"]))
    for w, b in p["block1"]:
        h = _gelu(lin(h, w, b)) + h
    h = _gelu(lin(h, *p["adapter2"]))
    for w, b in p["block2"]:
        h = _gelu(lin(h, w, b)) + h
    h = _gelu(lin(h, *p["adapter3"]))
    for w, b in p["block3"]:
        h = _gelu(lin(h, w, b)) + h
    h = _gelu(lin(h, *p["adapter4"]))
    for w, b in p["block4"]:
        h = _gelu(lin(h, w, b)) + h
    h = jnp.tanh(lin(h, *p["out"]))
    return jnp.dot(h, rw(p["expander"]).T, precision=hi)


if __name__ == "__main__":
    key = jax.random.PRNGKey(0)
    kx, kp = jax.random.split(key)

    # Small demo shapes (module defaults are rep_dim=4096, n_block=8; shrunk to
    # keep the runnable example small — structure is identical).  Non-aligned
    # n_z / n_out / d_exp / batch exercise the wrapper-level padding path.
    BS, N_Z, N_OUT, D_EXP = 6, 100, 200, 300
    REP_DIM, N_BLOCK = 512, 3

    params = init_params(kp, N_Z, N_OUT, D_EXP, rep_dim=REP_DIM, n_block=N_BLOCK)
    x = jax.random.normal(kx, (BS, N_Z), jnp.float32)

    pp, meta = prepare_params(params)
    fwd = jax.jit(functools.partial(res_generator_forward, meta=meta))
    out = jax.block_until_ready(fwd(x, pp))
    assert out.shape == (BS, D_EXP), out.shape
    assert bool(jnp.all(jnp.isfinite(out)))

    ref = reference_forward(x, params)
    err = float(jnp.max(jnp.abs(out - ref)))
    assert err < 1e-2, f"max abs err {err}"

    print("KERNEL_OK")
</pallas_src>

<mosaic_0001>
module attributes {stable_mosaic.version = 11 : i64} {
  func.func @kernel(%arg0: i32, %arg1: i32, %arg2: memref<8x128xf32, #tpu.memory_space<vmem>>, %arg3: memref<1x128x128xbf16, #tpu.memory_space<vmem>>, %arg4: memref<1x1x128xf32, #tpu.memory_space<vmem>>, %arg5: memref<8x128xf32, #tpu.memory_space<vmem>>, %arg6: memref<8x128xf32, #tpu.memory_space<vmem>>) attributes {dimension_semantics = [#tpu.dimension_semantics<arbitrary>, #tpu.dimension_semantics<arbitrary>], iteration_bounds = array<i64: 2, 1>, scalar_prefetch = 0 : i64, scratch_operands = 1 : i64, tpu.core_type = #tpu.core_type<tc>, window_params = [{pipeline_mode = #tpu.pipeline_mode<synchronous>, transform_indices = @transform_0, window_bounds = array<i64: 8, 128>}, {transform_indices = @transform_1, window_bounds = array<i64: 1, 128, 128>}, {transform_indices = @transform_2, window_bounds = array<i64: 1, 1, 128>}, {pipeline_mode = #tpu.pipeline_mode<synchronous>, transform_indices = @transform_3, window_bounds = array<i64: 8, 128>}]} {
    %c0_i32 = arith.constant 0 : i32
    %0 = arith.cmpi eq, %arg0, %c0_i32 : i32
    %c0_i32_0 = arith.constant 0 : i32
    %1 = arith.cmpi eq, %arg1, %c0_i32_0 : i32
    %2 = arith.andi %0, %1 : i1
    %3 = arith.extui %2 : i1 to i32
    %c0_i32_1 = arith.constant 0 : i32
    %4 = arith.cmpi ne, %3, %c0_i32_1 : i32
    scf.if %4 {
      %c0_17 = arith.constant 0 : index
      %c0_18 = arith.constant 0 : index
      %39 = vector.load %arg2[%c0_17, %c0_18] : memref<8x128xf32, #tpu.memory_space<vmem>>, vector<8x128xf32>
      %c0_19 = arith.constant 0 : index
      %c0_20 = arith.constant 0 : index
      %40 = vector.load %arg6[%c0_19, %c0_20] : memref<8x128xf32, #tpu.memory_space<vmem>>, vector<8x128xf32>
      tpu.vector_store %arg6[%c0_19, %c0_20], %39 {strides = array<i32>} : memref<8x128xf32, #tpu.memory_space<vmem>>, vector<8x128xf32>,
    } else {
    }
    %c0 = arith.constant 0 : index
    %c0_2 = arith.constant 0 : index
    %5 = vector.load %arg6[%c0, %c0_2] : memref<8x128xf32, #tpu.memory_space<vmem>>, vector<8x128xf32>
    %c0_3 = arith.constant 0 : index
    %c0_4 = arith.constant 0 : index
    %c0_5 = arith.constant 0 : index
    %6 = vector.load %arg3[%c0_3, %c0_4, %c0_5] : memref<1x128x128xbf16, #tpu.memory_space<vmem>>, vector<1x128x128xbf16>
    %7 = vector.shape_cast %6 : vector<1x128x128xbf16> to vector<128x128xbf16>
    %8 = arith.extf %7 : vector<128x128xbf16> to vector<128x128xf32>
    %cst = arith.constant dense<0.000000e+00> : vector<8x128xf32>
    %9 = tpu.matmul %5, %8, %cst {dimension_numbers = #tpu.dot_dimension_numbers<[1], [0], [0], [1], [0, 0, 1, 1], [], []>} : vector<8x128xf32>, vector<128x128xf32>, vector<8x128xf32> -> vector<8x128xf32>
    %c0_6 = arith.constant 0 : index
    %c0_7 = arith.constant 0 : index
    %c0_8 = arith.constant 0 : index
    %10 = vector.load %arg4[%c0_6, %c0_7, %c0_8] : memref<1x1x128xf32, #tpu.memory_space<vmem>>, vector<1x1x128xf32>
    %11 = vector.shape_cast %10 : vector<1x1x128xf32> to vector<1x128xf32>
    %12 = vector.broadcast %11 : vector<1x128xf32> to vector<8x128xf32>
    %13 = arith.addf %9, %12 : vector<8x128xf32>
    %cst_9 = arith.constant 5.000000e-01 : f32
    %14 = vector.broadcast %cst_9 : f32 to vector<8x128xf32>
    %15 = arith.mulf %14, %13 : vector<8x128xf32>
    %cst_10 = arith.constant 4.471500e-02 : f32
    %16 = vector.broadcast %cst_10 : f32 to vector<8x128xf32>
    %17 = arith.mulf %16, %13 : vector<8x128xf32>
    %18 = arith.mulf %17, %13 : vector<8x128xf32>
    %19 = arith.mulf %18, %13 : vector<8x128xf32>
    %20 = arith.addf %13, %19 : vector<8x128xf32>
    %cst_11 = arith.constant 0.797884583 : f32
    %21 = vector.broadcast %cst_11 : f32 to vector<8x128xf32>
    %22 = arith.mulf %21, %20 : vector<8x128xf32>
    %23 = math.tanh %22 : vector<8x128xf32>
    %cst_12 = arith.constant 1.000000e+00 : f32
    %24 = vector.broadcast %cst_12 : f32 to vector<8x128xf32>
    %25 = arith.addf %24, %23 : vector<8x128xf32>
    %26 = arith.mulf %15, %25 : vector<8x128xf32>
    %c128_i32 = arith.constant 128 : i32
    %27 = arith.muli %arg1, %c128_i32 : i32
    %28 = tpu.assume_multiple %27, 128 : i32
    %c0_13 = arith.constant 0 : index
    %29 = arith.index_cast %28 : i32 to index
    %30 = vector.load %arg6[%c0_13, %29] : memref<8x128xf32, #tpu.memory_space<vmem>>, vector<8x128xf32>
    %31 = arith.addf %26, %30 : vector<8x128xf32>
    %c0_14 = arith.constant 0 : index
    %32 = arith.index_cast %28 : i32 to index
    %33 = vector.load %arg5[%c0_14, %32] : memref<8x128xf32, #tpu.memory_space<vmem>>, vector<8x128xf32>
    tpu.vector_store %arg5[%c0_14, %32], %31 {strides = array<i32>} : memref<8x128xf32, #tpu.memory_space<vmem>>, vector<8x128xf32>,
    %c0_i32_15 = arith.constant 0 : i32
    %34 = arith.cmpi eq, %arg1, %c0_i32_15 : i32
    %c1_i32 = arith.constant 1 : i32
    %35 = arith.cmpi slt, %arg0, %c1_i32 : i32
    %36 = arith.andi %34, %35 : i1
    %37 = arith.extui %36 : i1 to i32
    %c0_i32_16 = arith.constant 0 : i32
    %38 = arith.cmpi ne, %37, %c0_i32_16 : i32
    scf.if %38 {
      %c0_17 = arith.constant 0 : index
      %c0_18 = arith.constant 0 : index
      %39 = vector.load %arg5[%c0_17, %c0_18] : memref<8x128xf32, #tpu.memory_space<vmem>>, vector<8x128xf32>
      %c0_19 = arith.constant 0 : index
      %c0_20 = arith.constant 0 : index
      %40 = vector.load %arg6[%c0_19, %c0_20] : memref<8x128xf32, #tpu.memory_space<vmem>>, vector<8x128xf32>
      tpu.vector_store %arg6[%c0_19, %c0_20], %39 {strides = array<i32>} : memref<8x128xf32, #tpu.memory_space<vmem>>, vector<8x128xf32>,
    } else {
    }
    return
  }
  func.func @transform_0(%arg0: i32, %arg1: i32) -> (i32, i32) {
    %c0_i32 = arith.constant 0 : i32
    %c0_i32_0 = arith.constant 0 : i32
    %c0_i32_1 = arith.constant 0 : i32
    return %c0_i32, %c0_i32_0 : i32, i32
  }
  func.func @transform_1(%arg0: i32, %arg1: i32) -> (i32, i32, i32) {
    %c0_i32 = arith.constant 0 : i32
    %c0_i32_0 = arith.constant 0 : i32
    return %arg0, %c0_i32, %arg1 : i32, i32, i32
  }
  func.func @transform_2(%arg0: i32, %arg1: i32) -> (i32, i32, i32) {
    %c0_i32 = arith.constant 0 : i32
    %c0_i32_0 = arith.constant 0 : i32
    return %arg0, %c0_i32, %arg1 : i32, i32, i32
  }
  func.func @transform_3(%arg0: i32, %arg1: i32) -> (i32, i32) {
    %c0_i32 = arith.constant 0 : i32
    %c0_i32_0 = arith.constant 0 : i32
    %c0_i32_1 = arith.constant 0 : i32
    return %c0_i32, %c0_i32_0 : i32, i32
  }
}

module attributes {stable_mosaic.version = 11 : i64} {
  func.func @kernel(%arg0: i32, %arg1: i32, %arg2: memref<8x128xf32, #tpu.memory_space<vmem>>, %arg3: memref<128x128xbf16, #tpu.memory_space<vmem>>, %arg4: memref<1x128xf32, #tpu.memory_space<vmem>>, %arg5: memref<8x128xf32, #tpu.memory_space<vmem>>) attributes {dimension_semantics = [#tpu.dimension_semantics<parallel>, #tpu.dimension_semantics<parallel>], iteration_bounds = array<i64: 1, 1>, scalar_prefetch = 0 : i64, scratch_operands = 0 : i64, tpu.core_type = #tpu.core_type<tc>, window_params = [{transform_indices = @transform_0, window_bounds = array<i64: 8, 128>}, {transform_indices = @transform_1, window_bounds = array<i64: 128, 128>}, {transform_indices = @transform_2, window_bounds = array<i64: 1, 128>}, {transform_indices = @transform_3, window_bounds = array<i64: 8, 128>}]} {
    %c0 = arith.constant 0 : index
    %c0_0 = arith.constant 0 : index
    %0 = vector.load %arg2[%c0, %c0_0] : memref<8x128xf32, #tpu.memory_space<vmem>>, vector<8x128xf32>
    %c0_1 = arith.constant 0 : index
    %c0_2 = arith.constant 0 : index
    %1 = vector.load %arg3[%c0_1, %c0_2] : memref<128x128xbf16, #tpu.memory_space<vmem>>, vector<128x128xbf16>
    %2 = arith.extf %1 : vector<128x128xbf16> to vector<128x128xf32>
    %cst = arith.constant dense<0.000000e+00> : vector<8x128xf32>
    %3 = tpu.matmul %0, %2, %cst {dimension_numbers = #tpu.dot_dimension_numbers<[1], [0], [0], [1], [0, 0, 1, 1], [], []>} : vector<8x128xf32>, vector<128x128xf32>, vector<8x128xf32> -> vector<8x128xf32>
    %c0_3 = arith.constant 0 : index
    %c0_4 = arith.constant 0 : index
    %4 = vector.load %arg4[%c0_3, %c0_4] : memref<1x128xf32, #tpu.memory_space<vmem>>, vector<1x128xf32>
    %5 = vector.broadcast %4 : vector<1x128xf32> to vector<8x128xf32>
    %6 = arith.addf %3, %5 : vector<8x128xf32>
    %cst_5 = arith.constant 5.000000e-01 : f32
    %7 = vector.broadcast %cst_5 : f32 to vector<8x128xf32>
    %8 = arith.mulf %7, %6 : vector<8x128xf32>
    %cst_6 = arith.constant 4.471500e-02 : f32
    %9 = vector.broadcast %cst_6 : f32 to vector<8x128xf32>
    %10 = arith.mulf %9, %6 : vector<8x128xf32>
    %11 = arith.mulf %10, %6 : vector<8x128xf32>
    %12 = arith.mulf %11, %6 : vector<8x128xf32>
    %13 = arith.addf %6, %12 : vector<8x128xf32>
    %cst_7 = arith.constant 0.797884583 : f32
    %14 = vector.broadcast %cst_7 : f32 to vector<8x128xf32>
    %15 = arith.mulf %14, %13 : vector<8x128xf32>
    %16 = math.tanh %15 : vector<8x128xf32>
    %cst_8 = arith.constant 1.000000e+00 : f32
    %17 = vector.broadcast %cst_8 : f32 to vector<8x128xf32>
    %18 = arith.addf %17, %16 : vector<8x128xf32>
    %19 = arith.mulf %8, %18 : vector<8x128xf32>
    %c0_9 = arith.constant 0 : index
    %c0_10 = arith.constant 0 : index
    %20 = vector.load %arg5[%c0_9, %c0_10] : memref<8x128xf32, #tpu.memory_space<vmem>>, vector<8x128xf32>
    tpu.vector_store %arg5[%c0_9, %c0_10], %19 {strides = array<i32>} : memref<8x128xf32, #tpu.memory_space<vmem>>, vector<8x128xf32>,
    return
  }
  func.func @transform_0(%arg0: i32, %arg1: i32) -> (i32, i32) {
    %c0_i32 = arith.constant 0 : i32
    %c0_i32_0 = arith.constant 0 : i32
    return %arg0, %c0_i32 : i32, i32
  }
  func.func @transform_1(%arg0: i32, %arg1: i32) -> (i32, i32) {
    %c0_i32 = arith.constant 0 : i32
    %c0_i32_0 = arith.constant 0 : i32
    return %c0_i32, %arg1 : i32, i32
  }
  func.func @transform_2(%arg0: i32, %arg1: i32) -> (i32, i32) {
    %c0_i32 = arith.constant 0 : i32
    %c0_i32_0 = arith.constant 0 : i32
    return %c0_i32, %arg1 : i32, i32
  }
  func.func @transform_3(%arg0: i32, %arg1: i32) -> (i32, i32) {
    %c0_i32 = arith.constant 0 : i32
    return %arg0, %arg1 : i32, i32
  }
}

module attributes {stable_mosaic.version = 11 : i64} {
  func.func @kernel(%arg0: i32, %arg1: i32, %arg2: memref<8x128xf32, #tpu.memory_space<vmem>>, %arg3: memref<128x128xbf16, #tpu.memory_space<vmem>>, %arg4: memref<1x128xf32, #tpu.memory_space<vmem>>, %arg5: memref<8x128xf32, #tpu.memory_space<vmem>>) attributes {dimension_semantics = [#tpu.dimension_semantics<parallel>, #tpu.dimension_semantics<parallel>], iteration_bounds = array<i64: 1, 2>, scalar_prefetch = 0 : i64, scratch_operands = 0 : i64, tpu.core_type = #tpu.core_type<tc>, window_params = [{transform_indices = @transform_0, window_bounds = array<i64: 8, 128>}, {transform_indices = @transform_1, window_bounds = array<i64: 128, 128>}, {transform_indices = @transform_2, window_bounds = array<i64: 1, 128>}, {transform_indices = @transform_3, window_bounds = array<i64: 8, 128>}]} {
    %c0 = arith.constant 0 : index
    %c0_0 = arith.constant 0 : index
    %0 = vector.load %arg2[%c0, %c0_0] : memref<8x128xf32, #tpu.memory_space<vmem>>, vector<8x128xf32>
    %c0_1 = arith.constant 0 : index
    %c0_2 = arith.constant 0 : index
    %1 = vector.load %arg3[%c0_1, %c0_2] : memref<128x128xbf16, #tpu.memory_space<vmem>>, vector<128x128xbf16>
    %2 = arith.extf %1 : vector<128x128xbf16> to vector<128x128xf32>
    %cst = arith.constant dense<0.000000e+00> : vector<8x128xf32>
    %3 = tpu.matmul %0, %2, %cst {dimension_numbers = #tpu.dot_dimension_numbers<[1], [0], [0], [1], [0, 0, 1, 1], [], []>} : vector<8x128xf32>, vector<128x128xf32>, vector<8x128xf32> -> vector<8x128xf32>
    %c0_3 = arith.constant 0 : index
    %c0_4 = arith.constant 0 : index
    %4 = vector.load %arg4[%c0_3, %c0_4] : memref<1x128xf32, #tpu.memory_space<vmem>>, vector<1x128xf32>
    %5 = vector.broadcast %4 : vector<1x128xf32> to vector<8x128xf32>
    %6 = arith.addf %3, %5 : vector<8x128xf32>
    %cst_5 = arith.constant 5.000000e-01 : f32
    %7 = vector.broadcast %cst_5 : f32 to vector<8x128xf32>
    %8 = arith.mulf %7, %6 : vector<8x128xf32>
    %cst_6 = arith.constant 4.471500e-02 : f32
    %9 = vector.broadcast %cst_6 : f32 to vector<8x128xf32>
    %10 = arith.mulf %9, %6 : vector<8x128xf32>
    %11 = arith.mulf %10, %6 : vector<8x128xf32>
    %12 = arith.mulf %11, %6 : vector<8x128xf32>
    %13 = arith.addf %6, %12 : vector<8x128xf32>
    %cst_7 = arith.constant 0.797884583 : f32
    %14 = vector.broadcast %cst_7 : f32 to vector<8x128xf32>
    %15 = arith.mulf %14, %13 : vector<8x128xf32>
    %16 = math.tanh %15 : vector<8x128xf32>
    %cst_8 = arith.constant 1.000000e+00 : f32
    %17 = vector.broadcast %cst_8 : f32 to vector<8x128xf32>
    %18 = arith.addf %17, %16 : vector<8x128xf32>
    %19 = arith.mulf %8, %18 : vector<8x128xf32>
    %c0_9 = arith.constant 0 : index
    %c0_10 = arith.constant 0 : index
    %20 = vector.load %arg5[%c0_9, %c0_10] : memref<8x128xf32, #tpu.memory_space<vmem>>, vector<8x128xf32>
    tpu.vector_store %arg5[%c0_9, %c0_10], %19 {strides = array<i32>} : memref<8x128xf32, #tpu.memory_space<vmem>>, vector<8x128xf32>,
    return
  }
  func.func @transform_0(%arg0: i32, %arg1: i32) -> (i32, i32) {
    %c0_i32 = arith.constant 0 : i32
    %c0_i32_0 = arith.constant 0 : i32
    return %arg0, %c0_i32 : i32, i32
  }
  func.func @transform_1(%arg0: i32, %arg1: i32) -> (i32, i32) {
    %c0_i32 = arith.constant 0 : i32
    %c0_i32_0 = arith.constant 0 : i32
    return %c0_i32, %arg1 : i32, i32
  }
  func.func @transform_2(%arg0: i32, %arg1: i32) -> (i32, i32) {
    %c0_i32 = arith.constant 0 : i32
    %c0_i32_0 = arith.constant 0 : i32
    return %c0_i32, %arg1 : i32, i32
  }
  func.func @transform_3(%arg0: i32, %arg1: i32) -> (i32, i32) {
    %c0_i32 = arith.constant 0 : i32
    return %arg0, %arg1 : i32, i32
  }
}

module attributes {stable_mosaic.version = 11 : i64} {
  func.func @kernel(%arg0: i32, %arg1: i32, %arg2: memref<8x256xf32, #tpu.memory_space<vmem>>, %arg3: memref<1x256x128xbf16, #tpu.memory_space<vmem>>, %arg4: memref<1x1x128xf32, #tpu.memory_space<vmem>>, %arg5: memref<8x256xf32, #tpu.memory_space<vmem>>, %arg6: memref<8x256xf32, #tpu.memory_space<vmem>>) attributes {dimension_semantics = [#tpu.dimension_semantics<arbitrary>, #tpu.dimension_semantics<arbitrary>], iteration_bounds = array<i64: 2, 2>, scalar_prefetch = 0 : i64, scratch_operands = 1 : i64, tpu.core_type = #tpu.core_type<tc>, window_params = [{pipeline_mode = #tpu.pipeline_mode<synchronous>, transform_indices = @transform_0, window_bounds = array<i64: 8, 256>}, {transform_indices = @transform_1, window_bounds = array<i64: 1, 256, 128>}, {transform_indices = @transform_2, window_bounds = array<i64: 1, 1, 128>}, {pipeline_mode = #tpu.pipeline_mode<synchronous>, transform_indices = @transform_3, window_bounds = array<i64: 8, 256>}]} {
    %c0_i32 = arith.constant 0 : i32
    %0 = arith.cmpi eq, %arg0, %c0_i32 : i32
    %c0_i32_0 = arith.constant 0 : i32
    %1 = arith.cmpi eq, %arg1, %c0_i32_0 : i32
    %2 = arith.andi %0, %1 : i1
    %3 = arith.extui %2 : i1 to i32
    %c0_i32_1 = arith.constant 0 : i32
    %4 = arith.cmpi ne, %3, %c0_i32_1 : i32
    scf.if %4 {
      %c0_17 = arith.constant 0 : index
      %c0_18 = arith.constant 0 : index
      %39 = vector.load %arg2[%c0_17, %c0_18] : memref<8x256xf32, #tpu.memory_space<vmem>>, vector<8x256xf32>
      %c0_19 = arith.constant 0 : index
      %c0_20 = arith.constant 0 : index
      %40 = vector.load %arg6[%c0_19, %c0_20] : memref<8x256xf32, #tpu.memory_space<vmem>>, vector<8x256xf32>
      tpu.vector_store %arg6[%c0_19, %c0_20], %39 {strides = array<i32>} : memref<8x256xf32, #tpu.memory_space<vmem>>, vector<8x256xf32>,
    } else {
    }
    %c0 = arith.constant 0 : index
    %c0_2 = arith.constant 0 : index
    %5 = vector.load %arg6[%c0, %c0_2] : memref<8x256xf32, #tpu.memory_space<vmem>>, vector<8x256xf32>
    %c0_3 = arith.constant 0 : index
    %c0_4 = arith.constant 0 : index
    %c0_5 = arith.constant 0 : index
    %6 = vector.load %arg3[%c0_3, %c0_4, %c0_5] : memref<1x256x128xbf16, #tpu.memory_space<vmem>>, vector<1x256x128xbf16>
    %7 = vector.shape_cast %6 : vector<1x256x128xbf16> to vector<256x128xbf16>
    %8 = arith.extf %7 : vector<256x128xbf16> to vector<256x128xf32>
    %cst = arith.constant dense<0.000000e+00> : vector<8x128xf32>
    %9 = tpu.matmul %5, %8, %cst {dimension_numbers = #tpu.dot_dimension_numbers<[1], [0], [0], [1], [0, 0, 1, 1], [], []>} : vector<8x256xf32>, vector<256x128xf32>, vector<8x128xf32> -> vector<8x128xf32>
    %c0_6 = arith.constant 0 : index
    %c0_7 = arith.constant 0 : index
    %c0_8 = arith.constant 0 : index
    %10 = vector.load %arg4[%c0_6, %c0_7, %c0_8] : memref<1x1x128xf32, #tpu.memory_space<vmem>>, vector<1x1x128xf32>
    %11 = vector.shape_cast %10 : vector<1x1x128xf32> to vector<1x128xf32>
    %12 = vector.broadcast %11 : vector<1x128xf32> to vector<8x128xf32>
    %13 = arith.addf %9, %12 : vector<8x128xf32>
    %cst_9 = arith.constant 5.000000e-01 : f32
    %14 = vector.broadcast %cst_9 : f32 to vector<8x128xf32>
    %15 = arith.mulf %14, %13 : vector<8x128xf32>
    %cst_10 = arith.constant 4.471500e-02 : f32
    %16 = vector.broadcast %cst_10 : f32 to vector<8x128xf32>
    %17 = arith.mulf %16, %13 : vector<8x128xf32>
    %18 = arith.mulf %17, %13 : vector<8x128xf32>
    %19 = arith.mulf %18, %13 : vector<8x128xf32>
    %20 = arith.addf %13, %19 : vector<8x128xf32>
    %cst_11 = arith.constant 0.797884583 : f32
    %21 = vector.broadcast %cst_11 : f32 to vector<8x128xf32>
    %22 = arith.mulf %21, %20 : vector<8x128xf32>
    %23 = math.tanh %22 : vector<8x128xf32>
    %cst_12 = arith.constant 1.000000e+00 : f32
    %24 = vector.broadcast %cst_12 : f32 to vector<8x128xf32>
    %25 = arith.addf %24, %23 : vector<8x128xf32>
    %26 = arith.mulf %15, %25 : vector<8x128xf32>
    %c128_i32 = arith.constant 128 : i32
    %27 = arith.muli %arg1, %c128_i32 : i32
    %28 = tpu.assume_multiple %27, 128 : i32
    %c0_13 = arith.constant 0 : index
    %29 = arith.index_cast %28 : i32 to index
    %30 = vector.load %arg6[%c0_13, %29] : memref<8x256xf32, #tpu.memory_space<vmem>>, vector<8x128xf32>
    %31 = arith.addf %26, %30 : vector<8x128xf32>
    %c0_14 = arith.constant 0 : index
    %32 = arith.index_cast %28 : i32 to index
    %33 = vector.load %arg5[%c0_14, %32] : memref<8x256xf32, #tpu.memory_space<vmem>>, vector<8x128xf32>
    tpu.vector_store %arg5[%c0_14, %32], %31 {strides = array<i32>} : memref<8x256xf32, #tpu.memory_space<vmem>>, vector<8x128xf32>,
    %c1_i32 = arith.constant 1 : i32
    %34 = arith.cmpi eq, %arg1, %c1_i32 : i32
    %c1_i32_15 = arith.constant 1 : i32
    %35 = arith.cmpi slt, %arg0, %c1_i32_15 : i32
    %36 = arith.andi %34, %35 : i1
    %37 = arith.extui %36 : i1 to i32
    %c0_i32_16 = arith.constant 0 : i32
    %38 = arith.cmpi ne, %37, %c0_i32_16 : i32
    scf.if %38 {
      %c0_17 = arith.constant 0 : index
      %c0_18 = arith.constant 0 : index
      %39 = vector.load %arg5[%c0_17, %c0_18] : memref<8x256xf32, #tpu.memory_space<vmem>>, vector<8x256xf32>
      %c0_19 = arith.constant 0 : index
      %c0_20 = arith.constant 0 : index
      %40 = vector.load %arg6[%c0_19, %c0_20] : memref<8x256xf32, #tpu.memory_space<vmem>>, vector<8x256xf32>
      tpu.vector_store %arg6[%c0_19, %c0_20], %39 {strides = array<i32>} : memref<8x256xf32, #tpu.memory_space<vmem>>, vector<8x256xf32>,
    } else {
    }
    return
  }
  func.func @transform_0(%arg0: i32, %arg1: i32) -> (i32, i32) {
    %c0_i32 = arith.constant 0 : i32
    %c0_i32_0 = arith.constant 0 : i32
    %c0_i32_1 = arith.constant 0 : i32
    return %c0_i32, %c0_i32_0 : i32, i32
  }
  func.func @transform_1(%arg0: i32, %arg1: i32) -> (i32, i32, i32) {
    %c0_i32 = arith.constant 0 : i32
    %c0_i32_0 = arith.constant 0 : i32
    return %arg0, %c0_i32, %arg1 : i32, i32, i32
  }
  func.func @transform_2(%arg0: i32, %arg1: i32) -> (i32, i32, i32) {
    %c0_i32 = arith.constant 0 : i32
    %c0_i32_0 = arith.constant 0 : i32
    return %arg0, %c0_i32, %arg1 : i32, i32, i32
  }
  func.func @transform_3(%arg0: i32, %arg1: i32) -> (i32, i32) {
    %c0_i32 = arith.constant 0 : i32
    %c0_i32_0 = arith.constant 0 : i32
    %c0_i32_1 = arith.constant 0 : i32
    return %c0_i32, %c0_i32_0 : i32, i32
  }
}

module attributes {stable_mosaic.version = 11 : i64} {
  func.func @kernel(%arg0: i32, %arg1: i32, %arg2: memref<8x256xf32, #tpu.memory_space<vmem>>, %arg3: memref<256x256xbf16, #tpu.memory_space<vmem>>, %arg4: memref<1x256xf32, #tpu.memory_space<vmem>>, %arg5: memref<8x256xf32, #tpu.memory_space<vmem>>) attributes {dimension_semantics = [#tpu.dimension_semantics<parallel>, #tpu.dimension_semantics<parallel>], iteration_bounds = array<i64: 1, 2>, scalar_prefetch = 0 : i64, scratch_operands = 0 : i64, tpu.core_type = #tpu.core_type<tc>, window_params = [{transform_indices = @transform_0, window_bounds = array<i64: 8, 256>}, {transform_indices = @transform_1, window_bounds = array<i64: 256, 256>}, {transform_indices = @transform_2, window_bounds = array<i64: 1, 256>}, {transform_indices = @transform_3, window_bounds = array<i64: 8, 256>}]} {
    %c0 = arith.constant 0 : index
    %c0_0 = arith.constant 0 : index
    %0 = vector.load %arg2[%c0, %c0_0] : memref<8x256xf32, #tpu.memory_space<vmem>>, vector<8x256xf32>
    %c0_1 = arith.constant 0 : index
    %c0_2 = arith.constant 0 : index
    %1 = vector.load %arg3[%c0_1, %c0_2] : memref<256x256xbf16, #tpu.memory_space<vmem>>, vector<256x256xbf16>
    %2 = arith.extf %1 : vector<256x256xbf16> to vector<256x256xf32>
    %cst = arith.constant dense<0.000000e+00> : vector<8x256xf32>
    %3 = tpu.matmul %0, %2, %cst {dimension_numbers = #tpu.dot_dimension_numbers<[1], [0], [0], [1], [0, 0, 1, 1], [], []>} : vector<8x256xf32>, vector<256x256xf32>, vector<8x256xf32> -> vector<8x256xf32>
    %c0_3 = arith.constant 0 : index
    %c0_4 = arith.constant 0 : index
    %4 = vector.load %arg4[%c0_3, %c0_4] : memref<1x256xf32, #tpu.memory_space<vmem>>, vector<1x256xf32>
    %5 = vector.broadcast %4 : vector<1x256xf32> to vector<8x256xf32>
    %6 = arith.addf %3, %5 : vector<8x256xf32>
    %cst_5 = arith.constant 5.000000e-01 : f32
    %7 = vector.broadcast %cst_5 : f32 to vector<8x256xf32>
    %8 = arith.mulf %7, %6 : vector<8x256xf32>
    %cst_6 = arith.constant 4.471500e-02 : f32
    %9 = vector.broadcast %cst_6 : f32 to vector<8x256xf32>
    %10 = arith.mulf %9, %6 : vector<8x256xf32>
    %11 = arith.mulf %10, %6 : vector<8x256xf32>
    %12 = arith.mulf %11, %6 : vector<8x256xf32>
    %13 = arith.addf %6, %12 : vector<8x256xf32>
    %cst_7 = arith.constant 0.797884583 : f32
    %14 = vector.broadcast %cst_7 : f32 to vector<8x256xf32>
    %15 = arith.mulf %14, %13 : vector<8x256xf32>
    %16 = math.tanh %15 : vector<8x256xf32>
    %cst_8 = arith.constant 1.000000e+00 : f32
    %17 = vector.broadcast %cst_8 : f32 to vector<8x256xf32>
    %18 = arith.addf %17, %16 : vector<8x256xf32>
    %19 = arith.mulf %8, %18 : vector<8x256xf32>
    %c0_9 = arith.constant 0 : index
    %c0_10 = arith.constant 0 : index
    %20 = vector.load %arg5[%c0_9, %c0_10] : memref<8x256xf32, #tpu.memory_space<vmem>>, vector<8x256xf32>
    tpu.vector_store %arg5[%c0_9, %c0_10], %19 {strides = array<i32>} : memref<8x256xf32, #tpu.memory_space<vmem>>, vector<8x256xf32>,
    return
  }
  func.func @transform_0(%arg0: i32, %arg1: i32) -> (i32, i32) {
    %c0_i32 = arith.constant 0 : i32
    %c0_i32_0 = arith.constant 0 : i32
    return %arg0, %c0_i32 : i32, i32
  }
  func.func @transform_1(%arg0: i32, %arg1: i32) -> (i32, i32) {
    %c0_i32 = arith.constant 0 : i32
    %c0_i32_0 = arith.constant 0 : i32
    return %c0_i32, %arg1 : i32, i32
  }
  func.func @transform_2(%arg0: i32, %arg1: i32) -> (i32, i32) {
    %c0_i32 = arith.constant 0 : i32
    %c0_i32_0 = arith.constant 0 : i32
    return %c0_i32, %arg1 : i32, i32
  }
  func.func @transform_3(%arg0: i32, %arg1: i32) -> (i32, i32) {
    %c0_i32 = arith.constant 0 : i32
    return %arg0, %arg1 : i32, i32
  }
}

module attributes {stable_mosaic.version = 11 : i64} {
  func.func @kernel(%arg0: i32, %arg1: i32, %arg2: memref<8x512xf32, #tpu.memory_space<vmem>>, %arg3: memref<1x512x256xbf16, #tpu.memory_space<vmem>>, %arg4: memref<1x1x256xf32, #tpu.memory_space<vmem>>, %arg5: memref<8x512xf32, #tpu.memory_space<vmem>>, %arg6: memref<8x512xf32, #tpu.memory_space<vmem>>) attributes {dimension_semantics = [#tpu.dimension_semantics<arbitrary>, #tpu.dimension_semantics<arbitrary>], iteration_bounds = array<i64: 2, 2>, scalar_prefetch = 0 : i64, scratch_operands = 1 : i64, tpu.core_type = #tpu.core_type<tc>, window_params = [{pipeline_mode = #tpu.pipeline_mode<synchronous>, transform_indices = @transform_0, window_bounds = array<i64: 8, 512>}, {transform_indices = @transform_1, window_bounds = array<i64: 1, 512, 256>}, {transform_indices = @transform_2, window_bounds = array<i64: 1, 1, 256>}, {pipeline_mode = #tpu.pipeline_mode<synchronous>, transform_indices = @transform_3, window_bounds = array<i64: 8, 512>}]} {
    %c0_i32 = arith.constant 0 : i32
    %0 = arith.cmpi eq, %arg0, %c0_i32 : i32
    %c0_i32_0 = arith.constant 0 : i32
    %1 = arith.cmpi eq, %arg1, %c0_i32_0 : i32
    %2 = arith.andi %0, %1 : i1
    %3 = arith.extui %2 : i1 to i32
    %c0_i32_1 = arith.constant 0 : i32
    %4 = arith.cmpi ne, %3, %c0_i32_1 : i32
    scf.if %4 {
      %c0_17 = arith.constant 0 : index
      %c0_18 = arith.constant 0 : index
      %39 = vector.load %arg2[%c0_17, %c0_18] : memref<8x512xf32, #tpu.memory_space<vmem>>, vector<8x512xf32>
      %c0_19 = arith.constant 0 : index
      %c0_20 = arith.constant 0 : index
      %40 = vector.load %arg6[%c0_19, %c0_20] : memref<8x512xf32, #tpu.memory_space<vmem>>, vector<8x512xf32>
      tpu.vector_store %arg6[%c0_19, %c0_20], %39 {strides = array<i32>} : memref<8x512xf32, #tpu.memory_space<vmem>>, vector<8x512xf32>,
    } else {
    }
    %c0 = arith.constant 0 : index
    %c0_2 = arith.constant 0 : index
    %5 = vector.load %arg6[%c0, %c0_2] : memref<8x512xf32, #tpu.memory_space<vmem>>, vector<8x512xf32>
    %c0_3 = arith.constant 0 : index
    %c0_4 = arith.constant 0 : index
    %c0_5 = arith.constant 0 : index
    %6 = vector.load %arg3[%c0_3, %c0_4, %c0_5] : memref<1x512x256xbf16, #tpu.memory_space<vmem>>, vector<1x512x256xbf16>
    %7 = vector.shape_cast %6 : vector<1x512x256xbf16> to vector<512x256xbf16>
    %8 = arith.extf %7 : vector<512x256xbf16> to vector<512x256xf32>
    %cst = arith.constant dense<0.000000e+00> : vector<8x256xf32>
    %9 = tpu.matmul %5, %8, %cst {dimension_numbers = #tpu.dot_dimension_numbers<[1], [0], [0], [1], [0, 0, 1, 1], [], []>} : vector<8x512xf32>, vector<512x256xf32>, vector<8x256xf32> -> vector<8x256xf32>
    %c0_6 = arith.constant 0 : index
    %c0_7 = arith.constant 0 : index
    %c0_8 = arith.constant 0 : index
    %10 = vector.load %arg4[%c0_6, %c0_7, %c0_8] : memref<1x1x256xf32, #tpu.memory_space<vmem>>, vector<1x1x256xf32>
    %11 = vector.shape_cast %10 : vector<1x1x256xf32> to vector<1x256xf32>
    %12 = vector.broadcast %11 : vector<1x256xf32> to vector<8x256xf32>
    %13 = arith.addf %9, %12 : vector<8x256xf32>
    %cst_9 = arith.constant 5.000000e-01 : f32
    %14 = vector.broadcast %cst_9 : f32 to vector<8x256xf32>
    %15 = arith.mulf %14, %13 : vector<8x256xf32>
    %cst_10 = arith.constant 4.471500e-02 : f32
    %16 = vector.broadcast %cst_10 : f32 to vector<8x256xf32>
    %17 = arith.mulf %16, %13 : vector<8x256xf32>
    %18 = arith.mulf %17, %13 : vector<8x256xf32>
    %19 = arith.mulf %18, %13 : vector<8x256xf32>
    %20 = arith.addf %13, %19 : vector<8x256xf32>
    %cst_11 = arith.constant 0.797884583 : f32
    %21 = vector.broadcast %cst_11 : f32 to vector<8x256xf32>
    %22 = arith.mulf %21, %20 : vector<8x256xf32>
    %23 = math.tanh %22 : vector<8x256xf32>
    %cst_12 = arith.constant 1.000000e+00 : f32
    %24 = vector.broadcast %cst_12 : f32 to vector<8x256xf32>
    %25 = arith.addf %24, %23 : vector<8x256xf32>
    %26 = arith.mulf %15, %25 : vector<8x256xf32>
    %c256_i32 = arith.constant 256 : i32
    %27 = arith.muli %arg1, %c256_i32 : i32
    %28 = tpu.assume_multiple %27, 256 : i32
    %c0_13 = arith.constant 0 : index
    %29 = arith.index_cast %28 : i32 to index
    %30 = vector.load %arg6[%c0_13, %29] : memref<8x512xf32, #tpu.memory_space<vmem>>, vector<8x256xf32>
    %31 = arith.addf %26, %30 : vector<8x256xf32>
    %c0_14 = arith.constant 0 : index
    %32 = arith.index_cast %28 : i32 to index
    %33 = vector.load %arg5[%c0_14, %32] : memref<8x512xf32, #tpu.memory_space<vmem>>, vector<8x256xf32>
    tpu.vector_store %arg5[%c0_14, %32], %31 {strides = array<i32>} : memref<8x512xf32, #tpu.memory_space<vmem>>, vector<8x256xf32>,
    %c1_i32 = arith.constant 1 : i32
    %34 = arith.cmpi eq, %arg1, %c1_i32 : i32
    %c1_i32_15 = arith.constant 1 : i32
    %35 = arith.cmpi slt, %arg0, %c1_i32_15 : i32
    %36 = arith.andi %34, %35 : i1
    %37 = arith.extui %36 : i1 to i32
    %c0_i32_16 = arith.constant 0 : i32
    %38 = arith.cmpi ne, %37, %c0_i32_16 : i32
    scf.if %38 {
      %c0_17 = arith.constant 0 : index
      %c0_18 = arith.constant 0 : index
      %39 = vector.load %arg5[%c0_17, %c0_18] : memref<8x512xf32, #tpu.memory_space<vmem>>, vector<8x512xf32>
      %c0_19 = arith.constant 0 : index
      %c0_20 = arith.constant 0 : index
      %40 = vector.load %arg6[%c0_19, %c0_20] : memref<8x512xf32, #tpu.memory_space<vmem>>, vector<8x512xf32>
      tpu.vector_store %arg6[%c0_19, %c0_20], %39 {strides = array<i32>} : memref<8x512xf32, #tpu.memory_space<vmem>>, vector<8x512xf32>,
    } else {
    }
    return
  }
  func.func @transform_0(%arg0: i32, %arg1: i32) -> (i32, i32) {
    %c0_i32 = arith.constant 0 : i32
    %c0_i32_0 = arith.constant 0 : i32
    %c0_i32_1 = arith.constant 0 : i32
    return %c0_i32, %c0_i32_0 : i32, i32
  }
  func.func @transform_1(%arg0: i32, %arg1: i32) -> (i32, i32, i32) {
    %c0_i32 = arith.constant 0 : i32
    %c0_i32_0 = arith.constant 0 : i32
    return %arg0, %c0_i32, %arg1 : i32, i32, i32
  }
  func.func @transform_2(%arg0: i32, %arg1: i32) -> (i32, i32, i32) {
    %c0_i32 = arith.constant 0 : i32
    %c0_i32_0 = arith.constant 0 : i32
    return %arg0, %c0_i32, %arg1 : i32, i32, i32
  }
  func.func @transform_3(%arg0: i32, %arg1: i32) -> (i32, i32) {
    %c0_i32 = arith.constant 0 : i32
    %c0_i32_0 = arith.constant 0 : i32
    %c0_i32_1 = arith.constant 0 : i32
    return %c0_i32, %c0_i32_0 : i32, i32
  }
}

module attributes {stable_mosaic.version = 11 : i64} {
  func.func @kernel(%arg0: i32, %arg1: i32, %arg2: memref<8x512xf32, #tpu.memory_space<vmem>>, %arg3: memref<512x128xbf16, #tpu.memory_space<vmem>>, %arg4: memref<1x128xf32, #tpu.memory_space<vmem>>, %arg5: memref<8x128xf32, #tpu.memory_space<vmem>>) attributes {dimension_semantics = [#tpu.dimension_semantics<parallel>, #tpu.dimension_semantics<parallel>], iteration_bounds = array<i64: 1, 2>, scalar_prefetch = 0 : i64, scratch_operands = 0 : i64, tpu.core_type = #tpu.core_type<tc>, window_params = [{transform_indices = @transform_0, window_bounds = array<i64: 8, 512>}, {transform_indices = @transform_1, window_bounds = array<i64: 512, 128>}, {transform_indices = @transform_2, window_bounds = array<i64: 1, 128>}, {transform_indices = @transform_3, window_bounds = array<i64: 8, 128>}]} {
    %c0 = arith.constant 0 : index
    %c0_0 = arith.constant 0 : index
    %0 = vector.load %arg2[%c0, %c0_0] : memref<8x512xf32, #tpu.memory_space<vmem>>, vector<8x512xf32>
    %c0_1 = arith.constant 0 : index
    %c0_2 = arith.constant 0 : index
    %1 = vector.load %arg3[%c0_1, %c0_2] : memref<512x128xbf16, #tpu.memory_space<vmem>>, vector<512x128xbf16>
    %2 = arith.extf %1 : vector<512x128xbf16> to vector<512x128xf32>
    %cst = arith.constant dense<0.000000e+00> : vector<8x128xf32>
    %3 = tpu.matmul %0, %2, %cst {dimension_numbers = #tpu.dot_dimension_numbers<[1], [0], [0], [1], [0, 0, 1, 1], [], []>} : vector<8x512xf32>, vector<512x128xf32>, vector<8x128xf32> -> vector<8x128xf32>
    %c0_3 = arith.constant 0 : index
    %c0_4 = arith.constant 0 : index
    %4 = vector.load %arg4[%c0_3, %c0_4] : memref<1x128xf32, #tpu.memory_space<vmem>>, vector<1x128xf32>
    %5 = vector.broadcast %4 : vector<1x128xf32> to vector<8x128xf32>
    %6 = arith.addf %3, %5 : vector<8x128xf32>
    %7 = math.tanh %6 : vector<8x128xf32>
    %c0_5 = arith.constant 0 : index
    %c0_6 = arith.constant 0 : index
    %8 = vector.load %arg5[%c0_5, %c0_6] : memref<8x128xf32, #tpu.memory_space<vmem>>, vector<8x128xf32>
    tpu.vector_store %arg5[%c0_5, %c0_6], %7 {strides = array<i32>} : memref<8x128xf32, #tpu.memory_space<vmem>>, vector<8x128xf32>,
    return
  }
  func.func @transform_0(%arg0: i32, %arg1: i32) -> (i32, i32) {
    %c0_i32 = arith.constant 0 : i32
    %c0_i32_0 = arith.constant 0 : i32
    return %arg0, %c0_i32 : i32, i32
  }
  func.func @transform_1(%arg0: i32, %arg1: i32) -> (i32, i32) {
    %c0_i32 = arith.constant 0 : i32
    %c0_i32_0 = arith.constant 0 : i32
    return %c0_i32, %arg1 : i32, i32
  }
  func.func @transform_2(%arg0: i32, %arg1: i32) -> (i32, i32) {
    %c0_i32 = arith.constant 0 : i32
    %c0_i32_0 = arith.constant 0 : i32
    return %c0_i32, %arg1 : i32, i32
  }
  func.func @transform_3(%arg0: i32, %arg1: i32) -> (i32, i32) {
    %c0_i32 = arith.constant 0 : i32
    return %arg0, %arg1 : i32, i32
  }
}

module attributes {stable_mosaic.version = 11 : i64} {
  func.func @kernel(%arg0: i32, %arg1: i32, %arg2: memref<8x256xf32, #tpu.memory_space<vmem>>, %arg3: memref<256x128xbf16, #tpu.memory_space<vmem>>, %arg4: memref<8x128xf32, #tpu.memory_space<vmem>>) attributes {dimension_semantics = [#tpu.dimension_semantics<parallel>, #tpu.dimension_semantics<parallel>], iteration_bounds = array<i64: 1, 3>, scalar_prefetch = 0 : i64, scratch_operands = 0 : i64, tpu.core_type = #tpu.core_type<tc>, window_params = [{transform_indices = @transform_0, window_bounds = array<i64: 8, 256>}, {transform_indices = @transform_1, window_bounds = array<i64: 256, 128>}, {transform_indices = @transform_2, window_bounds = array<i64: 8, 128>}]} {
    %c0 = arith.constant 0 : index
    %c0_0 = arith.constant 0 : index
    %0 = vector.load %arg2[%c0, %c0_0] : memref<8x256xf32, #tpu.memory_space<vmem>>, vector<8x256xf32>
    %c0_1 = arith.constant 0 : index
    %c0_2 = arith.constant 0 : index
    %1 = vector.load %arg3[%c0_1, %c0_2] : memref<256x128xbf16, #tpu.memory_space<vmem>>, vector<256x128xbf16>
    %2 = arith.extf %1 : vector<256x128xbf16> to vector<256x128xf32>
    %cst = arith.constant dense<0.000000e+00> : vector<8x128xf32>
    %3 = tpu.matmul %0, %2, %cst {dimension_numbers = #tpu.dot_dimension_numbers<[1], [0], [0], [1], [0, 0, 1, 1], [], []>} : vector<8x256xf32>, vector<256x128xf32>, vector<8x128xf32> -> vector<8x128xf32>
    %c0_3 = arith.constant 0 : index
    %c0_4 = arith.constant 0 : index
    %4 = vector.load %arg4[%c0_3, %c0_4] : memref<8x128xf32, #tpu.memory_space<vmem>>, vector<8x128xf32>
    tpu.vector_store %arg4[%c0_3, %c0_4], %3 {strides = array<i32>} : memref<8x128xf32, #tpu.memory_space<vmem>>, vector<8x128xf32>,
    return
  }
  func.func @transform_0(%arg0: i32, %arg1: i32) -> (i32, i32) {
    %c0_i32 = arith.constant 0 : i32
    %c0_i32_0 = arith.constant 0 : i32
    return %arg0, %c0_i32 : i32, i32
  }
  func.func @transform_1(%arg0: i32, %arg1: i32) -> (i32, i32) {
    %c0_i32 = arith.constant 0 : i32
    %c0_i32_0 = arith.constant 0 : i32
    return %c0_i32, %arg1 : i32, i32
  }
  func.func @transform_2(%arg0: i32, %arg1: i32) -> (i32, i32) {
    %c0_i32 = arith.constant 0 : i32
    return %arg0, %arg1 : i32, i32
  }
}

</mosaic_0001>

<bundles_post_ra>
// kernel: res_generator_forward.10
= control target key start
LH: loop header
LB: loop body
LE: loop exit
PB: predicated region body
PF: predicated region fallthrough
CT: control target
= control target key end

     0   :  { %8 = vsyncpa [#allocation3], 0  ;;  %s348_s0 = inlined_call_operand.vmem [shape: f32[8,128], index: 0, kind: input, shape index: {}]   ;;  %s349_s1 = inlined_call_operand.hbm [shape: bf16[128,128], index: 1, kind: input, shape index: {}]   ;;  %s350_s2 = inlined_call_operand.hbm [shape: f32[1,128], index: 2, kind: input, shape index: {}]   ;;  %s351_s3 = inlined_call_operand.vmem [shape: f32[8,128], index: 3, kind: output, shape index: {}]  }
   0x1   :  { %9 = vsyncpa [#allocation5], 0  ;;  %s310_s12 = smov [#allocation2]  }
   0x2   :  { %s17_s13 = sshll.u32 %s310_s12, 4  ;;  %s18_s13 = int_to_ptr.vmem [resolvable:$true] %s17_s13 }
   0x3   :  { %s274_s14 = scalar_lea.vmem %s18_s13, 1024  ;;  %p279_p1 = scmp.lt.s32.totalorder %s18_s13, %s18_s13 }
   0x4   :  { %p275_p0 = scmp.ne.s32.totalorder %s18_s13, %s274_s14  ;;  %p280_p2 = scmp.lt.s32.totalorder %s274_s14, %s274_s14 }
   0x6   :  { %p281_p3 = por %p280_p2, %p279_p1 }
   0x8   :  { %p282_p4 = pnand %p281_p3, %p275_p0 }
   0xa   :  { %285 = shalt.err (!%p282_p4)
}
   0xb   :  { %s311_s15 = smov 64   ;;  %s312_s16 = smov 4  }
   0xc   :  { %23 = dma.hbm_to_vmem [thread:$0]  %s349_s1, 1024, %s18_s13, [#allocation3], %s311_s15, %s311_s15, %s312_s16  }
   0xd   :  { %s313_s19 = smov [#allocation4]  }
   0xe   :  { %s30_s20 = sshll.u32 %s313_s19, 4  ;;  %s31_s20 = int_to_ptr.vmem [resolvable:$true] %s30_s20 }
   0xf   :  { %s294_s21 = scalar_lea.vmem %s31_s20, 16  ;;  %s298_s22 = scalar_lea.vmem %s31_s20, 32 }
  0x10   :  { %p295_p5 = scmp.ne.s32.totalorder %s31_s20, %s294_s21  ;;  %p299_p6 = scmp.lt.s32.totalorder %s31_s20, %s31_s20 }
  0x11   :  { %p300_p7 = scmp.lt.s32.totalorder %s298_s22, %s294_s21 }
  0x13   :  { %p301_p8 = por %p300_p7, %p299_p6 }
  0x15   :  { %p302_p9 = pnand %p301_p8, %p295_p5 }
  0x17   :  { %305 = shalt.err (!%p302_p9)
}
  0x18   :  { %33 = dma.hbm_to_vmem [thread:$0]  %s350_s2, 16, %s31_s20, [#allocation5]  }
  0x19   :  { %306 = dma.done.wait [#allocation3], 1024  }
  0x1a   :  { %307 = vsyncadd [#allocation3], 4294966272 }
  0x1b   :  { %308 = dma.done.wait [#allocation5], 16  }
  0x1c   :  { %309 = vsyncadd [#allocation5], 4294967280  ;;  %v314_v0 = vmov 0.0   ;;  %vm315_vm0 = vmmov 0   ;;  %v205_v1 = vld [vmem:[#allocation2 + $0x38] sm:$0xff]   ;;  %v204_v2 = vld [vmem:[#allocation2 + $0x30] sm:$0xff]  }
  0x1d   :  { %223 = vmatprep.subr.mxu0 %v314_v0  ;;  %255 = vmatprep.mubr.msk.f32.mxu0 %vm315_vm0, %v314_v0  ;;  %v197_v3 = vunpack.c.l.bf16 %v205_v1  ;;  %v198_v4 = vunpack.c.h.bf16 %v205_v1  ;;  %v194_v5 = vunpack.c.h.bf16 %v204_v2  ;;  %v203_v6 = vld [vmem:[#allocation2 + $0x28] sm:$0xff]   ;;  %v193_v7 = vunpack.c.l.bf16 %v204_v2  ;;  %v202_v9 = vld [vmem:[#allocation2 + $0x20] sm:$0xff]   ;;  %v201_v12 = vld [vmem:[#allocation2 + $0x18] sm:$0xff]  }
  0x1e   :  { %v190_v8 = vunpack.c.h.bf16 %v203_v6  ;;  %v189_v10 = vunpack.c.l.bf16 %v203_v6  ;;  %v186_v11 = vunpack.c.h.bf16 %v202_v9  ;;  %v185_v13 = vunpack.c.l.bf16 %v202_v9  ;;  %v200_v15 = vld [vmem:[#allocation2 + $0x10] sm:$0xff]   ;;  %v199_v18 = vld [vmem:[#allocation2 + $0x8] sm:$0xff]   ;;  %v168_v21 = vld [vmem:[#allocation2] sm:$0xff]  }
  0x1f   :  { %224 = vmatpush3.msra.mxu0 %v198_v4  ;;  %v182_v14 = vunpack.c.h.bf16 %v201_v12  ;;  %v181_v16 = vunpack.c.l.bf16 %v201_v12  ;;  %v178_v17 = vunpack.c.h.bf16 %v200_v15  ;;  %v177_v19 = vunpack.c.l.bf16 %v200_v15  ;;  %v40_v25 = vld [vmem:[%s348_s0] sm:$0xff] }
  0x20   :  { %225 = vmatprep.subr.mxu0 %v314_v0  ;;  %v174_v20 = vunpack.c.h.bf16 %v199_v18  ;;  %v173_v22 = vunpack.c.l.bf16 %v199_v18  ;;  %v170_v23 = vunpack.c.h.bf16 %v168_v21  ;;  %v169_v24 = vunpack.c.l.bf16 %v168_v21  ;;  %v166_v26 = vld [vmem:[#allocation4] ss:$0 sm:$0xff] }
  0x21   :  { %226 = vmatpush3.msra.mxu0 %v197_v3 }
  0x22   :  { %227 = vmatprep.subr.mxu0 %v314_v0 }
  0x23   :  { %228 = vmatpush3.msra.mxu0 %v194_v5 }
  0x24   :  { %229 = vmatprep.subr.mxu0 %v314_v0 }
  0x25   :  { %230 = vmatpush3.msra.mxu0 %v193_v7 }
  0x26   :  { %231 = vmatprep.subr.mxu0 %v314_v0 }
  0x27   :  { %232 = vmatpush3.msra.mxu0 %v190_v8 }
  0x28   :  { %233 = vmatprep.subr.mxu0 %v314_v0 }
  0x29   :  { %234 = vmatpush3.msra.mxu0 %v189_v10 }
  0x2a   :  { %235 = vmatprep.subr.mxu0 %v314_v0 }
  0x2b   :  { %236 = vmatpush3.msra.mxu0 %v186_v11 }
  0x2c   :  { %237 = vmatprep.subr.mxu0 %v314_v0 }
  0x2d   :  { %238 = vmatpush3.msra.mxu0 %v185_v13 }
  0x2e   :  { %239 = vmatprep.subr.mxu0 %v314_v0 }
  0x2f   :  { %240 = vmatpush3.msra.mxu0 %v182_v14 }
  0x30   :  { %241 = vmatprep.subr.mxu0 %v314_v0 }
  0x31   :  { %242 = vmatpush3.msra.mxu0 %v181_v16 }
  0x32   :  { %243 = vmatprep.subr.mxu0 %v314_v0 }
  0x33   :  { %244 = vmatpush3.msra.mxu0 %v178_v17 }
  0x34   :  { %245 = vmatprep.subr.mxu0 %v314_v0 }
  0x35   :  { %246 = vmatpush3.msra.mxu0 %v177_v19 }
  0x36   :  { %247 = vmatprep.subr.mxu0 %v314_v0 }
  0x37   :  { %248 = vmatpush3.msra.mxu0 %v174_v20 }
  0x38   :  { %249 = vmatprep.subr.mxu0 %v314_v0 }
  0x39   :  { %250 = vmatpush3.msra.mxu0 %v173_v22 }
  0x3a   :  { %251 = vmatprep.subr.mxu0 %v314_v0 }
  0x3b   :  { %252 = vmatpush3.msra.mxu0 %v170_v23 }
  0x3c   :  { %253 = vmatprep.subr.mxu0 %v314_v0 }
  0x3d   :  { %254 = vmatpush3.msra.mxu0 %v169_v24 }
  0x3e   :  { %256 = vmatmul.mubr.f32.vlgmr.msra.gmra.mxu0 %v40_v25 }
  0xfe   :  { %v146_v27 = vpop.f32.mrf.mxu0 }
  0xff   :  { %v147_v28 = vadd.f32 %v166_v26, %v146_v27 }
 0x100   :  { %v257_v29 = vpop.f32.mrf.mxu0 }
 0x101   :  { %v151_v30 = vmul.f32 0.044715, %v147_v28  ;;  %v150_v36 = vmul.f32 0.5, %v147_v28 }
 0x103   :  { %v152_v31 = vmul.f32 %v151_v30, %v147_v28 }
 0x105   :  { %v153_v32 = vmul.f32 %v152_v31, %v147_v28 }
 0x107   :  { %v154_v33 = vadd.f32 %v153_v32, %v147_v28 }
 0x109   :  { %v155_v34 = vmul.f32 0.7978846, %v154_v33 }
 0x10b   :  { %264 = vtanh.f32 %v155_v34 }
 0x118   :  { %v265_v35 = vpop.eup %264 }
 0x119   :  { %v157_v37 = vadd.f32 1.0, %v265_v35 }
 0x11b   :  { %v158_v38 = vmul.f32 %v157_v37, %v150_v36 }
 0x11d   :  { %159 = vst [vmem:[%s351_s3] sm:$0xff] %v158_v38 }
 0x11e   :  { %164 = vsyncpa [#allocation3], 1 }
 0x11f   :  { %165 = vsyncpa [#allocation5], 1 }

// kernel: res_generator_forward.11
= control target key start
LH: loop header
LB: loop body
LE: loop exit
PB: predicated region body
PF: predicated region fallthrough
CT: control target
= control target key end

     0   :  { %8 = vsyncpa [#allocation4], 0  ;;  %s905_s0 = inlined_call_operand.vmem [shape: f32[8,128], index: 0, kind: input, shape index: {}]   ;;  %s906_s1 = inlined_call_operand.hbm [shape: bf16[2,128,128], index: 1, kind: input, shape index: {}]   ;;  %s907_s2 = inlined_call_operand.hbm [shape: f32[2,1,128], index: 2, kind: input, shape index: {}]   ;;  %s908_s3 = inlined_call_operand.vmem [shape: f32[8,128], index: 3, kind: output, shape index: {}]  }
   0x1   :  { %10 = vsyncpa [#allocation4 + $0x1], 0 }
   0x2   :  { %11 = vsyncpa [#allocation6], 0 }
   0x3   :  { %13 = vsyncpa [#allocation6 + $0x1], 0  ;;  %s755_s12 = smov 0   ;;  %s757_s13 = smov 0  }
   0x4   :  { %s759_s14 = smov 0   ;;  %s761_s15 = smov 0  }
   0x5   :  { %s763_s16 = smov 0   ;;  %s765_s17 = smov 0  }
   0x6 LB: > { %s443_s18 = sadd.s32 4294967295, %s727_s17   ;;  %s31_s19 = sadd.s32 1, %s723_s16  ;;  %s727_s17 = sphi %s765_s17, %s19_s17   ;;  %s723_s16 = sphi %s763_s16, %s917_s16   ;;  %s719_s15 = sphi %s761_s15, %s916_s15   ;;  %s715_s14 = sphi %s759_s14, %s915_s14   ;;  %s711_s13 = sphi %s757_s13, %s914_s13   ;;  %s707_s12 = sphi %s755_s12, %s913_s12  }
   0x7   : > { %p33_p0 = scmp.ge.s32.totalorder %s31_s19, 2  ;;  %s61_s20 = sadd.s32 1, %s715_s14 }
   0x8   : > { %p68_p1 = scmp.ne.s32.totalorder %s715_s14, %s711_s13  ;;  %p69_p2 = scmp.eq.s32.totalorder %s727_s17, 0 }
   0x9   : > { %s919_s19 = smov (%p33_p0, %s31_s19), 0  ;;  %p74_p4 = scmp.ne.s32.totalorder %s711_s13, %s707_s12 }
   0xa   : > { %p791_p3 = por %p69_p2, %p68_p1  ;;  %s56_s22 = ssub.s32 %s723_s16, %s919_s19 }
   0xb   : > { %p75_p5 = scmp.eq.s32.totalorder %s443_s18, 0  ;;  %p59_p6 = scmp.eq.s32.totalorder %s56_s22, 0 }
   0xc   : > { %p562_p8 = scmp.lt.s32.totalorder %s727_s17, 2  ;;  %s807_s25 = sand.u32 1, %s715_s14  }
   0xd   : > { %p798_p7 = por %p75_p5, %p74_p4  ;;  %s457_s26 = sshll.u32 %s723_s16, 10 }
   0xe   : > { %s804_s24 = scalar_select %p59_p6, %s715_s14, %s61_s20  }
   0xf   : > { %s446_s27 = sshll.u32 %s807_s25, 6  ;;  %s161_s30 = scalar_lea.hbm %s906_s1, %s457_s26 }
  0x10   : > { %s154_s4 = scalar_lea.vmem [#allocation3], %s446_s27  ;;  %p816_p9 = pnand %p562_p8, %p791_p3 }
  0x11   : > { %s162_s5 = sshll.u32 %s154_s4, 4  ;;  %s151_s7 = scalar_lea.sflag [#allocation4], %s807_s25  ;;  %s163_s5 = int_to_ptr.vmem [resolvable:$true] %s162_s5 }
  0x12   : > { %p619_p10 = pneg %p816_p9  ;;  %s630_s8 = scalar_lea.vmem %s163_s5, 1024 }
  0x13   : > { %p631_p11 = scmp.ne.s32.totalorder %s163_s5, %s630_s8  ;;  %s729_s9 = smov [#allocation3]  }
  0x14   : > { %s635_s10 = sshll.u32 %s729_s9, 4  ;;  %s636_s10 = int_to_ptr.vmem [resolvable:$false] %s635_s10 }
  0x15   : > { %p633_p12 = pnand %p631_p11, %p619_p10  ;;  %s637_s11 = scalar_lea.vmem %s636_s10, 2048 }
  0x16   : > { %p638_p0 = scmp.lt.s32.totalorder %s163_s5, %s636_s10  ;;  %p639_p1 = scmp.lt.s32.totalorder %s637_s11, %s630_s8 }
  0x17   : > { %p634_p13 = pneg %p633_p12 }
  0x18   : > { %p640_p2 = por %p639_p1, %p638_p0 }
  0x1a   : > { %p641_p3 = pnand %p640_p2, %p634_p13 }
  0x1c   : > { %644 = shalt.err (!%p641_p3)
}
  0x1d   : > { %s730_s12 = smov 64   ;;  %s731_s18 = smov 4  }
  0x1e   : > { %558 = dma.hbm_to_vmem [thread:$0]  (!%p816_p9), %s161_s30, 1024, %s163_s5, %s151_s7, %s730_s12, %s730_s12, %s731_s18  }
  0x1f   : > { %p450_p4 = scmp.ge.s32.totalorder %s727_s17, 1  ;;  %p188_p5 = scmp.lt.s32.totalorder %s727_s17, 3 }
  0x20   : > { %s449_s21 = sshll.u32 %s723_s16, 4  ;;  %s175_s28 = scalar_lea.vmem [#allocation5], %s807_s25 }
  0x21   : > { %p830_p6 = pnand %p450_p4, %p188_p5  ;;  %s181_s27 = scalar_lea.hbm %s907_s2, %s449_s21 }
  0x22   : > { %s183_s29 = sshll.u32 %s175_s28, 4  ;;  %s173_s4 = scalar_lea.sflag [#allocation6], %s807_s25  ;;  %s184_s29 = int_to_ptr.vmem [resolvable:$true] %s183_s29 }
  0x23   : > { %s658_s8 = scalar_lea.vmem %s184_s29, 16  ;;  %s732_s30 = smov [#allocation5]  }
  0x24   : > { %p659_p8 = scmp.ne.s32.totalorder %s184_s29, %s658_s8  ;;  %s663_s5 = sshll.u32 %s732_s30, 4  ;;  %s664_s5 = int_to_ptr.vmem [resolvable:$false] %s663_s5 }
  0x25   : > { %s665_s7 = scalar_lea.vmem %s664_s5, 32  ;;  %p666_p13 = scmp.lt.s32.totalorder %s184_s29, %s664_s5 }
  0x26   : > { %p661_p11 = pnand %p659_p8, %p619_p10  ;;  %p667_p0 = scmp.lt.s32.totalorder %s665_s7, %s658_s8 }
  0x28   : > { %p662_p12 = pneg %p661_p11  ;;  %p668_p1 = por %p667_p0, %p666_p13 }
  0x2a   : > { %p669_p2 = pnand %p668_p1, %p662_p12 }
  0x2c   : > { %672 = shalt.err (!%p669_p2)
}
  0x2d   : > { %561 = dma.hbm_to_vmem [thread:$0]  (!%p816_p9), %s181_s27, 16, %s184_s29, %s173_s4  }
  0x2e   : > { %192 = sbr.rel (%p830_p6) target bundleno = 329 (0x149), region = 32  ;;  %s848_s25 = sand.u32 (!%p830_p6), 1, %s711_s13  }
  0x2f   : > { %s451_s9 = sshll.u32 (!%p830_p6), %s848_s25, 6  ;;  %s195_s10 = scalar_lea.sflag (!%p830_p6), [#allocation4], %s848_s25 }
  0x30   : > { %s852_s11 = scalar_lea.vmem (!%p830_p6), [#allocation3], %s451_s9 }
  0x33   : > { %698 = dma.done.wait (%p798_p7), %s195_s10, 1024  }
  0x34   : > { %700 = vsyncadd (%p798_p7), %s195_s10, 4294966272  ;;  %s204_s6 = scalar_lea.sflag [#allocation6], %s848_s25  ;;  %s206_s12 = scalar_lea.vmem [#allocation5], %s848_s25 }
  0x35   : > { %702 = dma.done.wait (%p798_p7), %s204_s6, 16  }
  0x36   : > { %704 = vsyncadd (%p798_p7), %s204_s6, 4294967280  ;;  %p228_p9 = scmp.eq.s32.totalorder %s719_s15, 0 }
  0x37   : > { %v234_v0 = vld [vmem:[%s905_s0] sm:$0xff] (%p228_p9) }
  0x38   : > { %233 = sbr.rel (!%p228_p9) target bundleno = 61 (0x3d), region = 44  ;;  %235 = vst [vmem:[#allocation2] sm:$0xff] (%p228_p9), %v234_v0 }
  0x3d PF: > { %v498_v1 = vld [vmem:[%s852_s11 + $0x38] sm:$0xff]   ;;  %v497_v2 = vld [vmem:[%s852_s11 + $0x30] sm:$0xff]   ;;  %v733_v3 = vmov 0.0   ;;  %vm734_vm0 = vmmov 0   ;;  %v496_v7 = vld [vmem:[%s852_s11 + $0x28] sm:$0xff]   ;;  %p363_p7 = scmp.lt.s32.totalorder %s719_s15, 1 }
  0x3e   : > { %516 = vmatprep.subr.mxu0 %v733_v3  ;;  %v490_v4 = vunpack.c.l.bf16 %v498_v1  ;;  %v491_v5 = vunpack.c.h.bf16 %v498_v1  ;;  %548 = vmatprep.mubr.msk.f32.mxu0 %vm734_vm0, %v733_v3  ;;  %v487_v6 = vunpack.c.h.bf16 %v497_v2  ;;  %v486_v8 = vunpack.c.l.bf16 %v497_v2  ;;  %v495_v10 = vld [vmem:[%s852_s11 + $0x20] sm:$0xff]   ;;  %v494_v13 = vld [vmem:[%s852_s11 + $0x18] sm:$0xff]   ;;  %v493_v16 = vld [vmem:[%s852_s11 + $0x10] sm:$0xff]  }
  0x3f   : > { %v483_v9 = vunpack.c.h.bf16 %v496_v7  ;;  %v482_v11 = vunpack.c.l.bf16 %v496_v7  ;;  %v479_v12 = vunpack.c.h.bf16 %v495_v10  ;;  %v478_v14 = vunpack.c.l.bf16 %v495_v10  ;;  %v492_v19 = vld [vmem:[%s852_s11 + $0x8] sm:$0xff]   ;;  %v461_v22 = vld [vmem:[%s852_s11] sm:$0xff]   ;;  %v236_v26 = vld [vmem:[#allocation2] sm:$0xff] }
  0x40   : > { %517 = vmatpush3.msra.mxu0 %v491_v5  ;;  %v475_v15 = vunpack.c.h.bf16 %v494_v13  ;;  %v474_v17 = vunpack.c.l.bf16 %v494_v13  ;;  %v471_v18 = vunpack.c.h.bf16 %v493_v16  ;;  %v470_v20 = vunpack.c.l.bf16 %v493_v16  ;;  %v453_v27 = vld [vmem:[%s206_s12] ss:$0 sm:$0xff] }
  0x41   : > { %518 = vmatprep.subr.mxu0 %v733_v3  ;;  %v467_v21 = vunpack.c.h.bf16 %v492_v19  ;;  %v466_v23 = vunpack.c.l.bf16 %v492_v19  ;;  %v463_v24 = vunpack.c.h.bf16 %v461_v22  ;;  %v462_v25 = vunpack.c.l.bf16 %v461_v22 }
  0x42   : > { %519 = vmatpush3.msra.mxu0 %v490_v4 }
  0x43   : > { %520 = vmatprep.subr.mxu0 %v733_v3 }
  0x44   : > { %521 = vmatpush3.msra.mxu0 %v487_v6 }
  0x45   : > { %522 = vmatprep.subr.mxu0 %v733_v3 }
  0x46   : > { %523 = vmatpush3.msra.mxu0 %v486_v8 }
  0x47   : > { %524 = vmatprep.subr.mxu0 %v733_v3 }
  0x48   : > { %525 = vmatpush3.msra.mxu0 %v483_v9 }
  0x49   : > { %526 = vmatprep.subr.mxu0 %v733_v3 }
  0x4a   : > { %527 = vmatpush3.msra.mxu0 %v482_v11 }
  0x4b   : > { %528 = vmatprep.subr.mxu0 %v733_v3 }
  0x4c   : > { %529 = vmatpush3.msra.mxu0 %v479_v12 }
  0x4d   : > { %530 = vmatprep.subr.mxu0 %v733_v3 }
  0x4e   : > { %531 = vmatpush3.msra.mxu0 %v478_v14 }
  0x4f   : > { %532 = vmatprep.subr.mxu0 %v733_v3 }
  0x50   : > { %533 = vmatpush3.msra.mxu0 %v475_v15 }
  0x51   : > { %534 = vmatprep.subr.mxu0 %v733_v3 }
  0x52   : > { %535 = vmatpush3.msra.mxu0 %v474_v17 }
  0x53   : > { %536 = vmatprep.subr.mxu0 %v733_v3 }
  0x54   : > { %537 = vmatpush3.msra.mxu0 %v471_v18 }
  0x55   : > { %538 = vmatprep.subr.mxu0 %v733_v3 }
  0x56   : > { %539 = vmatpush3.msra.mxu0 %v470_v20 }
  0x57   : > { %540 = vmatprep.subr.mxu0 %v733_v3 }
  0x58   : > { %541 = vmatpush3.msra.mxu0 %v467_v21 }
  0x59   : > { %542 = vmatprep.subr.mxu0 %v733_v3 }
  0x5a   : > { %543 = vmatpush3.msra.mxu0 %v466_v23 }
  0x5b   : > { %544 = vmatprep.subr.mxu0 %v733_v3 }
  0x5c   : > { %545 = vmatpush3.msra.mxu0 %v463_v24 }
  0x5d   : > { %546 = vmatprep.subr.mxu0 %v733_v3 }
  0x5e   : > { %547 = vmatpush3.msra.mxu0 %v462_v25 }
  0x5f   : > { %549 = vmatmul.mubr.f32.vlgmr.msra.gmra.mxu0 %v236_v26 }
 0x11f   : > { %v342_v28 = vpop.f32.mrf.mxu0 }
 0x120   : > { %v343_v29 = vadd.f32 %v453_v27, %v342_v28 }
 0x121   : > { %v550_v30 = vpop.f32.mrf.mxu0 }
 0x122   : > { %v347_v31 = vmul.f32 0.044715, %v343_v29  ;;  %v346_v37 = vmul.f32 0.5, %v343_v29 }
 0x124   : > { %v348_v32 = vmul.f32 %v347_v31, %v343_v29 }
 0x126   : > { %v349_v33 = vmul.f32 %v348_v32, %v343_v29 }
 0x128   : > { %v350_v34 = vadd.f32 %v349_v33, %v343_v29 }
 0x12a   : > { %v351_v35 = vmul.f32 0.7978846, %v350_v34 }
 0x12c   : > { %615 = vtanh.f32 %v351_v35 }
 0x139   : > { %v616_v36 = vpop.eup %615 }
 0x13a   : > { %v353_v38 = vadd.f32 1.0, %v616_v36 }
 0x13c   : > { %v354_v39 = vmul.f32 %v353_v38, %v346_v37  ;;  %367 = sbr.rel (!%p363_p7) target bundleno = 329 (0x149), region = 48 }
 0x13e   : > { %v360_v40 = vadd.f32 %v354_v39, %v236_v26 }
 0x140   : > { %362 = vst [vmem:[%s908_s3] sm:$0xff] %v360_v40 }
 0x147   : > { %v368_v41 = vld [vmem:[%s908_s3] sm:$0xff] }
 0x148   : > { %369 = vst [vmem:[#allocation2] sm:$0xff] %v368_v41 }
 0x149 PF: > { %s19_s17 = sadd.s32 1, %s727_s17   ;;  %s913_s12 = smov %s711_s13 }
 0x14a   : > { %p16_p10 = scmp.ge.s32.totalorder %s19_s17, 4   ;;  %s914_s13 = smov %s715_s14 }
 0x14b   : > { %s915_s14 = smov %s804_s24  ;;  %s916_s15 = smov %s723_s16 }
 0x14c   : > { %s917_s16 = smov %s919_s19  ;;  %18 = sbr.rel (!%p16_p10) target bundleno = 6 (0x6), region = 91 }
 0x151   :  { %381 = vsyncpa [#allocation4], 1 }
 0x152   :  { %383 = vsyncpa [#allocation4 + $0x1], 1 }
 0x153   :  { %384 = vsyncpa [#allocation6], 1 }
 0x154   :  { %386 = vsyncpa [#allocation6 + $0x1], 1 }

// kernel: res_generator_forward.14
= control target key start
LH: loop header
LB: loop body
LE: loop exit
PB: predicated region body
PF: predicated region fallthrough
CT: control target
= control target key end

     0   :  { %8 = vsyncpa [#allocation3], 0  ;;  %s963_s0 = inlined_call_operand.vmem [shape: f32[8,128], index: 0, kind: input, shape index: {}]   ;;  %s964_s1 = inlined_call_operand.hbm [shape: bf16[128,256], index: 1, kind: input, shape index: {}]   ;;  %s965_s2 = inlined_call_operand.hbm [shape: f32[1,256], index: 2, kind: input, shape index: {}]   ;;  %s966_s3 = inlined_call_operand.vmem [shape: f32[8,256], index: 3, kind: output, shape index: {}]  }
   0x1   :  { %10 = vsyncpa [#allocation3 + $0x1], 0 }
   0x2   :  { %11 = vsyncpa [#allocation5], 0 }
   0x3   :  { %13 = vsyncpa [#allocation5 + $0x1], 0  ;;  %s816_s12 = smov 0   ;;  %s818_s13 = smov 0  }
   0x4   :  { %s820_s14 = smov 0   ;;  %s822_s15 = smov 0  }
   0x5   :  { %s824_s16 = smov 0   ;;  %s826_s17 = smov 0  }
   0x6 LB: > { %s505_s18 = sadd.s32 4294967295, %s787_s17   ;;  %s28_s19 = sadd.s32 1, %s783_s16  ;;  %s787_s17 = sphi %s826_s17, %s19_s17   ;;  %s783_s16 = sphi %s824_s16, %s975_s16   ;;  %s779_s15 = sphi %s822_s15, %s974_s15   ;;  %s775_s14 = sphi %s820_s14, %s973_s14   ;;  %s771_s13 = sphi %s818_s13, %s972_s13   ;;  %s767_s12 = sphi %s816_s12, %s971_s12  }
   0x7   : > { %p29_p0 = scmp.ge.s32.totalorder %s28_s19, 2  ;;  %s64_s20 = sadd.s32 1, %s775_s14 }
   0x8   : > { %p71_p1 = scmp.ne.s32.totalorder %s775_s14, %s771_s13  ;;  %p72_p2 = scmp.eq.s32.totalorder %s787_s17, 0 }
   0x9   : > { %s977_s19 = smov (%p29_p0, %s28_s19), 0  ;;  %p77_p4 = scmp.ne.s32.totalorder %s771_s13, %s767_s12 }
   0xa   : > { %p852_p3 = por %p72_p2, %p71_p1  ;;  %s61_s22 = ssub.s32 %s783_s16, %s977_s19 }
   0xb   : > { %p78_p5 = scmp.eq.s32.totalorder %s505_s18, 0  ;;  %p62_p6 = scmp.eq.s32.totalorder %s61_s22, 0 }
   0xc   : > { %p621_p8 = scmp.lt.s32.totalorder %s787_s17, 2  ;;  %s868_s25 = sand.u32 1, %s775_s14  }
   0xd   : > { %p859_p7 = por %p78_p5, %p77_p4  ;;  %s511_s26 = sshll.u32 %s783_s16, 6 }
   0xe   : > { %s865_s24 = scalar_select %p62_p6, %s775_s14, %s64_s20  }
   0xf   : > { %s510_s27 = sshll.u32 %s868_s25, 6  ;;  %s171_s30 = scalar_lea.hbm %s964_s1, %s511_s26 }
  0x10   : > { %s166_s4 = scalar_lea.vmem [#allocation2], %s510_s27  ;;  %p877_p9 = pnand %p621_p8, %p852_p3 }
  0x11   : > { %s172_s5 = sshll.u32 %s166_s4, 4  ;;  %p513_p10 = scmp.ge.s32.totalorder %s787_s17, 1  ;;  %s173_s5 = int_to_ptr.vmem [resolvable:$true] %s172_s5 }
  0x12   : > { %s163_s7 = scalar_lea.sflag [#allocation3], %s868_s25  ;;  %p679_p11 = pneg %p877_p9 }
  0x13   : > { %s690_s8 = scalar_lea.vmem %s173_s5, 1024  ;;  %s789_s9 = smov [#allocation2]  }
  0x14   : > { %p691_p12 = scmp.ne.s32.totalorder %s173_s5, %s690_s8  ;;  %s695_s10 = sshll.u32 %s789_s9, 4  ;;  %s696_s10 = int_to_ptr.vmem [resolvable:$false] %s695_s10 }
  0x15   : > { %s697_s11 = scalar_lea.vmem %s696_s10, 2048  ;;  %p698_p1 = scmp.lt.s32.totalorder %s173_s5, %s696_s10 }
  0x16   : > { %p693_p13 = pnand %p691_p12, %p679_p11  ;;  %p699_p2 = scmp.lt.s32.totalorder %s697_s11, %s690_s8 }
  0x18   : > { %p694_p0 = pneg %p693_p13  ;;  %p700_p3 = por %p699_p2, %p698_p1 }
  0x1a   : > { %p701_p4 = pnand %p700_p3, %p694_p0 }
  0x1c   : > { %704 = shalt.err (!%p701_p4)
}
  0x1d   : > { %s790_s12 = smov 128   ;;  %s791_s18 = smov 64  }
  0x1e   : > { %s792_s20 = smov 4   ;;  %p197_p5 = scmp.lt.s32.totalorder %s787_s17, 3 }
  0x1f   : > { %617 = dma.hbm_to_vmem [thread:$0]  (!%p877_p9), %s171_s30, 1024, %s173_s5, %s163_s7, %s790_s12, %s791_s18, %s792_s20  }
  0x20   : > { %s512_s21 = sshll.u32 %s783_s16, 4  ;;  %p894_p6 = pnand %p513_p10, %p197_p5 }
  0x21   : > { %s190_s28 = scalar_lea.hbm %s965_s2, %s512_s21  ;;  %s185_s29 = scalar_lea.vmem [#allocation4], %s868_s25 }
  0x22   : > { %s192_s4 = sshll.u32 %s185_s29, 4  ;;  %s183_s8 = scalar_lea.sflag [#allocation5], %s868_s25  ;;  %s193_s4 = int_to_ptr.vmem [resolvable:$true] %s192_s4 }
  0x23   : > { %s718_s9 = scalar_lea.vmem %s193_s4, 16  ;;  %s793_s30 = smov [#allocation4]  }
  0x24   : > { %p719_p8 = scmp.ne.s32.totalorder %s193_s4, %s718_s9  ;;  %s723_s5 = sshll.u32 %s793_s30, 4  ;;  %s724_s5 = int_to_ptr.vmem [resolvable:$false] %s723_s5 }
  0x25   : > { %s725_s7 = scalar_lea.vmem %s724_s5, 32  ;;  %p726_p10 = scmp.lt.s32.totalorder %s193_s4, %s724_s5 }
  0x26   : > { %p721_p12 = pnand %p719_p8, %p679_p11  ;;  %p727_p0 = scmp.lt.s32.totalorder %s725_s7, %s718_s9 }
  0x28   : > { %p722_p13 = pneg %p721_p12  ;;  %p728_p1 = por %p727_p0, %p726_p10 }
  0x2a   : > { %p729_p2 = pnand %p728_p1, %p722_p13 }
  0x2c   : > { %732 = shalt.err (!%p729_p2)
}
  0x2d   : > { %620 = dma.hbm_to_vmem [thread:$0]  (!%p877_p9), %s190_s28, 16, %s193_s4, %s183_s8  }
  0x2e   : > { %201 = sbr.rel (%p894_p6) target bundleno = 312 (0x138), region = 32  ;;  %s911_s25 = sand.u32 (!%p894_p6), 1, %s771_s13  }
  0x2f   : > { %s514_s10 = sshll.u32 (!%p894_p6), %s911_s25, 6  ;;  %s204_s11 = scalar_lea.sflag (!%p894_p6), [#allocation3], %s911_s25 }
  0x30   : > { %s915_s12 = scalar_lea.vmem (!%p894_p6), [#allocation2], %s514_s10 }
  0x33   : > { %758 = dma.done.wait (%p859_p7), %s204_s11, 1024  }
  0x34   : > { %760 = vsyncadd (%p859_p7), %s204_s11, 4294966272  ;;  %s213_s6 = scalar_lea.sflag [#allocation5], %s911_s25  ;;  %s215_s18 = scalar_lea.vmem [#allocation4], %s911_s25 }
  0x35   : > { %762 = dma.done.wait (%p859_p7), %s213_s6, 16  }
  0x36   : > { %764 = vsyncadd (%p859_p7), %s213_s6, 4294967280  ;;  %v794_v0 = vmov 0.0   ;;  %vm795_vm0 = vmmov 0   ;;  %v557_v1 = vld [vmem:[%s915_s12 + $0x38] sm:$0xff]   ;;  %v556_v2 = vld [vmem:[%s915_s12 + $0x30] sm:$0xff]   ;;  %p255_p7 = scmp.lt.s32.totalorder %s779_s15, 1 }
  0x37   : > { %575 = vmatprep.subr.mxu0 %v794_v0  ;;  %607 = vmatprep.mubr.msk.f32.mxu0 %vm795_vm0, %v794_v0  ;;  %v549_v3 = vunpack.c.l.bf16 %v557_v1  ;;  %v550_v4 = vunpack.c.h.bf16 %v557_v1  ;;  %v546_v5 = vunpack.c.h.bf16 %v556_v2  ;;  %v555_v6 = vld [vmem:[%s915_s12 + $0x28] sm:$0xff]   ;;  %v545_v7 = vunpack.c.l.bf16 %v556_v2  ;;  %v554_v9 = vld [vmem:[%s915_s12 + $0x20] sm:$0xff]   ;;  %v553_v12 = vld [vmem:[%s915_s12 + $0x18] sm:$0xff]  }
  0x38   : > { %v542_v8 = vunpack.c.h.bf16 %v555_v6  ;;  %v541_v10 = vunpack.c.l.bf16 %v555_v6  ;;  %v538_v11 = vunpack.c.h.bf16 %v554_v9  ;;  %v537_v13 = vunpack.c.l.bf16 %v554_v9  ;;  %v552_v15 = vld [vmem:[%s915_s12 + $0x10] sm:$0xff]   ;;  %v551_v18 = vld [vmem:[%s915_s12 + $0x8] sm:$0xff]   ;;  %v520_v21 = vld [vmem:[%s915_s12] sm:$0xff]   ;;  %s979_s15 = smov (!%p255_p7, %s779_s15), 1 }
  0x39   : > { %576 = vmatpush3.msra.mxu0 %v550_v4  ;;  %v534_v14 = vunpack.c.h.bf16 %v553_v12  ;;  %v533_v16 = vunpack.c.l.bf16 %v553_v12  ;;  %v530_v17 = vunpack.c.h.bf16 %v552_v15  ;;  %v529_v19 = vunpack.c.l.bf16 %v552_v15  ;;  %v261_v25 = vld [vmem:[%s963_s0] sm:$0xff]  ;;  %s515_s21 = sshll.u32 %s979_s15, 3 }
  0x3a   : > { %577 = vmatprep.subr.mxu0 %v794_v0  ;;  %v526_v20 = vunpack.c.h.bf16 %v551_v18  ;;  %v525_v22 = vunpack.c.l.bf16 %v551_v18  ;;  %v522_v23 = vunpack.c.h.bf16 %v520_v21  ;;  %v521_v24 = vunpack.c.l.bf16 %v520_v21  ;;  %v516_v26 = vld [vmem:[%s215_s18] ss:$0 sm:$0xff]  ;;  %s260_s27 = scalar_lea.vmem %s966_s3, %s515_s21 }
  0x3b   : > { %578 = vmatpush3.msra.mxu0 %v549_v3 }
  0x3c   : > { %579 = vmatprep.subr.mxu0 %v794_v0 }
  0x3d   : > { %580 = vmatpush3.msra.mxu0 %v546_v5 }
  0x3e   : > { %581 = vmatprep.subr.mxu0 %v794_v0 }
  0x3f   : > { %582 = vmatpush3.msra.mxu0 %v545_v7 }
  0x40   : > { %583 = vmatprep.subr.mxu0 %v794_v0 }
  0x41   : > { %584 = vmatpush3.msra.mxu0 %v542_v8 }
  0x42   : > { %585 = vmatprep.subr.mxu0 %v794_v0 }
  0x43   : > { %586 = vmatpush3.msra.mxu0 %v541_v10 }
  0x44   : > { %587 = vmatprep.subr.mxu0 %v794_v0 }
  0x45   : > { %588 = vmatpush3.msra.mxu0 %v538_v11 }
  0x46   : > { %589 = vmatprep.subr.mxu0 %v794_v0 }
  0x47   : > { %590 = vmatpush3.msra.mxu0 %v537_v13 }
  0x48   : > { %591 = vmatprep.subr.mxu0 %v794_v0 }
  0x49   : > { %592 = vmatpush3.msra.mxu0 %v534_v14 }
  0x4a   : > { %593 = vmatprep.subr.mxu0 %v794_v0 }
  0x4b   : > { %594 = vmatpush3.msra.mxu0 %v533_v16 }
  0x4c   : > { %595 = vmatprep.subr.mxu0 %v794_v0 }
  0x4d   : > { %596 = vmatpush3.msra.mxu0 %v530_v17 }
  0x4e   : > { %597 = vmatprep.subr.mxu0 %v794_v0 }
  0x4f   : > { %598 = vmatpush3.msra.mxu0 %v529_v19 }
  0x50   : > { %599 = vmatprep.subr.mxu0 %v794_v0 }
  0x51   : > { %600 = vmatpush3.msra.mxu0 %v526_v20 }
  0x52   : > { %601 = vmatprep.subr.mxu0 %v794_v0 }
  0x53   : > { %602 = vmatpush3.msra.mxu0 %v525_v22 }
  0x54   : > { %603 = vmatprep.subr.mxu0 %v794_v0 }
  0x55   : > { %604 = vmatpush3.msra.mxu0 %v522_v23 }
  0x56   : > { %605 = vmatprep.subr.mxu0 %v794_v0 }
  0x57   : > { %606 = vmatpush3.msra.mxu0 %v521_v24 }
  0x58   : > { %608 = vmatmul.mubr.f32.vlgmr.msra.gmra.mxu0 %v261_v25 }
 0x118   : > { %v367_v27 = vpop.f32.mrf.mxu0 }
 0x119   : > { %v368_v28 = vadd.f32 %v516_v26, %v367_v27 }
 0x11a   : > { %v609_v29 = vpop.f32.mrf.mxu0 }
 0x11b   : > { %v372_v30 = vmul.f32 0.044715, %v368_v28  ;;  %v371_v36 = vmul.f32 0.5, %v368_v28 }
 0x11d   : > { %v373_v31 = vmul.f32 %v372_v30, %v368_v28 }
 0x11f   : > { %v374_v32 = vmul.f32 %v373_v31, %v368_v28 }
 0x121   : > { %v375_v33 = vadd.f32 %v374_v32, %v368_v28 }
 0x123   : > { %v376_v34 = vmul.f32 0.7978846, %v375_v33 }
 0x125   : > { %675 = vtanh.f32 %v376_v34 }
 0x132   : > { %v676_v35 = vpop.eup %675 }
 0x133   : > { %v378_v37 = vadd.f32 1.0, %v676_v35 }
 0x135   : > { %v379_v38 = vmul.f32 %v378_v37, %v371_v36 }
 0x137   : > { %380 = vst [vmem:[%s260_s27] sm:$0xff] %v379_v38 }
 0x138 PF: > { %s19_s17 = sadd.s32 1, %s787_s17   ;;  %s971_s12 = smov %s771_s13 }
 0x139   : > { %p16_p9 = scmp.ge.s32.totalorder %s19_s17, 4   ;;  %s972_s13 = smov %s775_s14 }
 0x13a   : > { %s973_s14 = smov %s865_s24  ;;  %s974_s15 = smov %s783_s16 }
 0x13b   : > { %s975_s16 = smov %s977_s19  ;;  %18 = sbr.rel (!%p16_p9) target bundleno = 6 (0x6), region = 88 }
 0x140   :  { %408 = vsyncpa [#allocation3], 1 }
 0x141   :  { %410 = vsyncpa [#allocation3 + $0x1], 1 }
 0x142   :  { %411 = vsyncpa [#allocation5], 1 }
 0x143   :  { %413 = vsyncpa [#allocation5 + $0x1], 1 }

// kernel: res_generator_forward.15
= control target key start
LH: loop header
LB: loop body
LE: loop exit
PB: predicated region body
PF: predicated region fallthrough
CT: control target
= control target key end

     0   :  { %s878_s12 = smov 0   ;;  %s880_s13 = smov 0   ;;  %s1092_s0 = inlined_call_operand.vmem [shape: f32[8,256], index: 0, kind: input, shape index: {}]   ;;  %s1093_s1 = inlined_call_operand.vmem [shape: bf16[2,256,256], index: 1, kind: input, shape index: {}]   ;;  %s1094_s2 = inlined_call_operand.vmem [shape: f32[2,1,256], index: 2, kind: input, shape index: {}]   ;;  %s1095_s3 = inlined_call_operand.vmem [shape: f32[8,256], index: 3, kind: output, shape index: {}]  }
   0x1   :  { %s882_s14 = smov 0   ;;  %s884_s15 = smov 0  }
   0x2   :  { %s886_s16 = smov 0   ;;  %s888_s17 = smov 0  }
   0x3   :  { %s890_s18 = smov 0  }
   0x4 LB: > { %s22_s19 = sadd.s32 1, %s848_s16  ;;  %s25_s20 = sadd.s32 1, %s852_s17  ;;  %s856_s18 = sphi %s890_s18, %s13_s18   ;;  %s852_s17 = sphi %s888_s17, %s1102_s17   ;;  %s848_s16 = sphi %s886_s16, %s1101_s16   ;;  %s844_s15 = sphi %s884_s15, %s1100_s15   ;;  %s840_s14 = sphi %s882_s14, %s1099_s14   ;;  %s836_s13 = sphi %s880_s13, %s1098_s13   ;;  %s832_s12 = sphi %s878_s12, %s1097_s12  }
   0x5   : > { %p23_p0 = scmp.ge.s32.totalorder %s22_s19, 2  ;;  %p62_p1 = scmp.ne.s32.totalorder %s836_s13, %s832_s12 }
   0x6   : > { %p63_p2 = scmp.eq.s32.totalorder %s856_s18, 0  ;;  %s55_s24 = sadd.s32 1, %s836_s13 }
   0x7   : > { %s1104_s19 = smov (%p23_p0, %s22_s19), 0  ;;  %s1106_s20 = smov (!%p23_p0, %s25_s20), %s852_s17 }
   0x8   : > { %p64_p3 = por %p63_p2, %p62_p1  ;;  %p27_p4 = scmp.ge.s32.totalorder %s1106_s20, 2 }
   0x9   : > { %s51_s21 = ssub.s32 %s848_s16, %s1104_s19  ;;  %p617_p6 = scmp.ge.s32.totalorder %s856_s18, 4 }
   0xa   : > { %s1108_s20 = smov (%p27_p4, %s1106_s20), 0 }
   0xb   : > { %s50_s22 = ssub.s32 %s852_s17, %s1108_s20  ;;  %140 = sbr.rel (%p617_p6) target bundleno = 43 (0x2b), region = 20 }
   0xc   : > { %s52_s23 = sor.u32 %s51_s21, %s50_s22 }
   0xd   : > { %p53_p5 = scmp.eq.s32.totalorder %s52_s23, 0 }
   0xf   : > { %s929_s25 = scalar_select %p53_p5, %s836_s13, %s55_s24  }
  0x10   : > { %143 = sbr.rel (!%p64_p3) target bundleno = 43 (0x2b), region = 24  ;;  %s145_s26 = sand.u32 (%p64_p3), 1, %s836_s13  }
  0x11   : > { %s619_s27 = sshll.u32 (%p64_p3), %s852_s17, 6  ;;  %s618_s28 = sshll.u32 (%p64_p3), %s145_s26, 7 }
  0x12   : > { %s149_s29 = sadd.s32 (%p64_p3), %s848_s16, %s619_s27  ;;  %s943_s7 = scalar_lea.vmem (%p64_p3), [#allocation3], %s618_s28 }
  0x13   : > { %s620_s30 = sshll.u32 (%p64_p3), %s149_s29, 2 }
  0x14   : > { %s938_s6 = scalar_lea.vmem (%p64_p3), %s1093_s1, %s620_s30 }
  0x15   : > { %v168_v0 = vld [vmem:[%s938_s6] sm:$0xf]  ;;  %v170_v1 = vld [vmem:[%s938_s6 + $0x8] sm:$0xf]  ;;  %v172_v2 = vld [vmem:[%s938_s6 + $0x10] sm:$0xf] }
  0x16   : > { %169 = vst [vmem:[%s943_s7] sm:$0xf] %v168_v0  ;;  %171 = vst [vmem:[%s943_s7 + $0x4] sm:$0xf] %v170_v1  ;;  %v174_v3 = vld [vmem:[%s938_s6 + $0x18] sm:$0xf] }
  0x17   : > { %173 = vst [vmem:[%s943_s7 + $0x8] sm:$0xf] %v172_v2  ;;  %v176_v4 = vld [vmem:[%s938_s6 + $0x20] sm:$0xf]  ;;  %v178_v5 = vld [vmem:[%s938_s6 + $0x28] sm:$0xf] }
  0x18   : > { %175 = vst [vmem:[%s943_s7 + $0xc] sm:$0xf] %v174_v3  ;;  %177 = vst [vmem:[%s943_s7 + $0x10] sm:$0xf] %v176_v4  ;;  %v180_v6 = vld [vmem:[%s938_s6 + $0x30] sm:$0xf] }
  0x19   : > { %179 = vst [vmem:[%s943_s7 + $0x14] sm:$0xf] %v178_v5  ;;  %v182_v7 = vld [vmem:[%s938_s6 + $0x38] sm:$0xf]  ;;  %v184_v8 = vld [vmem:[%s938_s6 + $0x40] sm:$0xf] }
  0x1a   : > { %181 = vst [vmem:[%s943_s7 + $0x18] sm:$0xf] %v180_v6  ;;  %183 = vst [vmem:[%s943_s7 + $0x1c] sm:$0xf] %v182_v7  ;;  %v186_v9 = vld [vmem:[%s938_s6 + $0x48] sm:$0xf] }
  0x1b   : > { %185 = vst [vmem:[%s943_s7 + $0x20] sm:$0xf] %v184_v8  ;;  %v188_v10 = vld [vmem:[%s938_s6 + $0x50] sm:$0xf]  ;;  %v190_v11 = vld [vmem:[%s938_s6 + $0x58] sm:$0xf] }
  0x1c   : > { %187 = vst [vmem:[%s943_s7 + $0x24] sm:$0xf] %v186_v9  ;;  %189 = vst [vmem:[%s943_s7 + $0x28] sm:$0xf] %v188_v10  ;;  %v192_v12 = vld [vmem:[%s938_s6 + $0x60] sm:$0xf] }
  0x1d   : > { %191 = vst [vmem:[%s943_s7 + $0x2c] sm:$0xf] %v190_v11  ;;  %v194_v13 = vld [vmem:[%s938_s6 + $0x68] sm:$0xf]  ;;  %v196_v14 = vld [vmem:[%s938_s6 + $0x70] sm:$0xf] }
  0x1e   : > { %193 = vst [vmem:[%s943_s7 + $0x30] sm:$0xf] %v192_v12  ;;  %195 = vst [vmem:[%s943_s7 + $0x34] sm:$0xf] %v194_v13  ;;  %v198_v15 = vld [vmem:[%s938_s6 + $0x78] sm:$0xf] }
  0x1f   : > { %197 = vst [vmem:[%s943_s7 + $0x38] sm:$0xf] %v196_v14  ;;  %v200_v16 = vld [vmem:[%s938_s6 + $0x80] sm:$0xf]  ;;  %v202_v17 = vld [vmem:[%s938_s6 + $0x88] sm:$0xf] }
  0x20   : > { %199 = vst [vmem:[%s943_s7 + $0x3c] sm:$0xf] %v198_v15  ;;  %201 = vst [vmem:[%s943_s7 + $0x40] sm:$0xf] %v200_v16  ;;  %v204_v18 = vld [vmem:[%s938_s6 + $0x90] sm:$0xf] }
  0x21   : > { %203 = vst [vmem:[%s943_s7 + $0x44] sm:$0xf] %v202_v17  ;;  %v206_v19 = vld [vmem:[%s938_s6 + $0x98] sm:$0xf]  ;;  %v208_v20 = vld [vmem:[%s938_s6 + $0xa0] sm:$0xf] }
  0x22   : > { %205 = vst [vmem:[%s943_s7 + $0x48] sm:$0xf] %v204_v18  ;;  %207 = vst [vmem:[%s943_s7 + $0x4c] sm:$0xf] %v206_v19  ;;  %v210_v21 = vld [vmem:[%s938_s6 + $0xa8] sm:$0xf] }
  0x23   : > { %209 = vst [vmem:[%s943_s7 + $0x50] sm:$0xf] %v208_v20  ;;  %v212_v22 = vld [vmem:[%s938_s6 + $0xb0] sm:$0xf]  ;;  %v214_v23 = vld [vmem:[%s938_s6 + $0xb8] sm:$0xf] }
  0x24   : > { %211 = vst [vmem:[%s943_s7 + $0x54] sm:$0xf] %v210_v21  ;;  %213 = vst [vmem:[%s943_s7 + $0x58] sm:$0xf] %v212_v22  ;;  %v216_v24 = vld [vmem:[%s938_s6 + $0xc0] sm:$0xf] }
  0x25   : > { %215 = vst [vmem:[%s943_s7 + $0x5c] sm:$0xf] %v214_v23  ;;  %v218_v25 = vld [vmem:[%s938_s6 + $0xc8] sm:$0xf]  ;;  %v220_v26 = vld [vmem:[%s938_s6 + $0xd0] sm:$0xf] }
  0x26   : > { %217 = vst [vmem:[%s943_s7 + $0x60] sm:$0xf] %v216_v24  ;;  %219 = vst [vmem:[%s943_s7 + $0x64] sm:$0xf] %v218_v25  ;;  %v222_v27 = vld [vmem:[%s938_s6 + $0xd8] sm:$0xf] }
  0x27   : > { %221 = vst [vmem:[%s943_s7 + $0x68] sm:$0xf] %v220_v26  ;;  %v224_v28 = vld [vmem:[%s938_s6 + $0xe0] sm:$0xf]  ;;  %v226_v29 = vld [vmem:[%s938_s6 + $0xe8] sm:$0xf] }
  0x28   : > { %223 = vst [vmem:[%s943_s7 + $0x6c] sm:$0xf] %v222_v27  ;;  %225 = vst [vmem:[%s943_s7 + $0x70] sm:$0xf] %v224_v28  ;;  %v228_v30 = vld [vmem:[%s938_s6 + $0xf0] sm:$0xf] }
  0x29   : > { %227 = vst [vmem:[%s943_s7 + $0x74] sm:$0xf] %v226_v29  ;;  %v230_v31 = vld [vmem:[%s938_s6 + $0xf8] sm:$0xf]  ;;  %229 = vst [vmem:[%s943_s7 + $0x78] sm:$0xf] %v228_v30 }
  0x2a   : > { %231 = vst [vmem:[%s943_s7 + $0x7c] sm:$0xf] %v230_v31 }
  0x2b PF: > { %p621_p7 = scmp.ge.s32.totalorder %s856_s18, 1  ;;  %p328_p8 = scmp.lt.s32.totalorder %s856_s18, 5 }
  0x2d   : > { %p329_p9 = pnand %p621_p7, %p328_p8 }
  0x2e   : > { %s335_s8 = sand.u32 (!%p329_p9), 1, %s832_s12   ;;  %p360_p10 = scmp.lt.s32.totalorder (!%p329_p9), %s844_s15, 1 }
  0x2f   : > { %332 = sbr.rel (%p329_p9) target bundleno = 334 (0x14e), region = 69  ;;  %s622_s9 = sshll.u32 (!%p329_p9), %s335_s8, 7 }
  0x30   : > { %p362_p11 = scmp.lt.s32.totalorder (!%p329_p9), %s840_s14, 1  ;;  %p367_p12 = scmp.eq.s32.totalorder (!%p329_p9), %s844_s15, 0 }
  0x31   : > { %p368_p13 = scmp.eq.s32.totalorder (!%p329_p9), %s840_s14, 0  ;;  %s1023_s27 = scalar_lea.vmem (!%p329_p9), [#allocation3], %s622_s9 }
  0x33   : > { %p369_p0 = pnand (!%p329_p9), %p368_p13, %p367_p12 }
  0x34   : > { %s361_s10 = scalar_select %p360_p10, %s844_s15, 1 }
  0x35   : > { %s363_s11 = scalar_select %p362_p11, %s840_s14, 1 }
  0x36   : > { %s623_s21 = sshll.u32 %s361_s10, 1  ;;  %372 = sbr.rel (%p369_p0) target bundleno = 61 (0x3d), region = 77 }
  0x37   : > { %s1017_s22 = sadd.s32 %s623_s21, %s363_s11 }
  0x38   : > { %s366_s26 = scalar_lea.vmem %s1094_s2, %s1017_s22 }
  0x3b   : > { %v373_v32 = vld [vmem:[%s1092_s0] sm:$0xff]  ;;  %v374_v33 = vld [vmem:[%s1092_s0 + $0x8] sm:$0xff] }
  0x3c   : > { %375 = vst [vmem:[#allocation2] sm:$0xff] %v373_v32  ;;  %376 = vst [vmem:[#allocation2 + $0x8] sm:$0xff] %v374_v33 }
  0x3d PF: > { %v708_v34 = vld [vmem:[%s1023_s27 + $0x78] sm:$0xff]   ;;  %v707_v36 = vld [vmem:[%s1023_s27 + $0x70] sm:$0xff]   ;;  %v706_v44 = vld [vmem:[%s1023_s27 + $0x68] sm:$0xff]   ;;  %p539_p1 = scmp.eq.s32.totalorder %s840_s14, 1  ;;  %s625_s15 = sshll.u32 %s840_s14, 7 }
  0x3e   : > { %v700_v35 = vld [vmem:[%s1023_s27 + $0x38] sm:$0xff]   ;;  %v692_v37 = vunpack.c.l.bf16 %v708_v34  ;;  %v693_v38 = vunpack.c.h.bf16 %v708_v34  ;;  %v699_v40 = vld [vmem:[%s1023_s27 + $0x30] sm:$0xff]   ;;  %v689_v42 = vunpack.c.h.bf16 %v707_v36  ;;  %v688_v45 = vunpack.c.l.bf16 %v707_v36  ;;  %v698_v46 = vld [vmem:[%s1023_s27 + $0x28] sm:$0xff]   ;;  %s530_s7 = sshra.s32 %s625_s15, 7 }
  0x3f   : > { %v661_v39 = vunpack.c.h.bf16 %v700_v35  ;;  %v660_v41 = vunpack.c.l.bf16 %v700_v35  ;;  %v657_v43 = vunpack.c.h.bf16 %v699_v40  ;;  %v656_v48 = vunpack.c.l.bf16 %v699_v40  ;;  %v705_v51 = vld [vmem:[%s1023_s27 + $0x60] sm:$0xff]   ;;  %v704_v57 = vld [vmem:[%s1023_s27 + $0x58] sm:$0xff]   ;;  %v703_v63 = vld [vmem:[%s1023_s27 + $0x50] sm:$0xff]   ;;  %p1050_p2 = pnand %p539_p1, %p360_p10  ;;  %s626_s8 = sshll.u32 %s530_s7, 3 }
  0x40   : > { %709 = vmatprep.subr.mxu0 %v693_v38  ;;  %v685_v49 = vunpack.c.h.bf16 %v706_v44  ;;  %v653_v50 = vunpack.c.h.bf16 %v698_v46  ;;  %v684_v52 = vunpack.c.l.bf16 %v706_v44  ;;  %v697_v53 = vld [vmem:[%s1023_s27 + $0x20] sm:$0xff]   ;;  %v652_v54 = vunpack.c.l.bf16 %v698_v46  ;;  %v696_v59 = vld [vmem:[%s1023_s27 + $0x18] sm:$0xff]   ;;  %v695_v1 = vld [vmem:[%s1023_s27 + $0x10] sm:$0xff]   ;;  %s533_s9 = scalar_lea.vmem [#allocation2], %s626_s8  ;;  %s537_s21 = scalar_lea.vmem %s1095_s3, %s626_s8 }
  0x41   : > { %710 = vmatpush3.msra.mxu0 %v661_v39  ;;  %v681_v55 = vunpack.c.h.bf16 %v705_v51  ;;  %v649_v56 = vunpack.c.h.bf16 %v697_v53  ;;  %v680_v58 = vunpack.c.l.bf16 %v705_v51  ;;  %v648_v60 = vunpack.c.l.bf16 %v697_v53  ;;  %v702_v5 = vld [vmem:[%s1023_s27 + $0x48] sm:$0xff]   ;;  %v701_v11 = vld [vmem:[%s1023_s27 + $0x40] sm:$0xff]   ;;  %v624_v21 = vld [vmem:[%s366_s26] ss:$0 sm:$0xff] }
  0x42   : > { %711 = vmatprep.subr.mxu0 %v692_v37  ;;  %v677_v61 = vunpack.c.h.bf16 %v704_v57  ;;  %v645_v62 = vunpack.c.h.bf16 %v696_v59  ;;  %v676_v0 = vunpack.c.l.bf16 %v704_v57  ;;  %v644_v2 = vunpack.c.l.bf16 %v696_v59  ;;  %v694_v7 = vld [vmem:[%s1023_s27 + $0x8] sm:$0xff]   ;;  %v631_v13 = vld [vmem:[%s1023_s27] sm:$0xff]  }
  0x43   : > { %v378_v47 = vld [vmem:[#allocation2 + $0x8] sm:$0xff]  ;;  %712 = vmatpush3.msra.mxu0 %v660_v41  ;;  %v673_v3 = vunpack.c.h.bf16 %v703_v63  ;;  %v641_v4 = vunpack.c.h.bf16 %v695_v1  ;;  %v672_v6 = vunpack.c.l.bf16 %v703_v63  ;;  %v640_v8 = vunpack.c.l.bf16 %v695_v1  ;;  %v377_v19 = vld [vmem:[#allocation2] sm:$0xff] }
  0x44   : > { %514 = vmatprep.mubr.f32.mxu0 %v378_v47  ;;  %713 = vmatprep.subr.mxu0 %v689_v42  ;;  %v669_v9 = vunpack.c.h.bf16 %v702_v5  ;;  %v637_v10 = vunpack.c.h.bf16 %v694_v7  ;;  %v668_v12 = vunpack.c.l.bf16 %v702_v5  ;;  %v636_v14 = vunpack.c.l.bf16 %v694_v7  ;;  %v534_v33 = vld [vmem:[%s533_s9] sm:$0xff] }
  0x45   : > { %714 = vmatpush3.msra.mxu0 %v657_v43  ;;  %v665_v15 = vunpack.c.h.bf16 %v701_v11  ;;  %v633_v16 = vunpack.c.h.bf16 %v631_v13  ;;  %v664_v17 = vunpack.c.l.bf16 %v701_v11  ;;  %v632_v18 = vunpack.c.l.bf16 %v631_v13 }
  0x46   : > { %715 = vmatprep.subr.mxu0 %v688_v45 }
  0x47   : > { %716 = vmatpush3.msra.mxu0 %v656_v48 }
  0x48   : > { %717 = vmatprep.subr.mxu0 %v685_v49 }
  0x49   : > { %718 = vmatpush3.msra.mxu0 %v653_v50 }
  0x4a   : > { %719 = vmatprep.subr.mxu0 %v684_v52 }
  0x4b   : > { %720 = vmatpush3.msra.mxu0 %v652_v54 }
  0x4c   : > { %721 = vmatprep.subr.mxu0 %v681_v55 }
  0x4d   : > { %722 = vmatpush3.msra.mxu0 %v649_v56 }
  0x4e   : > { %723 = vmatprep.subr.mxu0 %v680_v58 }
  0x4f   : > { %724 = vmatpush3.msra.mxu0 %v648_v60 }
  0x50   : > { %725 = vmatprep.subr.mxu0 %v677_v61 }
  0x51   : > { %726 = vmatpush3.msra.mxu0 %v645_v62 }
  0x52   : > { %727 = vmatprep.subr.mxu0 %v676_v0 }
  0x53   : > { %728 = vmatpush3.msra.mxu0 %v644_v2 }
  0x54   : > { %729 = vmatprep.subr.mxu0 %v673_v3 }
  0x55   : > { %730 = vmatpush3.msra.mxu0 %v641_v4 }
  0x56   : > { %731 = vmatprep.subr.mxu0 %v672_v6 }
  0x57   : > { %732 = vmatpush3.msra.mxu0 %v640_v8 }
  0x58   : > { %733 = vmatprep.subr.mxu0 %v669_v9 }
  0x59   : > { %734 = vmatpush3.msra.mxu0 %v637_v10 }
  0x5a   : > { %735 = vmatprep.subr.mxu0 %v668_v12 }
  0x5b   : > { %736 = vmatpush3.msra.mxu0 %v636_v14 }
  0x5c   : > { %737 = vmatprep.subr.mxu0 %v665_v15 }
  0x5d   : > { %738 = vmatpush3.msra.mxu0 %v633_v16 }
  0x5e   : > { %739 = vmatprep.subr.mxu0 %v664_v17 }
  0x5f   : > { %740 = vmatpush3.msra.mxu0 %v632_v18 }
  0x60   : > { %515 = vmatmul.mubr.f32.vlgmr.msra.gmra.mxu0 %v377_v19 }
 0x120   : > { %v741_v20 = vpop.f32.mrf.mxu0 }
 0x122   : > { %v742_v22 = vpop.f32.mrf.mxu0 }
 0x123   : > { %v743_v23 = vadd.f32 %v742_v22, %v741_v20 }
 0x125   : > { %v517_v24 = vadd.f32 %v743_v23, %v624_v21 }
 0x127   : > { %v521_v25 = vmul.f32 0.044715, %v517_v24  ;;  %v520_v31 = vmul.f32 0.5, %v517_v24 }
 0x129   : > { %v522_v26 = vmul.f32 %v521_v25, %v517_v24 }
 0x12b   : > { %v523_v27 = vmul.f32 %v522_v26, %v517_v24 }
 0x12d   : > { %v524_v28 = vadd.f32 %v523_v27, %v517_v24 }
 0x12f   : > { %v525_v29 = vmul.f32 0.7978846, %v524_v28 }
 0x131   : > { %800 = vtanh.f32 %v525_v29 }
 0x13e   : > { %v801_v30 = vpop.eup %800 }
 0x13f   : > { %v527_v32 = vadd.f32 1.0, %v801_v30 }
 0x141   : > { %v528_v34 = vmul.f32 %v527_v32, %v520_v31  ;;  %544 = sbr.rel (%p1050_p2) target bundleno = 334 (0x14e), region = 81 }
 0x143   : > { %v535_v35 = vadd.f32 %v534_v33, %v528_v34 }
 0x145   : > { %538 = vst [vmem:[%s537_s21] sm:$0xff] %v535_v35 }
 0x14c   : > { %v545_v36 = vld [vmem:[%s1095_s3] sm:$0xff]  ;;  %v546_v37 = vld [vmem:[%s1095_s3 + $0x8] sm:$0xff] }
 0x14d   : > { %547 = vst [vmem:[#allocation2] sm:$0xff] %v545_v36  ;;  %548 = vst [vmem:[#allocation2 + $0x8] sm:$0xff] %v546_v37 }
 0x14e PF: > { %s13_s18 = sadd.s32 1, %s856_s18   ;;  %s1097_s12 = smov %s836_s13 }
 0x14f   : > { %p10_p3 = scmp.ge.s32.totalorder %s13_s18, 6   ;;  %s1098_s13 = smov %s929_s25 }
 0x150   : > { %s1099_s14 = smov %s848_s16  ;;  %s1100_s15 = smov %s852_s17 }
 0x151   : > { %s1101_s16 = smov %s1104_s19  ;;  %s1102_s17 = smov %s1108_s20 }
 0x152   :  { %12 = sbr.rel (!%p10_p3) target bundleno = 4 (0x4), region = 117 }

// kernel: res_generator_forward.16
= control target key start
LH: loop header
LB: loop body
LE: loop exit
PB: predicated region body
PF: predicated region fallthrough
CT: control target
= control target key end

     0   :  { %s826_s12 = smov 0   ;;  %s828_s13 = smov 0   ;;  %s1006_s0 = inlined_call_operand.vmem [shape: f32[8,256], index: 0, kind: input, shape index: {}]   ;;  %s1007_s1 = inlined_call_operand.vmem [shape: bf16[256,512], index: 1, kind: input, shape index: {}]   ;;  %s1008_s2 = inlined_call_operand.vmem [shape: f32[1,512], index: 2, kind: input, shape index: {}]   ;;  %s1009_s3 = inlined_call_operand.vmem [shape: f32[8,512], index: 3, kind: output, shape index: {}]  }
   0x1   :  { %s830_s14 = smov 0   ;;  %s832_s15 = smov 0  }
   0x2   :  { %s834_s16 = smov 0  }
   0x3 LB: > { %s22_s17 = sadd.s32 1, %s800_s15  ;;  %p65_p1 = scmp.ne.s32.totalorder %s792_s13, %s788_s12  ;;  %s804_s16 = sphi %s834_s16, %s13_s16   ;;  %s800_s15 = sphi %s832_s15, %s1013_s15   ;;  %s796_s14 = sphi %s830_s14, %s1012_s14   ;;  %s792_s13 = sphi %s828_s13, %s1011_s13   ;;  %s788_s12 = sphi %s826_s12, %s1010_s12  }
   0x4   : > { %p23_p0 = scmp.ge.s32.totalorder %s22_s17, 2  ;;  %p66_p2 = scmp.eq.s32.totalorder %s804_s16, 0 }
   0x5   : > { %s58_s19 = sadd.s32 1, %s792_s13  ;;  %p710_p5 = scmp.ge.s32.totalorder %s804_s16, 2 }
   0x6   : > { %s1015_s17 = smov (%p23_p0, %s22_s17), 0  ;;  %p67_p3 = por %p66_p2, %p65_p1 }
   0x7   : > { %s55_s18 = ssub.s32 %s800_s15, %s1015_s17  ;;  %153 = sbr.rel (%p710_p5) target bundleno = 32 (0x20), region = 20 }
   0x8   : > { %p56_p4 = scmp.eq.s32.totalorder %s55_s18, 0 }
   0xa   : > { %s861_s20 = scalar_select %p56_p4, %s792_s13, %s58_s19  }
   0xc   : > { %156 = sbr.rel (!%p67_p3) target bundleno = 32 (0x20), region = 24  ;;  %s158_s21 = sand.u32 (%p67_p3), 1, %s792_s13  }
   0xd   : > { %s721_s22 = sshll.u32 (%p67_p3), %s800_s15, 3  ;;  %s711_s23 = sshll.u32 (%p67_p3), %s158_s21, 8 }
   0xe   : > { %s869_s26 = scalar_lea.vmem (%p67_p3), %s1007_s1, %s721_s22  ;;  %s874_s27 = scalar_lea.vmem (%p67_p3), [#allocation2], %s711_s23 }
   0xf   : > { %v254_v0 = vld [vmem:[%s869_s26] sm:$0xff] (%p67_p3)  ;;  %v256_v1 = vld [vmem:[%s869_s26 + $0x10] sm:$0xff] (%p67_p3) }
  0x10   : > { %v258_v2 = vld [vmem:[%s869_s26 + $0x20] sm:$0xff] (%p67_p3)  ;;  %255 = vst [vmem:[%s874_s27] sm:$0xff] (%p67_p3), %v254_v0  ;;  %257 = vst [vmem:[%s874_s27 + $0x8] sm:$0xff] (%p67_p3), %v256_v1  ;;  %v260_v3 = vld [vmem:[%s869_s26 + $0x30] sm:$0xff] (%p67_p3) }
  0x11   : > { %259 = vst [vmem:[%s874_s27 + $0x10] sm:$0xff] %v258_v2  ;;  %v262_v4 = vld [vmem:[%s869_s26 + $0x40] sm:$0xff]  ;;  %v264_v5 = vld [vmem:[%s869_s26 + $0x50] sm:$0xff]  ;;  %261 = vst [vmem:[%s874_s27 + $0x18] sm:$0xff] %v260_v3 }
  0x12   : > { %263 = vst [vmem:[%s874_s27 + $0x20] sm:$0xff] %v262_v4  ;;  %265 = vst [vmem:[%s874_s27 + $0x28] sm:$0xff] %v264_v5  ;;  %v266_v6 = vld [vmem:[%s869_s26 + $0x60] sm:$0xff]  ;;  %v268_v7 = vld [vmem:[%s869_s26 + $0x70] sm:$0xff] }
  0x13   : > { %v270_v8 = vld [vmem:[%s869_s26 + $0x80] sm:$0xff]  ;;  %267 = vst [vmem:[%s874_s27 + $0x30] sm:$0xff] %v266_v6  ;;  %269 = vst [vmem:[%s874_s27 + $0x38] sm:$0xff] %v268_v7  ;;  %v272_v9 = vld [vmem:[%s869_s26 + $0x90] sm:$0xff] }
  0x14   : > { %271 = vst [vmem:[%s874_s27 + $0x40] sm:$0xff] %v270_v8  ;;  %v274_v10 = vld [vmem:[%s869_s26 + $0xa0] sm:$0xff]  ;;  %v276_v11 = vld [vmem:[%s869_s26 + $0xb0] sm:$0xff]  ;;  %273 = vst [vmem:[%s874_s27 + $0x48] sm:$0xff] %v272_v9 }
  0x15   : > { %275 = vst [vmem:[%s874_s27 + $0x50] sm:$0xff] %v274_v10  ;;  %277 = vst [vmem:[%s874_s27 + $0x58] sm:$0xff] %v276_v11  ;;  %v278_v12 = vld [vmem:[%s869_s26 + $0xc0] sm:$0xff]  ;;  %v280_v13 = vld [vmem:[%s869_s26 + $0xd0] sm:$0xff] }
  0x16   : > { %v282_v14 = vld [vmem:[%s869_s26 + $0xe0] sm:$0xff]  ;;  %279 = vst [vmem:[%s874_s27 + $0x60] sm:$0xff] %v278_v12  ;;  %281 = vst [vmem:[%s874_s27 + $0x68] sm:$0xff] %v280_v13  ;;  %v284_v15 = vld [vmem:[%s869_s26 + $0xf0] sm:$0xff] }
  0x17   : > { %283 = vst [vmem:[%s874_s27 + $0x70] sm:$0xff] %v282_v14  ;;  %v286_v16 = vld [vmem:[%s869_s26 + $0x100] sm:$0xff]  ;;  %v288_v17 = vld [vmem:[%s869_s26 + $0x110] sm:$0xff]  ;;  %285 = vst [vmem:[%s874_s27 + $0x78] sm:$0xff] %v284_v15 }
  0x18   : > { %287 = vst [vmem:[%s874_s27 + $0x80] sm:$0xff] %v286_v16  ;;  %289 = vst [vmem:[%s874_s27 + $0x88] sm:$0xff] %v288_v17  ;;  %v290_v18 = vld [vmem:[%s869_s26 + $0x120] sm:$0xff]  ;;  %v292_v19 = vld [vmem:[%s869_s26 + $0x130] sm:$0xff] }
  0x19   : > { %v294_v20 = vld [vmem:[%s869_s26 + $0x140] sm:$0xff]  ;;  %291 = vst [vmem:[%s874_s27 + $0x90] sm:$0xff] %v290_v18  ;;  %293 = vst [vmem:[%s874_s27 + $0x98] sm:$0xff] %v292_v19  ;;  %v296_v21 = vld [vmem:[%s869_s26 + $0x150] sm:$0xff] }
  0x1a   : > { %295 = vst [vmem:[%s874_s27 + $0xa0] sm:$0xff] %v294_v20  ;;  %v298_v22 = vld [vmem:[%s869_s26 + $0x160] sm:$0xff]  ;;  %v300_v23 = vld [vmem:[%s869_s26 + $0x170] sm:$0xff]  ;;  %297 = vst [vmem:[%s874_s27 + $0xa8] sm:$0xff] %v296_v21 }
  0x1b   : > { %299 = vst [vmem:[%s874_s27 + $0xb0] sm:$0xff] %v298_v22  ;;  %301 = vst [vmem:[%s874_s27 + $0xb8] sm:$0xff] %v300_v23  ;;  %v302_v24 = vld [vmem:[%s869_s26 + $0x180] sm:$0xff]  ;;  %v304_v25 = vld [vmem:[%s869_s26 + $0x190] sm:$0xff] }
  0x1c   : > { %v306_v26 = vld [vmem:[%s869_s26 + $0x1a0] sm:$0xff]  ;;  %303 = vst [vmem:[%s874_s27 + $0xc0] sm:$0xff] %v302_v24  ;;  %305 = vst [vmem:[%s874_s27 + $0xc8] sm:$0xff] %v304_v25  ;;  %v308_v27 = vld [vmem:[%s869_s26 + $0x1b0] sm:$0xff] }
  0x1d   : > { %307 = vst [vmem:[%s874_s27 + $0xd0] sm:$0xff] %v306_v26  ;;  %v310_v28 = vld [vmem:[%s869_s26 + $0x1c0] sm:$0xff]  ;;  %v312_v29 = vld [vmem:[%s869_s26 + $0x1d0] sm:$0xff]  ;;  %309 = vst [vmem:[%s874_s27 + $0xd8] sm:$0xff] %v308_v27 }
  0x1e   : > { %311 = vst [vmem:[%s874_s27 + $0xe0] sm:$0xff] %v310_v28  ;;  %313 = vst [vmem:[%s874_s27 + $0xe8] sm:$0xff] %v312_v29  ;;  %v314_v30 = vld [vmem:[%s869_s26 + $0x1e0] sm:$0xff]  ;;  %v316_v31 = vld [vmem:[%s869_s26 + $0x1f0] sm:$0xff] }
  0x1f   : > { %315 = vst [vmem:[%s874_s27 + $0xf0] sm:$0xff] %v314_v30  ;;  %317 = vst [vmem:[%s874_s27 + $0xf8] sm:$0xff] %v316_v31 }
  0x20 PF: > { %p714_p6 = scmp.ge.s32.totalorder %s804_s16, 1  ;;  %p330_p7 = scmp.lt.s32.totalorder %s804_s16, 3 }
  0x22   : > { %p331_p8 = pnand %p714_p6, %p330_p7 }
  0x23   : > { %s337_s28 = sand.u32 (!%p331_p8), 1, %s788_s12   ;;  %s716_s8 = sshll.u32 (!%p331_p8), %s796_s14, 1 }
  0x24   : > { %334 = sbr.rel (%p331_p8) target bundleno = 334 (0x14e), region = 66  ;;  %s715_s4 = sshll.u32 (!%p331_p8), %s337_s28, 8 }
  0x25   : > { %s943_s5 = scalar_lea.vmem (!%p331_p8), [#allocation2], %s715_s4  ;;  %p380_p9 = scmp.lt.s32.totalorder (!%p331_p8), %s716_s8, 3 }
  0x29   : > { %v395_v32 = vld [vmem:[%s1006_s0 + $0x8] sm:$0xff]  ;;  %v411_v33 = vld [vmem:[%s943_s5 + $0x78] sm:$0xff]  ;;  %v410_v34 = vld [vmem:[%s943_s5 + $0x70] sm:$0xff]  ;;  %s1017_s8 = smov (!%p380_p9, %s716_s8), 3 }
  0x2a   : > { %568 = vmatprep.mubr.f32.mxu0 %v395_v32  ;;  %v409_v35 = vld [vmem:[%s943_s5 + $0x68] sm:$0xff]  ;;  %v459_v36 = vunpack.c.h.bf16 %v411_v33  ;;  %v458_v37 = vunpack.c.l.bf16 %v411_v33  ;;  %v457_v38 = vunpack.c.h.bf16 %v410_v34  ;;  %v456_v39 = vunpack.c.l.bf16 %v410_v34  ;;  %v408_v40 = vld [vmem:[%s943_s5 + $0x60] sm:$0xff]  ;;  %v407_v43 = vld [vmem:[%s943_s5 + $0x58] sm:$0xff]  ;;  %s382_s11 = scalar_lea.vmem %s1008_s2, %s1017_s8  ;;  %s718_s12 = sshll.u32 %s1017_s8, 3 }
  0x2b   : > { %v455_v41 = vunpack.c.h.bf16 %v409_v35  ;;  %v454_v42 = vunpack.c.l.bf16 %v409_v35  ;;  %v453_v44 = vunpack.c.h.bf16 %v408_v40  ;;  %v452_v45 = vunpack.c.l.bf16 %v408_v40  ;;  %v406_v46 = vld [vmem:[%s943_s5 + $0x50] sm:$0xff]  ;;  %v405_v49 = vld [vmem:[%s943_s5 + $0x48] sm:$0xff]  ;;  %v404_v52 = vld [vmem:[%s943_s5 + $0x40] sm:$0xff]  ;;  %s392_s19 = scalar_lea.vmem %s1009_s3, %s718_s12 }
  0x2c   : > { %504 = vmatprep.subr.mxu0 %v459_v36  ;;  %v451_v47 = vunpack.c.h.bf16 %v407_v43  ;;  %v450_v48 = vunpack.c.l.bf16 %v407_v43  ;;  %v449_v50 = vunpack.c.h.bf16 %v406_v46  ;;  %v448_v51 = vunpack.c.l.bf16 %v406_v46  ;;  %v403_v55 = vld [vmem:[%s943_s5 + $0x38] sm:$0xff]  ;;  %v402_v58 = vld [vmem:[%s943_s5 + $0x30] sm:$0xff]  ;;  %v401_v61 = vld [vmem:[%s943_s5 + $0x28] sm:$0xff] }
  0x2d   : > { %505 = vmatpush1.msra.mxu0 %v458_v37  ;;  %v447_v53 = vunpack.c.h.bf16 %v405_v49  ;;  %v446_v54 = vunpack.c.l.bf16 %v405_v49  ;;  %v445_v56 = vunpack.c.h.bf16 %v404_v52  ;;  %v444_v57 = vunpack.c.l.bf16 %v404_v52  ;;  %v400_v0 = vld [vmem:[%s943_s5 + $0x20] sm:$0xff]  ;;  %v399_v3 = vld [vmem:[%s943_s5 + $0x18] sm:$0xff]  ;;  %v398_v6 = vld [vmem:[%s943_s5 + $0x10] sm:$0xff] }
  0x2e   : > { %506 = vmatprep.subr.mxu0 %v457_v38  ;;  %v443_v59 = vunpack.c.h.bf16 %v403_v55  ;;  %v442_v60 = vunpack.c.l.bf16 %v403_v55  ;;  %v441_v62 = vunpack.c.h.bf16 %v402_v58  ;;  %v440_v63 = vunpack.c.l.bf16 %v402_v58  ;;  %v397_v9 = vld [vmem:[%s943_s5 + $0x8] sm:$0xff]  ;;  %v396_v12 = vld [vmem:[%s943_s5] sm:$0xff]  ;;  %v427_v15 = vld [vmem:[%s943_s5 + $0xf8] sm:$0xff] }
  0x2f   : > { %507 = vmatpush1.msra.mxu0 %v456_v39  ;;  %v439_v1 = vunpack.c.h.bf16 %v401_v61  ;;  %v438_v2 = vunpack.c.l.bf16 %v401_v61  ;;  %v437_v4 = vunpack.c.h.bf16 %v400_v0  ;;  %v436_v5 = vunpack.c.l.bf16 %v400_v0  ;;  %v426_v18 = vld [vmem:[%s943_s5 + $0xf0] sm:$0xff]  ;;  %v425_v21 = vld [vmem:[%s943_s5 + $0xe8] sm:$0xff]  ;;  %v424_v24 = vld [vmem:[%s943_s5 + $0xe0] sm:$0xff] }
  0x30   : > { %508 = vmatprep.subr.mxu0 %v455_v41  ;;  %v435_v7 = vunpack.c.h.bf16 %v399_v3  ;;  %v434_v8 = vunpack.c.l.bf16 %v399_v3  ;;  %v433_v10 = vunpack.c.h.bf16 %v398_v6  ;;  %v432_v11 = vunpack.c.l.bf16 %v398_v6  ;;  %v423_v27 = vld [vmem:[%s943_s5 + $0xd8] sm:$0xff]  ;;  %v422_v30 = vld [vmem:[%s943_s5 + $0xd0] sm:$0xff]  ;;  %v421_v33 = vld [vmem:[%s943_s5 + $0xc8] sm:$0xff] }
  0x31   : > { %509 = vmatpush1.msra.mxu0 %v454_v42  ;;  %v431_v13 = vunpack.c.h.bf16 %v397_v9  ;;  %v430_v14 = vunpack.c.l.bf16 %v397_v9  ;;  %v429_v16 = vunpack.c.h.bf16 %v396_v12  ;;  %v428_v17 = vunpack.c.l.bf16 %v396_v12  ;;  %v420_v36 = vld [vmem:[%s943_s5 + $0xc0] sm:$0xff]  ;;  %v419_v39 = vld [vmem:[%s943_s5 + $0xb8] sm:$0xff]  ;;  %v418_v42 = vld [vmem:[%s943_s5 + $0xb0] sm:$0xff] }
  0x32   : > { %510 = vmatprep.subr.mxu0 %v453_v44  ;;  %v491_v19 = vunpack.c.h.bf16 %v427_v15  ;;  %v490_v20 = vunpack.c.l.bf16 %v427_v15  ;;  %v489_v22 = vunpack.c.h.bf16 %v426_v18  ;;  %v488_v23 = vunpack.c.l.bf16 %v426_v18 }
  0x33   : > { %511 = vmatpush1.msra.mxu0 %v452_v45  ;;  %v487_v25 = vunpack.c.h.bf16 %v425_v21  ;;  %v486_v26 = vunpack.c.l.bf16 %v425_v21  ;;  %v485_v28 = vunpack.c.h.bf16 %v424_v24  ;;  %v484_v29 = vunpack.c.l.bf16 %v424_v24  ;;  %v417_v45 = vld [vmem:[%s943_s5 + $0xa8] sm:$0xff] }
  0x34   : > { %512 = vmatprep.subr.mxu0 %v451_v47  ;;  %v483_v31 = vunpack.c.h.bf16 %v423_v27  ;;  %v482_v32 = vunpack.c.l.bf16 %v423_v27  ;;  %v481_v34 = vunpack.c.h.bf16 %v422_v30  ;;  %v480_v35 = vunpack.c.l.bf16 %v422_v30 }
  0x35   : > { %513 = vmatpush1.msra.mxu0 %v450_v48  ;;  %v479_v37 = vunpack.c.h.bf16 %v421_v33  ;;  %v478_v38 = vunpack.c.l.bf16 %v421_v33  ;;  %v477_v40 = vunpack.c.h.bf16 %v420_v36  ;;  %v476_v41 = vunpack.c.l.bf16 %v420_v36  ;;  %v416_v48 = vld [vmem:[%s943_s5 + $0xa0] sm:$0xff] }
  0x36   : > { %514 = vmatprep.subr.mxu0 %v449_v50  ;;  %v475_v43 = vunpack.c.h.bf16 %v419_v39  ;;  %v474_v44 = vunpack.c.l.bf16 %v419_v39  ;;  %v473_v46 = vunpack.c.h.bf16 %v418_v42  ;;  %v472_v47 = vunpack.c.l.bf16 %v418_v42 }
  0x37   : > { %515 = vmatpush1.msra.mxu0 %v448_v51  ;;  %v471_v49 = vunpack.c.h.bf16 %v417_v45  ;;  %v470_v50 = vunpack.c.l.bf16 %v417_v45  ;;  %v415_v51 = vld [vmem:[%s943_s5 + $0x98] sm:$0xff]  ;;  %v469_v52 = vunpack.c.h.bf16 %v416_v48 }
  0x38   : > { %516 = vmatprep.subr.mxu0 %v447_v53  ;;  %v468_v53 = vunpack.c.l.bf16 %v416_v48  ;;  %v467_v55 = vunpack.c.h.bf16 %v415_v51 }
  0x39   : > { %517 = vmatpush1.msra.mxu0 %v446_v54  ;;  %v414_v54 = vld [vmem:[%s943_s5 + $0x90] sm:$0xff] }
  0x3a   : > { %518 = vmatprep.subr.mxu0 %v445_v56  ;;  %v466_v56 = vunpack.c.l.bf16 %v415_v51  ;;  %v465_v58 = vunpack.c.h.bf16 %v414_v54 }
  0x3b   : > { %519 = vmatpush1.msra.mxu0 %v444_v57  ;;  %v413_v57 = vld [vmem:[%s943_s5 + $0x88] sm:$0xff] }
  0x3c   : > { %520 = vmatprep.subr.mxu0 %v443_v59  ;;  %v464_v59 = vunpack.c.l.bf16 %v414_v54  ;;  %v463_v61 = vunpack.c.h.bf16 %v413_v57 }
  0x3d   : > { %521 = vmatpush1.msra.mxu0 %v442_v60  ;;  %v412_v60 = vld [vmem:[%s943_s5 + $0x80] sm:$0xff] }
  0x3e   : > { %522 = vmatprep.subr.mxu0 %v441_v62  ;;  %v462_v62 = vunpack.c.l.bf16 %v413_v57  ;;  %v460_v0 = vunpack.c.l.bf16 %v412_v60 }
  0x3f   : > { %523 = vmatpush1.msra.mxu0 %v440_v63  ;;  %v461_v63 = vunpack.c.h.bf16 %v412_v60 }
  0x40   : > { %524 = vmatprep.subr.mxu0 %v439_v1  ;;  %v394_v1 = vld [vmem:[%s1006_s0] sm:$0xff] }
  0x41   : > { %525 = vmatpush1.msra.mxu0 %v438_v2  ;;  %v494_v2 = vlaneseq }
  0x42   : > { %526 = vmatprep.subr.mxu0 %v437_v4 }
  0x43   : > { %527 = vmatpush1.msra.mxu0 %v436_v5  ;;  %v495_v3 = vshrl.u32 %v494_v2, 7  ;;  %v492_v5 = vld [vmem:[%s382_s11] sm:$0x3] }
  0x44   : > { %528 = vmatprep.subr.mxu0 %v435_v7 }
  0x45   : > { %529 = vmatpush1.msra.mxu0 %v434_v8  ;;  %v496_v4 = vsub.s32 0, %v495_v3  ;;  %v500_v6 = vsub.s32 1, %v495_v3 }
  0x46   : > { %530 = vmatprep.subr.mxu0 %v433_v10 }
  0x47   : > { %531 = vmatpush1.msra.mxu0 %v432_v11  ;;  %v497_v7 = vrot.slane %v492_v5, %v496_v4  ;;  %v501_v8 = vrot.slane %v492_v5, %v500_v6 }
  0x48   : > { %532 = vmatprep.subr.mxu0 %v431_v13 }
  0x49   : > { %533 = vmatpush1.msra.mxu0 %v430_v14 }
  0x4a   : > { %534 = vmatprep.subr.mxu0 %v429_v16 }
  0x4b   : > { %535 = vmatpush1.msra.mxu0 %v428_v17 }
  0x4c   : > { %536 = vmatprep.subr.mxu0 %v491_v19 }
  0x4d   : > { %537 = vmatpush2.msra.mxu0 %v490_v20 }
  0x4e   : > { %538 = vmatprep.subr.mxu0 %v489_v22 }
  0x4f   : > { %539 = vmatpush2.msra.mxu0 %v488_v23 }
  0x50   : > { %540 = vmatprep.subr.mxu0 %v487_v25 }
  0x51   : > { %541 = vmatpush2.msra.mxu0 %v486_v26 }
  0x52   : > { %542 = vmatprep.subr.mxu0 %v485_v28 }
  0x53   : > { %543 = vmatpush2.msra.mxu0 %v484_v29 }
  0x54   : > { %544 = vmatprep.subr.mxu0 %v483_v31 }
  0x55   : > { %545 = vmatpush2.msra.mxu0 %v482_v32 }
  0x56   : > { %546 = vmatprep.subr.mxu0 %v481_v34 }
  0x57   : > { %547 = vmatpush2.msra.mxu0 %v480_v35 }
  0x58   : > { %548 = vmatprep.subr.mxu0 %v479_v37 }
  0x59   : > { %549 = vmatpush2.msra.mxu0 %v478_v38 }
  0x5a   : > { %550 = vmatprep.subr.mxu0 %v477_v40 }
  0x5b   : > { %551 = vmatpush2.msra.mxu0 %v476_v41 }
  0x5c   : > { %552 = vmatprep.subr.mxu0 %v475_v43 }
  0x5d   : > { %553 = vmatpush2.msra.mxu0 %v474_v44 }
  0x5e   : > { %554 = vmatprep.subr.mxu0 %v473_v46 }
  0x5f   : > { %555 = vmatpush2.msra.mxu0 %v472_v47 }
  0x60   : > { %556 = vmatprep.subr.mxu0 %v471_v49 }
  0x61   : > { %557 = vmatpush2.msra.mxu0 %v470_v50 }
  0x62   : > { %558 = vmatprep.subr.mxu0 %v469_v52 }
  0x63   : > { %559 = vmatpush2.msra.mxu0 %v468_v53 }
  0x64   : > { %560 = vmatprep.subr.mxu0 %v467_v55 }
  0x65   : > { %561 = vmatpush2.msra.mxu0 %v466_v56 }
  0x66   : > { %562 = vmatprep.subr.mxu0 %v465_v58 }
  0x67   : > { %563 = vmatpush2.msra.mxu0 %v464_v59 }
  0x68   : > { %564 = vmatprep.subr.mxu0 %v463_v61 }
  0x69   : > { %565 = vmatpush2.msra.mxu0 %v462_v62 }
  0x6a   : > { %566 = vmatprep.subr.mxu0 %v461_v63 }
  0x6b   : > { %567 = vmatpush2.msra.mxu0 %v460_v0 }
  0x6c   : > { %569 = vmatmul.mubr.f32.vlgmr.msra.gmra.mxu0 %v394_v1 }
 0x12c   : > { %v570_v9 = vpop.f32.mrf.mxu0 }
 0x12d   : > { %v571_v10 = vadd.f32 %v570_v9, %v497_v7 }
 0x12e   : > { %v572_v11 = vpop.f32.mrf.mxu0 }
 0x12f   : > { %v577_v12 = vmul.f32 0.044715, %v571_v10  ;;  %v573_v13 = vadd.f32 %v572_v11, %v501_v8  ;;  %v575_v24 = vmul.f32 0.5, %v571_v10 }
 0x131   : > { %v579_v14 = vmul.f32 %v577_v12, %v571_v10  ;;  %v578_v15 = vmul.f32 0.044715, %v573_v13  ;;  %v576_v28 = vmul.f32 0.5, %v573_v13 }
 0x133   : > { %v581_v16 = vmul.f32 %v579_v14, %v571_v10  ;;  %v580_v17 = vmul.f32 %v578_v15, %v573_v13 }
 0x135   : > { %v583_v18 = vadd.f32 %v581_v16, %v571_v10  ;;  %v582_v19 = vmul.f32 %v580_v17, %v573_v13 }
 0x137   : > { %v585_v20 = vmul.f32 0.7978846, %v583_v18  ;;  %v584_v21 = vadd.f32 %v582_v19, %v573_v13 }
 0x139   : > { %762 = vtanh.f32 %v585_v20  ;;  %v586_v22 = vmul.f32 0.7978846, %v584_v21 }
 0x13b   : > { %764 = vtanh.f32 %v586_v22 }
 0x146   : > { %v763_v23 = vpop.eup %762 }
 0x147   : > { %v589_v25 = vadd.f32 1.0, %v763_v23 }
 0x148   : > { %v765_v26 = vpop.eup %764 }
 0x149   : > { %v591_v27 = vmul.f32 %v589_v25, %v575_v24  ;;  %v590_v29 = vadd.f32 1.0, %v765_v26 }
 0x14b   : > { %593 = vst [vmem:[%s392_s19] sm:$0xff] %v591_v27  ;;  %v592_v30 = vmul.f32 %v590_v29, %v576_v28 }
 0x14d   : > { %594 = vst [vmem:[%s392_s19 + $0x8] sm:$0xff] %v592_v30 }
 0x14e PF: > { %s13_s16 = sadd.s32 1, %s804_s16   ;;  %s1010_s12 = smov %s792_s13 }
 0x14f   : > { %p10_p10 = scmp.ge.s32.totalorder %s13_s16, 4   ;;  %s1011_s13 = smov %s861_s20 }
 0x150   : > { %s1012_s14 = smov %s800_s15  ;;  %s1013_s15 = smov %s1015_s17 }
 0x151   :  { %12 = sbr.rel (!%p10_p10) target bundleno = 3 (0x3), region = 111 }

// kernel: res_generator_forward.17
= control target key start
LH: loop header
LB: loop body
LE: loop exit
PB: predicated region body
PF: predicated region fallthrough
CT: control target
= control target key end

     0   :  { %8 = vsyncpa [#allocation4], 0  ;;  %s1159_s0 = inlined_call_operand.vmem [shape: f32[8,512], index: 0, kind: input, shape index: {}]   ;;  %s1160_s1 = inlined_call_operand.hbm [shape: bf16[2,512,512], index: 1, kind: input, shape index: {}]   ;;  %s1161_s2 = inlined_call_operand.vmem [shape: f32[2,1,512], index: 2, kind: input, shape index: {}]   ;;  %s1162_s3 = inlined_call_operand.vmem [shape: f32[8,512], index: 3, kind: output, shape index: {}]  }
   0x1   :  { %10 = vsyncpa [#allocation4 + $0x1], 0  ;;  %s922_s12 = smov 0   ;;  %s924_s13 = smov 0  }
   0x2   :  { %s926_s14 = smov 0   ;;  %s928_s15 = smov 0  }
   0x3   :  { %s930_s16 = smov 0   ;;  %s932_s17 = smov 0  }
   0x4   :  { %s934_s18 = smov 0   ;;  %s936_s19 = smov 0  }
   0x5 LB: > { %s708_s20 = sadd.s32 4294967295, %s896_s19   ;;  %s25_s21 = sadd.s32 1, %s888_s17  ;;  %s896_s19 = sphi %s936_s19, %s16_s19   ;;  %s892_s18 = sphi %s934_s18, %s1173_s18   ;;  %s888_s17 = sphi %s932_s17, %s1172_s17   ;;  %s884_s16 = sphi %s930_s16, %s1171_s16   ;;  %s880_s15 = sphi %s928_s15, %s1170_s15   ;;  %s876_s14 = sphi %s926_s14, %s1169_s14   ;;  %s872_s13 = sphi %s924_s13, %s1168_s13   ;;  %s868_s12 = sphi %s922_s12, %s1167_s12  }
   0x6   : > { %p26_p0 = scmp.ge.s32.totalorder %s25_s21, 2  ;;  %s28_s22 = sadd.s32 1, %s892_s18 }
   0x7   : > { %s58_s23 = sadd.s32 1, %s876_s14  ;;  %p65_p1 = scmp.ne.s32.totalorder %s876_s14, %s872_s13 }
   0x8   : > { %s1175_s21 = smov (%p26_p0, %s25_s21), 0  ;;  %s1177_s22 = smov (!%p26_p0, %s28_s22), %s892_s18 }
   0x9   : > { %s54_s24 = ssub.s32 %s888_s17, %s1175_s21  ;;  %p66_p2 = scmp.eq.s32.totalorder %s896_s19, 0 }
   0xa   : > { %p30_p3 = scmp.ge.s32.totalorder %s1177_s22, 2  ;;  %p71_p4 = scmp.ne.s32.totalorder %s872_s13, %s868_s12 }
   0xb   : > { %p973_p5 = por %p66_p2, %p65_p1  ;;  %p72_p6 = scmp.eq.s32.totalorder %s708_s20, 0 }
   0xc   : > { %s1179_s22 = smov (%p30_p3, %s1177_s22), 0  ;;  %p730_p8 = scmp.lt.s32.totalorder %s896_s19, 4 }
   0xd   : > { %p979_p7 = por %p72_p6, %p71_p4  ;;  %s53_s27 = ssub.s32 %s892_s18, %s1179_s22 }
   0xe   : > { %s55_s28 = sor.u32 %s54_s24, %s53_s27  ;;  %s147_s29 = sand.u32 1, %s876_s14  }
   0xf   : > { %p56_p9 = scmp.eq.s32.totalorder %s55_s28, 0  ;;  %s711_s30 = sshll.u32 %s147_s29, 9 }
  0x10   : > { %s712_s4 = sshll.u32 %s888_s17, 1  ;;  %s713_s6 = sshll.u32 %s892_s18, 8 }
  0x11   : > { %s989_s5 = scalar_select %p56_p9, %s876_s14, %s58_s23  }
  0x12   : > { %s157_s7 = sadd.s32 %s713_s6, %s712_s4  ;;  %s151_s8 = scalar_lea.vmem [#allocation3], %s711_s30 }
  0x13   : > { %s160_s9 = sshll.u32 %s151_s8, 4  ;;  %s714_s10 = sshll.u32 %s157_s7, 6  ;;  %s161_s9 = int_to_ptr.vmem [resolvable:$true] %s160_s9 }
  0x14   : > { %s159_s20 = scalar_lea.hbm %s1160_s1, %s714_s10  ;;  %p999_p10 = pnand %p730_p8, %p973_p5 }
  0x15   : > { %s148_s27 = scalar_lea.sflag [#allocation4], %s147_s29  ;;  %s815_s23 = scalar_lea.vmem %s161_s9, 8192 }
  0x16   : > { %p804_p11 = pneg %p999_p10  ;;  %p816_p12 = scmp.ne.s32.totalorder %s161_s9, %s815_s23 }
  0x17   : > { %s898_s28 = smov [#allocation3]  }
  0x18   : > { %p818_p13 = pnand %p816_p12, %p804_p11  ;;  %s820_s30 = sshll.u32 %s898_s28, 4  ;;  %s821_s30 = int_to_ptr.vmem [resolvable:$false] %s820_s30 }
  0x19   : > { %s822_s4 = scalar_lea.vmem %s821_s30, 16384  ;;  %p823_p1 = scmp.lt.s32.totalorder %s161_s9, %s821_s30 }
  0x1a   : > { %p819_p0 = pneg %p818_p13  ;;  %p824_p2 = scmp.lt.s32.totalorder %s822_s4, %s815_s23 }
  0x1c   : > { %p825_p3 = por %p824_p2, %p823_p1 }
  0x1e   : > { %p826_p4 = pnand %p825_p3, %p819_p0 }
  0x20   : > { %829 = shalt.err (!%p826_p4)
}
  0x21   : > { %s899_s25 = smov 256   ;;  %s900_s29 = smov 128  }
  0x22   : > { %s901_s6 = smov 8   ;;  %p715_p5 = scmp.ge.s32.totalorder %s896_s19, 1 }
  0x23   : > { %729 = dma.hbm_to_vmem [thread:$0]  (!%p999_p10), %s159_s20, 8192, %s161_s9, %s148_s27, %s899_s25, %s900_s29, %s901_s6  }
  0x24   : > { %p180_p6 = scmp.lt.s32.totalorder %s896_s19, 5 }
  0x26   : > { %p181_p8 = pnand %p715_p5, %p180_p6 }
  0x27   : > { %s186_s7 = sand.u32 (!%p181_p8), 1, %s872_s13  }
  0x28   : > { %184 = sbr.rel (%p181_p8) target bundleno = 368 (0x170), region = 32  ;;  %s716_s8 = sshll.u32 (!%p181_p8), %s186_s7, 9 }
  0x29   : > { %s187_s10 = scalar_lea.sflag (!%p181_p8), [#allocation4], %s186_s7  ;;  %s1010_s11 = scalar_lea.vmem (!%p181_p8), [#allocation3], %s716_s8 }
  0x2d   : > { %863 = dma.done.wait (%p979_p7), %s187_s10, 8192  }
  0x2e   : > { %865 = vsyncadd (%p979_p7), %s187_s10, 4294959104  ;;  %s717_s9 = sshll.u32 %s880_s15, 1  ;;  %p218_p9 = scmp.lt.s32.totalorder %s884_s16, 1 }
  0x2f   : > { %p220_p10 = scmp.lt.s32.totalorder %s717_s9, 3  ;;  %p226_p11 = scmp.eq.s32.totalorder %s884_s16, 0 }
  0x30   : > { %s219_s12 = scalar_select %p218_p9, %s884_s16, 1 }
  0x31   : > { %s1181_s9 = smov (!%p220_p10, %s717_s9), 3  ;;  %p227_p12 = scmp.eq.s32.totalorder %s880_s15, 0 }
  0x32   : > { %s718_s20 = sshll.u32 %s219_s12, 2 }
  0x33   : > { %s1023_s24 = sadd.s32 %s718_s20, %s1181_s9  ;;  %p228_p7 = pnand %p227_p12, %p226_p11 }
  0x34   : > { %s224_s23 = scalar_lea.vmem %s1161_s2, %s1023_s24 }
  0x35   : > { %231 = sbr.rel (%p228_p7) target bundleno = 61 (0x3d), region = 40 }
  0x3a   : > { %v232_v0 = vld [vmem:[%s1159_s0] sm:$0xff]  ;;  %v233_v1 = vld [vmem:[%s1159_s0 + $0x8] sm:$0xff]  ;;  %v234_v2 = vld [vmem:[%s1159_s0 + $0x10] sm:$0xff] }
  0x3b   : > { %236 = vst [vmem:[#allocation2] sm:$0xff] %v232_v0  ;;  %237 = vst [vmem:[#allocation2 + $0x8] sm:$0xff] %v233_v1  ;;  %v235_v3 = vld [vmem:[%s1159_s0 + $0x18] sm:$0xff] }
  0x3c   : > { %238 = vst [vmem:[#allocation2 + $0x10] sm:$0xff] %v234_v2  ;;  %239 = vst [vmem:[#allocation2 + $0x18] sm:$0xff] %v235_v3 }
  0x3d PF: > { %v259_v4 = vld [vmem:[%s1010_s11 + $0x78] sm:$0xff]  ;;  %v258_v6 = vld [vmem:[%s1010_s11 + $0x70] sm:$0xff]  ;;  %v257_v12 = vld [vmem:[%s1010_s11 + $0x68] sm:$0xff]  ;;  %p621_p13 = scmp.eq.s32.totalorder %s880_s15, 1  ;;  %s719_s16 = sshll.u32 %s880_s15, 8 }
  0x3e   : > { %v291_v5 = vld [vmem:[%s1010_s11 + $0x178] sm:$0xff]  ;;  %v339_v7 = vunpack.c.h.bf16 %v259_v4  ;;  %v338_v9 = vunpack.c.l.bf16 %v259_v4  ;;  %v290_v11 = vld [vmem:[%s1010_s11 + $0x170] sm:$0xff]  ;;  %v289_v13 = vld [vmem:[%s1010_s11 + $0x168] sm:$0xff]  ;;  %v337_v14 = vunpack.c.h.bf16 %v258_v6  ;;  %v336_v16 = vunpack.c.l.bf16 %v258_v6  ;;  %s609_s12 = sshra.s32 %s719_s16, 7 }
  0x3f   : > { %v403_v8 = vunpack.c.h.bf16 %v291_v5  ;;  %v402_v10 = vunpack.c.l.bf16 %v291_v5  ;;  %v401_v15 = vunpack.c.h.bf16 %v290_v11  ;;  %v400_v17 = vunpack.c.l.bf16 %v290_v11  ;;  %v256_v18 = vld [vmem:[%s1010_s11 + $0x60] sm:$0xff]  ;;  %v255_v24 = vld [vmem:[%s1010_s11 + $0x58] sm:$0xff]  ;;  %v254_v30 = vld [vmem:[%s1010_s11 + $0x50] sm:$0xff]  ;;  %p1108_p0 = pnand %p621_p13, %p218_p9  ;;  %s720_s20 = sshll.u32 %s609_s12, 3 }
  0x40   : > { %v288_v19 = vld [vmem:[%s1010_s11 + $0x160] sm:$0xff]  ;;  %448 = vmatprep.subr.mxu0 %v339_v7  ;;  %v335_v20 = vunpack.c.h.bf16 %v257_v12  ;;  %v399_v21 = vunpack.c.h.bf16 %v289_v13  ;;  %v334_v22 = vunpack.c.l.bf16 %v257_v12  ;;  %v398_v23 = vunpack.c.l.bf16 %v289_v13  ;;  %v287_v25 = vld [vmem:[%s1010_s11 + $0x158] sm:$0xff]  ;;  %v286_v31 = vld [vmem:[%s1010_s11 + $0x150] sm:$0xff]  ;;  %s612_s24 = scalar_lea.vmem [#allocation2], %s720_s20 }
  0x41   : > { %519 = vmatprep.subr.mxu1 %v403_v8  ;;  %449 = vmatpush1.msra.mxu0 %v338_v9  ;;  %v333_v26 = vunpack.c.h.bf16 %v256_v18  ;;  %v397_v27 = vunpack.c.h.bf16 %v288_v19  ;;  %v332_v28 = vunpack.c.l.bf16 %v256_v18  ;;  %v396_v29 = vunpack.c.l.bf16 %v288_v19  ;;  %v253_v36 = vld [vmem:[%s1010_s11 + $0x48] sm:$0xff]  ;;  %v252_v42 = vld [vmem:[%s1010_s11 + $0x40] sm:$0xff]  ;;  %v251_v48 = vld [vmem:[%s1010_s11 + $0x38] sm:$0xff] }
  0x42   : > { %520 = vmatpush1.msra.mxu1 %v402_v10  ;;  %450 = vmatprep.subr.mxu0 %v337_v14  ;;  %v331_v32 = vunpack.c.h.bf16 %v255_v24  ;;  %v395_v33 = vunpack.c.h.bf16 %v287_v25  ;;  %v330_v34 = vunpack.c.l.bf16 %v255_v24  ;;  %v394_v35 = vunpack.c.l.bf16 %v287_v25  ;;  %v285_v37 = vld [vmem:[%s1010_s11 + $0x148] sm:$0xff]  ;;  %v284_v43 = vld [vmem:[%s1010_s11 + $0x140] sm:$0xff]  ;;  %v283_v49 = vld [vmem:[%s1010_s11 + $0x138] sm:$0xff] }
  0x43   : > { %521 = vmatprep.subr.mxu1 %v401_v15  ;;  %451 = vmatpush1.msra.mxu0 %v336_v16  ;;  %v329_v38 = vunpack.c.h.bf16 %v254_v30  ;;  %v393_v39 = vunpack.c.h.bf16 %v286_v31  ;;  %v328_v40 = vunpack.c.l.bf16 %v254_v30  ;;  %v392_v41 = vunpack.c.l.bf16 %v286_v31  ;;  %v250_v54 = vld [vmem:[%s1010_s11 + $0x30] sm:$0xff]  ;;  %v249_v60 = vld [vmem:[%s1010_s11 + $0x28] sm:$0xff]  ;;  %v248_v2 = vld [vmem:[%s1010_s11 + $0x20] sm:$0xff] }
  0x44   : > { %522 = vmatpush1.msra.mxu1 %v400_v17  ;;  %452 = vmatprep.subr.mxu0 %v335_v20  ;;  %v327_v44 = vunpack.c.h.bf16 %v253_v36  ;;  %v391_v45 = vunpack.c.h.bf16 %v285_v37  ;;  %v326_v46 = vunpack.c.l.bf16 %v253_v36  ;;  %v390_v47 = vunpack.c.l.bf16 %v285_v37  ;;  %v282_v55 = vld [vmem:[%s1010_s11 + $0x130] sm:$0xff]  ;;  %v281_v61 = vld [vmem:[%s1010_s11 + $0x128] sm:$0xff]  ;;  %v280_v3 = vld [vmem:[%s1010_s11 + $0x120] sm:$0xff] }
  0x45   : > { %523 = vmatprep.subr.mxu1 %v399_v21  ;;  %453 = vmatpush1.msra.mxu0 %v334_v22  ;;  %v325_v50 = vunpack.c.h.bf16 %v252_v42  ;;  %v389_v51 = vunpack.c.h.bf16 %v284_v43  ;;  %v324_v52 = vunpack.c.l.bf16 %v252_v42  ;;  %v388_v53 = vunpack.c.l.bf16 %v284_v43  ;;  %v247_v8 = vld [vmem:[%s1010_s11 + $0x18] sm:$0xff]  ;;  %v246_v14 = vld [vmem:[%s1010_s11 + $0x10] sm:$0xff]  ;;  %v245_v20 = vld [vmem:[%s1010_s11 + $0x8] sm:$0xff] }
  0x46   : > { %524 = vmatpush1.msra.mxu1 %v398_v23  ;;  %454 = vmatprep.subr.mxu0 %v333_v26  ;;  %v323_v56 = vunpack.c.h.bf16 %v251_v48  ;;  %v387_v57 = vunpack.c.h.bf16 %v283_v49  ;;  %v322_v58 = vunpack.c.l.bf16 %v251_v48  ;;  %v386_v59 = vunpack.c.l.bf16 %v283_v49  ;;  %v279_v9 = vld [vmem:[%s1010_s11 + $0x118] sm:$0xff]  ;;  %v278_v15 = vld [vmem:[%s1010_s11 + $0x110] sm:$0xff]  ;;  %v277_v21 = vld [vmem:[%s1010_s11 + $0x108] sm:$0xff] }
  0x47   : > { %525 = vmatprep.subr.mxu1 %v397_v27  ;;  %455 = vmatpush1.msra.mxu0 %v332_v28  ;;  %v321_v62 = vunpack.c.h.bf16 %v250_v54  ;;  %v385_v63 = vunpack.c.h.bf16 %v282_v55  ;;  %v320_v0 = vunpack.c.l.bf16 %v250_v54  ;;  %v384_v1 = vunpack.c.l.bf16 %v282_v55  ;;  %v244_v26 = vld [vmem:[%s1010_s11] sm:$0xff] }
  0x48   : > { %526 = vmatpush1.msra.mxu1 %v396_v29  ;;  %456 = vmatprep.subr.mxu0 %v331_v32  ;;  %v319_v4 = vunpack.c.h.bf16 %v249_v60  ;;  %v383_v5 = vunpack.c.h.bf16 %v281_v61  ;;  %v318_v6 = vunpack.c.l.bf16 %v249_v60  ;;  %v382_v7 = vunpack.c.l.bf16 %v281_v61  ;;  %v276_v27 = vld [vmem:[%s1010_s11 + $0x100] sm:$0xff]  ;;  %v275_v32 = vld [vmem:[%s1010_s11 + $0xf8] sm:$0xff] }
  0x49   : > { %527 = vmatprep.subr.mxu1 %v395_v33  ;;  %457 = vmatpush1.msra.mxu0 %v330_v34  ;;  %v317_v10 = vunpack.c.h.bf16 %v248_v2  ;;  %v381_v11 = vunpack.c.h.bf16 %v280_v3  ;;  %v316_v12 = vunpack.c.l.bf16 %v248_v2  ;;  %v380_v13 = vunpack.c.l.bf16 %v280_v3  ;;  %v307_v33 = vld [vmem:[%s1010_s11 + $0x1f8] sm:$0xff] }
  0x4a   : > { %528 = vmatpush1.msra.mxu1 %v394_v35  ;;  %458 = vmatprep.subr.mxu0 %v329_v38  ;;  %v315_v16 = vunpack.c.h.bf16 %v247_v8  ;;  %v379_v17 = vunpack.c.h.bf16 %v279_v9  ;;  %v314_v18 = vunpack.c.l.bf16 %v247_v8  ;;  %v378_v19 = vunpack.c.l.bf16 %v279_v9  ;;  %v274_v38 = vld [vmem:[%s1010_s11 + $0xf0] sm:$0xff] }
  0x4b   : > { %529 = vmatprep.subr.mxu1 %v393_v39  ;;  %459 = vmatpush1.msra.mxu0 %v328_v40  ;;  %v313_v22 = vunpack.c.h.bf16 %v246_v14  ;;  %v377_v23 = vunpack.c.h.bf16 %v278_v15  ;;  %v312_v24 = vunpack.c.l.bf16 %v246_v14  ;;  %v376_v25 = vunpack.c.l.bf16 %v278_v15  ;;  %v306_v39 = vld [vmem:[%s1010_s11 + $0x1f0] sm:$0xff] }
  0x4c   : > { %530 = vmatpush1.msra.mxu1 %v392_v41  ;;  %460 = vmatprep.subr.mxu0 %v327_v44  ;;  %v311_v28 = vunpack.c.h.bf16 %v245_v20  ;;  %v375_v29 = vunpack.c.h.bf16 %v277_v21  ;;  %v310_v30 = vunpack.c.l.bf16 %v245_v20  ;;  %v374_v31 = vunpack.c.l.bf16 %v277_v21  ;;  %v273_v44 = vld [vmem:[%s1010_s11 + $0xe8] sm:$0xff] }
  0x4d   : > { %531 = vmatprep.subr.mxu1 %v391_v45  ;;  %461 = vmatpush1.msra.mxu0 %v326_v46  ;;  %v309_v34 = vunpack.c.h.bf16 %v244_v26  ;;  %v373_v35 = vunpack.c.h.bf16 %v276_v27  ;;  %v308_v36 = vunpack.c.l.bf16 %v244_v26  ;;  %v372_v37 = vunpack.c.l.bf16 %v276_v27  ;;  %v305_v45 = vld [vmem:[%s1010_s11 + $0x1e8] sm:$0xff] }
  0x4e   : > { %532 = vmatpush1.msra.mxu1 %v390_v47  ;;  %462 = vmatprep.subr.mxu0 %v325_v50  ;;  %v371_v40 = vunpack.c.h.bf16 %v275_v32  ;;  %v435_v41 = vunpack.c.h.bf16 %v307_v33  ;;  %v370_v42 = vunpack.c.l.bf16 %v275_v32  ;;  %v434_v43 = vunpack.c.l.bf16 %v307_v33  ;;  %v272_v50 = vld [vmem:[%s1010_s11 + $0xe0] sm:$0xff] }
  0x4f   : > { %533 = vmatprep.subr.mxu1 %v389_v51  ;;  %463 = vmatpush1.msra.mxu0 %v324_v52  ;;  %v369_v46 = vunpack.c.h.bf16 %v274_v38  ;;  %v433_v47 = vunpack.c.h.bf16 %v306_v39  ;;  %v368_v48 = vunpack.c.l.bf16 %v274_v38  ;;  %v432_v49 = vunpack.c.l.bf16 %v306_v39  ;;  %v304_v51 = vld [vmem:[%s1010_s11 + $0x1e0] sm:$0xff] }
  0x50   : > { %534 = vmatpush1.msra.mxu1 %v388_v53  ;;  %464 = vmatprep.subr.mxu0 %v323_v56  ;;  %v367_v52 = vunpack.c.h.bf16 %v273_v44  ;;  %v431_v53 = vunpack.c.h.bf16 %v305_v45  ;;  %v366_v54 = vunpack.c.l.bf16 %v273_v44  ;;  %v430_v55 = vunpack.c.l.bf16 %v305_v45  ;;  %v271_v56 = vld [vmem:[%s1010_s11 + $0xd8] sm:$0xff] }
  0x51   : > { %535 = vmatprep.subr.mxu1 %v387_v57  ;;  %465 = vmatpush1.msra.mxu0 %v322_v58  ;;  %v303_v57 = vld [vmem:[%s1010_s11 + $0x1d8] sm:$0xff]  ;;  %v365_v58 = vunpack.c.h.bf16 %v272_v50  ;;  %v364_v60 = vunpack.c.l.bf16 %v272_v50  ;;  %v428_v61 = vunpack.c.l.bf16 %v304_v51  ;;  %v362_v2 = vunpack.c.l.bf16 %v271_v56 }
  0x52   : > { %536 = vmatpush1.msra.mxu1 %v386_v59  ;;  %466 = vmatprep.subr.mxu0 %v321_v62  ;;  %v429_v59 = vunpack.c.h.bf16 %v304_v51  ;;  %v270_v62 = vld [vmem:[%s1010_s11 + $0xd0] sm:$0xff]  ;;  %v426_v3 = vunpack.c.l.bf16 %v303_v57 }
  0x53   : > { %537 = vmatprep.subr.mxu1 %v385_v63  ;;  %467 = vmatpush1.msra.mxu0 %v320_v0  ;;  %v302_v63 = vld [vmem:[%s1010_s11 + $0x1d0] sm:$0xff]  ;;  %v363_v0 = vunpack.c.h.bf16 %v271_v56  ;;  %v360_v8 = vunpack.c.l.bf16 %v270_v62 }
  0x54   : > { %538 = vmatpush1.msra.mxu1 %v384_v1  ;;  %468 = vmatprep.subr.mxu0 %v319_v4  ;;  %v427_v1 = vunpack.c.h.bf16 %v303_v57  ;;  %v269_v4 = vld [vmem:[%s1010_s11 + $0xc8] sm:$0xff]  ;;  %v424_v9 = vunpack.c.l.bf16 %v302_v63 }
  0x55   : > { %539 = vmatprep.subr.mxu1 %v383_v5  ;;  %469 = vmatpush1.msra.mxu0 %v318_v6  ;;  %v301_v5 = vld [vmem:[%s1010_s11 + $0x1c8] sm:$0xff]  ;;  %v361_v6 = vunpack.c.h.bf16 %v270_v62  ;;  %v358_v14 = vunpack.c.l.bf16 %v269_v4 }
  0x56   : > { %540 = vmatpush1.msra.mxu1 %v382_v7  ;;  %470 = vmatprep.subr.mxu0 %v317_v10  ;;  %v425_v7 = vunpack.c.h.bf16 %v302_v63  ;;  %v268_v10 = vld [vmem:[%s1010_s11 + $0xc0] sm:$0xff]  ;;  %v422_v15 = vunpack.c.l.bf16 %v301_v5 }
  0x57   : > { %541 = vmatprep.subr.mxu1 %v381_v11  ;;  %471 = vmatpush1.msra.mxu0 %v316_v12  ;;  %v300_v11 = vld [vmem:[%s1010_s11 + $0x1c0] sm:$0xff]  ;;  %v359_v12 = vunpack.c.h.bf16 %v269_v4  ;;  %v356_v20 = vunpack.c.l.bf16 %v268_v10 }
  0x58   : > { %542 = vmatpush1.msra.mxu1 %v380_v13  ;;  %472 = vmatprep.subr.mxu0 %v315_v16  ;;  %v423_v13 = vunpack.c.h.bf16 %v301_v5  ;;  %v267_v16 = vld [vmem:[%s1010_s11 + $0xb8] sm:$0xff]  ;;  %v420_v21 = vunpack.c.l.bf16 %v300_v11 }
  0x59   : > { %543 = vmatprep.subr.mxu1 %v379_v17  ;;  %473 = vmatpush1.msra.mxu0 %v314_v18  ;;  %v299_v17 = vld [vmem:[%s1010_s11 + $0x1b8] sm:$0xff]  ;;  %v357_v18 = vunpack.c.h.bf16 %v268_v10  ;;  %v354_v26 = vunpack.c.l.bf16 %v267_v16 }
  0x5a   : > { %544 = vmatpush1.msra.mxu1 %v378_v19  ;;  %474 = vmatprep.subr.mxu0 %v313_v22  ;;  %v421_v19 = vunpack.c.h.bf16 %v300_v11  ;;  %v266_v22 = vld [vmem:[%s1010_s11 + $0xb0] sm:$0xff]  ;;  %v418_v27 = vunpack.c.l.bf16 %v299_v17  ;;  %v243_v5 = vld [vmem:[#allocation2 + $0x18] sm:$0xff]  ;;  %v436_v11 = vld [vmem:[%s224_s23] sm:$0x3]  ;;  %s618_s23 = scalar_lea.vmem %s1162_s3, %s720_s20 }
  0x5b   : > { %545 = vmatprep.subr.mxu1 %v377_v23  ;;  %475 = vmatpush1.msra.mxu0 %v312_v24  ;;  %v298_v23 = vld [vmem:[%s1010_s11 + $0x1b0] sm:$0xff]  ;;  %v355_v24 = vunpack.c.h.bf16 %v267_v16  ;;  %v352_v32 = vunpack.c.l.bf16 %v266_v22 }
  0x5c   : > { %546 = vmatpush1.msra.mxu1 %v376_v25  ;;  %476 = vmatprep.subr.mxu0 %v311_v28  ;;  %v419_v25 = vunpack.c.h.bf16 %v299_v17  ;;  %v265_v28 = vld [vmem:[%s1010_s11 + $0xa8] sm:$0xff]  ;;  %v416_v33 = vunpack.c.l.bf16 %v298_v23 }
  0x5d   : > { %547 = vmatprep.subr.mxu1 %v375_v29  ;;  %477 = vmatpush1.msra.mxu0 %v310_v30  ;;  %v297_v29 = vld [vmem:[%s1010_s11 + $0x1a8] sm:$0xff]  ;;  %v353_v30 = vunpack.c.h.bf16 %v266_v22  ;;  %v350_v38 = vunpack.c.l.bf16 %v265_v28 }
  0x5e   : > { %548 = vmatpush1.msra.mxu1 %v374_v31  ;;  %478 = vmatprep.subr.mxu0 %v309_v34  ;;  %v417_v31 = vunpack.c.h.bf16 %v298_v23  ;;  %v264_v34 = vld [vmem:[%s1010_s11 + $0xa0] sm:$0xff]  ;;  %v414_v39 = vunpack.c.l.bf16 %v297_v29 }
  0x5f   : > { %549 = vmatprep.subr.mxu1 %v373_v35  ;;  %479 = vmatpush1.msra.mxu0 %v308_v36  ;;  %v296_v35 = vld [vmem:[%s1010_s11 + $0x1a0] sm:$0xff]  ;;  %v351_v36 = vunpack.c.h.bf16 %v265_v28  ;;  %v348_v44 = vunpack.c.l.bf16 %v264_v34 }
  0x60   : > { %550 = vmatpush1.msra.mxu1 %v372_v37  ;;  %480 = vmatprep.subr.mxu0 %v371_v40  ;;  %v415_v37 = vunpack.c.h.bf16 %v297_v29  ;;  %v263_v40 = vld [vmem:[%s1010_s11 + $0x98] sm:$0xff]  ;;  %v412_v45 = vunpack.c.l.bf16 %v296_v35 }
  0x61   : > { %551 = vmatprep.subr.mxu1 %v435_v41  ;;  %481 = vmatpush2.msra.mxu0 %v370_v42  ;;  %v295_v41 = vld [vmem:[%s1010_s11 + $0x198] sm:$0xff]  ;;  %v349_v42 = vunpack.c.h.bf16 %v264_v34  ;;  %v346_v50 = vunpack.c.l.bf16 %v263_v40 }
  0x62   : > { %552 = vmatpush2.msra.mxu1 %v434_v43  ;;  %482 = vmatprep.subr.mxu0 %v369_v46  ;;  %v413_v43 = vunpack.c.h.bf16 %v296_v35  ;;  %v262_v46 = vld [vmem:[%s1010_s11 + $0x90] sm:$0xff]  ;;  %v410_v51 = vunpack.c.l.bf16 %v295_v41 }
  0x63   : > { %553 = vmatprep.subr.mxu1 %v433_v47  ;;  %483 = vmatpush2.msra.mxu0 %v368_v48  ;;  %v294_v47 = vld [vmem:[%s1010_s11 + $0x190] sm:$0xff]  ;;  %v347_v48 = vunpack.c.h.bf16 %v263_v40  ;;  %v344_v56 = vunpack.c.l.bf16 %v262_v46 }
  0x64   : > { %554 = vmatpush2.msra.mxu1 %v432_v49  ;;  %484 = vmatprep.subr.mxu0 %v367_v52  ;;  %v411_v49 = vunpack.c.h.bf16 %v295_v41  ;;  %v261_v52 = vld [vmem:[%s1010_s11 + $0x88] sm:$0xff]  ;;  %v408_v57 = vunpack.c.l.bf16 %v294_v47 }
  0x65   : > { %555 = vmatprep.subr.mxu1 %v431_v53  ;;  %485 = vmatpush2.msra.mxu0 %v366_v54  ;;  %v293_v53 = vld [vmem:[%s1010_s11 + $0x188] sm:$0xff]  ;;  %v345_v54 = vunpack.c.h.bf16 %v262_v46  ;;  %v342_v62 = vunpack.c.l.bf16 %v261_v52 }
  0x66   : > { %556 = vmatpush2.msra.mxu1 %v430_v55  ;;  %486 = vmatprep.subr.mxu0 %v365_v58  ;;  %v409_v55 = vunpack.c.h.bf16 %v294_v47  ;;  %v260_v58 = vld [vmem:[%s1010_s11 + $0x80] sm:$0xff]  ;;  %v406_v63 = vunpack.c.l.bf16 %v293_v53  ;;  %v614_v41 = vld [vmem:[%s612_s24 + $0x8] sm:$0xff] }
  0x67   : > { %557 = vmatprep.subr.mxu1 %v429_v59  ;;  %487 = vmatpush2.msra.mxu0 %v364_v60  ;;  %v292_v59 = vld [vmem:[%s1010_s11 + $0x180] sm:$0xff]  ;;  %v343_v60 = vunpack.c.h.bf16 %v261_v52 }
  0x68   : > { %558 = vmatpush2.msra.mxu1 %v428_v61  ;;  %488 = vmatprep.subr.mxu0 %v363_v0  ;;  %v407_v61 = vunpack.c.h.bf16 %v293_v53  ;;  %v341_v0 = vunpack.c.h.bf16 %v260_v58  ;;  %v404_v4 = vunpack.c.l.bf16 %v292_v59 }
  0x69   : > { %559 = vmatprep.subr.mxu1 %v427_v1  ;;  %489 = vmatpush2.msra.mxu0 %v362_v2  ;;  %v405_v1 = vunpack.c.h.bf16 %v292_v59  ;;  %v340_v2 = vunpack.c.l.bf16 %v260_v58 }
  0x6a   : > { %560 = vmatpush2.msra.mxu1 %v426_v3  ;;  %490 = vmatprep.subr.mxu0 %v361_v6  ;;  %v241_v3 = vld [vmem:[#allocation2 + $0x8] sm:$0xff]  ;;  %v240_v6 = vld [vmem:[#allocation2] sm:$0xff] }
  0x6b   : > { %561 = vmatprep.subr.mxu1 %v425_v7  ;;  %491 = vmatpush2.msra.mxu0 %v360_v8  ;;  %v242_v7 = vld [vmem:[#allocation2 + $0x10] sm:$0xff]  ;;  %v438_v8 = vlaneseq }
  0x6c   : > { %562 = vmatpush2.msra.mxu1 %v424_v9  ;;  %492 = vmatprep.subr.mxu0 %v359_v12 }
  0x6d   : > { %563 = vmatprep.subr.mxu1 %v423_v13  ;;  %493 = vmatpush2.msra.mxu0 %v358_v14  ;;  %v439_v9 = vshrl.u32 %v438_v8, 7 }
  0x6e   : > { %564 = vmatpush2.msra.mxu1 %v422_v15  ;;  %494 = vmatprep.subr.mxu0 %v357_v18 }
  0x6f   : > { %565 = vmatprep.subr.mxu1 %v421_v19  ;;  %495 = vmatpush2.msra.mxu0 %v356_v20  ;;  %v440_v10 = vsub.s32 0, %v439_v9  ;;  %v444_v12 = vsub.s32 1, %v439_v9 }
  0x70   : > { %566 = vmatpush2.msra.mxu1 %v420_v21  ;;  %496 = vmatprep.subr.mxu0 %v355_v24 }
  0x71   : > { %567 = vmatprep.subr.mxu1 %v419_v25  ;;  %497 = vmatpush2.msra.mxu0 %v354_v26  ;;  %v441_v13 = vrot.slane %v436_v11, %v440_v10  ;;  %v445_v14 = vrot.slane %v436_v11, %v444_v12 }
  0x72   : > { %568 = vmatpush2.msra.mxu1 %v418_v27  ;;  %498 = vmatprep.subr.mxu0 %v353_v30 }
  0x73   : > { %569 = vmatprep.subr.mxu1 %v417_v31  ;;  %499 = vmatpush2.msra.mxu0 %v352_v32 }
  0x74   : > { %570 = vmatpush2.msra.mxu1 %v416_v33  ;;  %500 = vmatprep.subr.mxu0 %v351_v36 }
  0x75   : > { %571 = vmatprep.subr.mxu1 %v415_v37  ;;  %501 = vmatpush2.msra.mxu0 %v350_v38  ;;  %v613_v37 = vld [vmem:[%s612_s24] sm:$0xff] }
  0x76   : > { %572 = vmatpush2.msra.mxu1 %v414_v39  ;;  %502 = vmatprep.subr.mxu0 %v349_v42 }
  0x77   : > { %573 = vmatprep.subr.mxu1 %v413_v43  ;;  %503 = vmatpush2.msra.mxu0 %v348_v44 }
  0x78   : > { %574 = vmatpush2.msra.mxu1 %v412_v45  ;;  %504 = vmatprep.subr.mxu0 %v347_v48 }
  0x79   : > { %575 = vmatprep.subr.mxu1 %v411_v49  ;;  %505 = vmatpush2.msra.mxu0 %v346_v50 }
  0x7a   : > { %576 = vmatpush2.msra.mxu1 %v410_v51  ;;  %506 = vmatprep.subr.mxu0 %v345_v54 }
  0x7b   : > { %577 = vmatprep.subr.mxu1 %v409_v55  ;;  %507 = vmatpush2.msra.mxu0 %v344_v56 }
  0x7c   : > { %578 = vmatpush2.msra.mxu1 %v408_v57  ;;  %508 = vmatprep.subr.mxu0 %v343_v60 }
  0x7d   : > { %579 = vmatprep.subr.mxu1 %v407_v61  ;;  %509 = vmatpush2.msra.mxu0 %v342_v62 }
  0x7e   : > { %580 = vmatpush2.msra.mxu1 %v406_v63  ;;  %510 = vmatprep.subr.mxu0 %v341_v0 }
  0x7f   : > { %581 = vmatprep.subr.mxu1 %v405_v1  ;;  %511 = vmatpush2.msra.mxu0 %v340_v2 }
  0x80   : > { %512 = vmatprep.mubr.f32.mxu0 %v241_v3  ;;  %582 = vmatpush2.msra.mxu1 %v404_v4 }
  0x81   : > { %583 = vmatprep.mubr.f32.mxu1 %v243_v5  ;;  %513 = vmatmul.mubr.f32.vlgmr.msra.gmra.mxu0 %v240_v6 }
  0x82   : > { %584 = vmatmul.mubr.f32.vlgmr.msra.gmra.mxu1 %v242_v7 }
 0x141   : > { %v514_v15 = vpop.f32.mrf.mxu0 }
 0x142   : > { %v585_v16 = vpop.f32.mrf.mxu1  ;;  %v515_v17 = vadd.f32 %v514_v15, %v441_v13 }
 0x143   : > { %v516_v18 = vpop.f32.mrf.mxu0 }
 0x144   : > { %v586_v19 = vadd.f32 %v585_v16, %v515_v17  ;;  %v517_v20 = vadd.f32 %v516_v18, %v445_v14  ;;  %v587_v21 = vpop.f32.mrf.mxu1 }
 0x146   : > { %v592_v22 = vmul.f32 0.044715, %v586_v19  ;;  %v588_v23 = vadd.f32 %v587_v21, %v517_v20  ;;  %v590_v34 = vmul.f32 0.5, %v586_v19 }
 0x148   : > { %v594_v24 = vmul.f32 %v592_v22, %v586_v19  ;;  %v593_v25 = vmul.f32 0.044715, %v588_v23  ;;  %v591_v39 = vmul.f32 0.5, %v588_v23 }
 0x14a   : > { %v596_v26 = vmul.f32 %v594_v24, %v586_v19  ;;  %v595_v27 = vmul.f32 %v593_v25, %v588_v23 }
 0x14c   : > { %v598_v28 = vadd.f32 %v596_v26, %v586_v19  ;;  %v597_v29 = vmul.f32 %v595_v27, %v588_v23 }
 0x14e   : > { %v600_v30 = vmul.f32 0.7978846, %v598_v28  ;;  %v599_v31 = vadd.f32 %v597_v29, %v588_v23 }
 0x150   : > { %798 = vtanh.f32 %v600_v30  ;;  %v601_v32 = vmul.f32 0.7978846, %v599_v31 }
 0x152   : > { %800 = vtanh.f32 %v601_v32 }
 0x15d   : > { %v799_v33 = vpop.eup %798 }
 0x15e   : > { %v604_v35 = vadd.f32 1.0, %v799_v33 }
 0x15f   : > { %v801_v36 = vpop.eup %800 }
 0x160   : > { %v606_v38 = vmul.f32 %v604_v35, %v590_v34  ;;  %v605_v40 = vadd.f32 1.0, %v801_v36 }
 0x162   : > { %v615_v42 = vadd.f32 %v613_v37, %v606_v38  ;;  %v607_v43 = vmul.f32 %v605_v40, %v591_v39  ;;  %626 = sbr.rel (%p1108_p0) target bundleno = 368 (0x170), region = 44 }
 0x164   : > { %619 = vst [vmem:[%s618_s23] sm:$0xff] %v615_v42  ;;  %v616_v44 = vadd.f32 %v614_v41, %v607_v43 }
 0x166   : > { %620 = vst [vmem:[%s618_s23 + $0x8] sm:$0xff] %v616_v44 }
 0x16d   : > { %v627_v45 = vld [vmem:[%s1162_s3] sm:$0xff]  ;;  %v628_v46 = vld [vmem:[%s1162_s3 + $0x8] sm:$0xff]  ;;  %v629_v47 = vld [vmem:[%s1162_s3 + $0x10] sm:$0xff] }
 0x16e   : > { %631 = vst [vmem:[#allocation2] sm:$0xff] %v627_v45  ;;  %632 = vst [vmem:[#allocation2 + $0x8] sm:$0xff] %v628_v46  ;;  %v630_v48 = vld [vmem:[%s1162_s3 + $0x18] sm:$0xff] }
 0x16f   : > { %633 = vst [vmem:[#allocation2 + $0x10] sm:$0xff] %v629_v47  ;;  %634 = vst [vmem:[#allocation2 + $0x18] sm:$0xff] %v630_v48 }
 0x170 PF: > { %s16_s19 = sadd.s32 1, %s896_s19   ;;  %s1167_s12 = smov %s872_s13 }
 0x171   : > { %p13_p1 = scmp.ge.s32.totalorder %s16_s19, 6   ;;  %s1168_s13 = smov %s876_s14 }
 0x172   : > { %s1169_s14 = smov %s989_s5  ;;  %s1170_s15 = smov %s888_s17 }
 0x173   : > { %s1171_s16 = smov %s892_s18  ;;  %s1172_s17 = smov %s1175_s21 }
 0x174   : > { %s1173_s18 = smov %s1179_s22  ;;  %15 = sbr.rel (!%p13_p1) target bundleno = 5 (0x5), region = 81 }
 0x179   :  { %646 = vsyncpa [#allocation4], 1 }
 0x17a   :  { %648 = vsyncpa [#allocation4 + $0x1], 1 }

// kernel: res_generator_forward.18
= control target key start
LH: loop header
LB: loop body
LE: loop exit
PB: predicated region body
PF: predicated region fallthrough
CT: control target
= control target key end

     0   :  { %s1253_s12 = smov 0   ;;  %s1255_s13 = smov 0   ;;  %s1500_s0 = inlined_call_operand.vmem [shape: f32[8,512], index: 0, kind: input, shape index: {}]   ;;  %s1501_s1 = inlined_call_operand.vmem [shape: bf16[512,256], index: 1, kind: input, shape index: {}]   ;;  %s1502_s2 = inlined_call_operand.vmem [shape: f32[1,256], index: 2, kind: input, shape index: {}]   ;;  %s1503_s3 = inlined_call_operand.vmem [shape: f32[8,256], index: 3, kind: output, shape index: {}]  }
   0x1   :  { %s1257_s14 = smov 0   ;;  %s1259_s15 = smov 0  }
   0x2   :  { %s1261_s16 = smov 0  }
   0x3 LB: > { %s22_s17 = sadd.s32 1, %s1227_s15  ;;  %p65_p1 = scmp.ne.s32.totalorder %s1219_s13, %s1215_s12  ;;  %s1231_s16 = sphi %s1261_s16, %s13_s16   ;;  %s1227_s15 = sphi %s1259_s15, %s1507_s15   ;;  %s1223_s14 = sphi %s1257_s14, %s1506_s14   ;;  %s1219_s13 = sphi %s1255_s13, %s1505_s13   ;;  %s1215_s12 = sphi %s1253_s12, %s1504_s12  }
   0x4   : > { %p23_p0 = scmp.ge.s32.totalorder %s22_s17, 2  ;;  %p66_p2 = scmp.eq.s32.totalorder %s1231_s16, 0 }
   0x5   : > { %s58_s19 = sadd.s32 1, %s1219_s13  ;;  %p913_p5 = scmp.ge.s32.totalorder %s1231_s16, 2 }
   0x6   : > { %s1509_s17 = smov (%p23_p0, %s22_s17), 0  ;;  %p67_p3 = por %p66_p2, %p65_p1 }
   0x7   : > { %s55_s18 = ssub.s32 %s1227_s15, %s1509_s17  ;;  %153 = sbr.rel (%p913_p5) target bundleno = 58 (0x3a), region = 20 }
   0x8   : > { %p56_p4 = scmp.eq.s32.totalorder %s55_s18, 0 }
   0xa   : > { %s1288_s20 = scalar_select %p56_p4, %s1219_s13, %s58_s19  }
   0xc   : > { %156 = sbr.rel (!%p67_p3) target bundleno = 58 (0x3a), region = 24  ;;  %s158_s21 = sand.u32 (%p67_p3), 1, %s1219_s13  }
   0xd   : > { %s915_s22 = sshll.u32 (%p67_p3), %s1227_s15, 2  ;;  %s914_s23 = sshll.u32 (%p67_p3), %s158_s21, 8 }
   0xe   : > { %s1296_s26 = scalar_lea.vmem (%p67_p3), %s1501_s1, %s915_s22  ;;  %s1300_s27 = scalar_lea.vmem (%p67_p3), [#allocation2], %s914_s23 }
   0xf   : > { %v179_v0 = vld [vmem:[%s1296_s26] sm:$0xf] (%p67_p3)  ;;  %v181_v1 = vld [vmem:[%s1296_s26 + $0x8] sm:$0xf] (%p67_p3)  ;;  %v183_v2 = vld [vmem:[%s1296_s26 + $0x10] sm:$0xf] (%p67_p3) }
  0x10   : > { %180 = vst [vmem:[%s1300_s27] sm:$0xf] (%p67_p3), %v179_v0  ;;  %182 = vst [vmem:[%s1300_s27 + $0x4] sm:$0xf] (%p67_p3), %v181_v1  ;;  %v185_v3 = vld [vmem:[%s1296_s26 + $0x18] sm:$0xf] (%p67_p3) }
  0x11   : > { %v187_v4 = vld [vmem:[%s1296_s26 + $0x20] sm:$0xf]  ;;  %184 = vst [vmem:[%s1300_s27 + $0x8] sm:$0xf] %v183_v2  ;;  %186 = vst [vmem:[%s1300_s27 + $0xc] sm:$0xf] %v185_v3 }
  0x12   : > { %188 = vst [vmem:[%s1300_s27 + $0x10] sm:$0xf] %v187_v4  ;;  %v189_v5 = vld [vmem:[%s1296_s26 + $0x28] sm:$0xf]  ;;  %v191_v6 = vld [vmem:[%s1296_s26 + $0x30] sm:$0xf] }
  0x13   : > { %v193_v7 = vld [vmem:[%s1296_s26 + $0x38] sm:$0xf]  ;;  %190 = vst [vmem:[%s1300_s27 + $0x14] sm:$0xf] %v189_v5  ;;  %192 = vst [vmem:[%s1300_s27 + $0x18] sm:$0xf] %v191_v6 }
  0x14   : > { %194 = vst [vmem:[%s1300_s27 + $0x1c] sm:$0xf] %v193_v7  ;;  %v195_v8 = vld [vmem:[%s1296_s26 + $0x40] sm:$0xf]  ;;  %v197_v9 = vld [vmem:[%s1296_s26 + $0x48] sm:$0xf] }
  0x15   : > { %v199_v10 = vld [vmem:[%s1296_s26 + $0x50] sm:$0xf]  ;;  %196 = vst [vmem:[%s1300_s27 + $0x20] sm:$0xf] %v195_v8  ;;  %198 = vst [vmem:[%s1300_s27 + $0x24] sm:$0xf] %v197_v9 }
  0x16   : > { %200 = vst [vmem:[%s1300_s27 + $0x28] sm:$0xf] %v199_v10  ;;  %v201_v11 = vld [vmem:[%s1296_s26 + $0x58] sm:$0xf]  ;;  %v203_v12 = vld [vmem:[%s1296_s26 + $0x60] sm:$0xf] }
  0x17   : > { %v205_v13 = vld [vmem:[%s1296_s26 + $0x68] sm:$0xf]  ;;  %202 = vst [vmem:[%s1300_s27 + $0x2c] sm:$0xf] %v201_v11  ;;  %204 = vst [vmem:[%s1300_s27 + $0x30] sm:$0xf] %v203_v12 }
  0x18   : > { %206 = vst [vmem:[%s1300_s27 + $0x34] sm:$0xf] %v205_v13  ;;  %v207_v14 = vld [vmem:[%s1296_s26 + $0x70] sm:$0xf]  ;;  %v209_v15 = vld [vmem:[%s1296_s26 + $0x78] sm:$0xf] }
  0x19   : > { %v211_v16 = vld [vmem:[%s1296_s26 + $0x80] sm:$0xf]  ;;  %208 = vst [vmem:[%s1300_s27 + $0x38] sm:$0xf] %v207_v14  ;;  %210 = vst [vmem:[%s1300_s27 + $0x3c] sm:$0xf] %v209_v15 }
  0x1a   : > { %212 = vst [vmem:[%s1300_s27 + $0x40] sm:$0xf] %v211_v16  ;;  %v213_v17 = vld [vmem:[%s1296_s26 + $0x88] sm:$0xf]  ;;  %v215_v18 = vld [vmem:[%s1296_s26 + $0x90] sm:$0xf] }
  0x1b   : > { %v217_v19 = vld [vmem:[%s1296_s26 + $0x98] sm:$0xf]  ;;  %214 = vst [vmem:[%s1300_s27 + $0x44] sm:$0xf] %v213_v17  ;;  %216 = vst [vmem:[%s1300_s27 + $0x48] sm:$0xf] %v215_v18 }
  0x1c   : > { %218 = vst [vmem:[%s1300_s27 + $0x4c] sm:$0xf] %v217_v19  ;;  %v219_v20 = vld [vmem:[%s1296_s26 + $0xa0] sm:$0xf]  ;;  %v221_v21 = vld [vmem:[%s1296_s26 + $0xa8] sm:$0xf] }
  0x1d   : > { %v223_v22 = vld [vmem:[%s1296_s26 + $0xb0] sm:$0xf]  ;;  %220 = vst [vmem:[%s1300_s27 + $0x50] sm:$0xf] %v219_v20  ;;  %222 = vst [vmem:[%s1300_s27 + $0x54] sm:$0xf] %v221_v21 }
  0x1e   : > { %224 = vst [vmem:[%s1300_s27 + $0x58] sm:$0xf] %v223_v22  ;;  %v225_v23 = vld [vmem:[%s1296_s26 + $0xb8] sm:$0xf]  ;;  %v227_v24 = vld [vmem:[%s1296_s26 + $0xc0] sm:$0xf] }
  0x1f   : > { %v229_v25 = vld [vmem:[%s1296_s26 + $0xc8] sm:$0xf]  ;;  %226 = vst [vmem:[%s1300_s27 + $0x5c] sm:$0xf] %v225_v23  ;;  %228 = vst [vmem:[%s1300_s27 + $0x60] sm:$0xf] %v227_v24 }
  0x20   : > { %230 = vst [vmem:[%s1300_s27 + $0x64] sm:$0xf] %v229_v25  ;;  %v231_v26 = vld [vmem:[%s1296_s26 + $0xd0] sm:$0xf]  ;;  %v233_v27 = vld [vmem:[%s1296_s26 + $0xd8] sm:$0xf] }
  0x21   : > { %v235_v28 = vld [vmem:[%s1296_s26 + $0xe0] sm:$0xf]  ;;  %232 = vst [vmem:[%s1300_s27 + $0x68] sm:$0xf] %v231_v26  ;;  %234 = vst [vmem:[%s1300_s27 + $0x6c] sm:$0xf] %v233_v27 }
  0x22   : > { %236 = vst [vmem:[%s1300_s27 + $0x70] sm:$0xf] %v235_v28  ;;  %v237_v29 = vld [vmem:[%s1296_s26 + $0xe8] sm:$0xf]  ;;  %v239_v30 = vld [vmem:[%s1296_s26 + $0xf0] sm:$0xf] }
  0x23   : > { %v241_v31 = vld [vmem:[%s1296_s26 + $0xf8] sm:$0xf]  ;;  %238 = vst [vmem:[%s1300_s27 + $0x74] sm:$0xf] %v237_v29  ;;  %240 = vst [vmem:[%s1300_s27 + $0x78] sm:$0xf] %v239_v30 }
  0x24   : > { %242 = vst [vmem:[%s1300_s27 + $0x7c] sm:$0xf] %v241_v31  ;;  %v243_v32 = vld [vmem:[%s1296_s26 + $0x100] sm:$0xf]  ;;  %v245_v33 = vld [vmem:[%s1296_s26 + $0x108] sm:$0xf] }
  0x25   : > { %v247_v34 = vld [vmem:[%s1296_s26 + $0x110] sm:$0xf]  ;;  %244 = vst [vmem:[%s1300_s27 + $0x80] sm:$0xf] %v243_v32  ;;  %246 = vst [vmem:[%s1300_s27 + $0x84] sm:$0xf] %v245_v33 }
  0x26   : > { %248 = vst [vmem:[%s1300_s27 + $0x88] sm:$0xf] %v247_v34  ;;  %v249_v35 = vld [vmem:[%s1296_s26 + $0x118] sm:$0xf]  ;;  %v251_v36 = vld [vmem:[%s1296_s26 + $0x120] sm:$0xf] }
  0x27   : > { %v253_v37 = vld [vmem:[%s1296_s26 + $0x128] sm:$0xf]  ;;  %250 = vst [vmem:[%s1300_s27 + $0x8c] sm:$0xf] %v249_v35  ;;  %252 = vst [vmem:[%s1300_s27 + $0x90] sm:$0xf] %v251_v36 }
  0x28   : > { %254 = vst [vmem:[%s1300_s27 + $0x94] sm:$0xf] %v253_v37  ;;  %v255_v38 = vld [vmem:[%s1296_s26 + $0x130] sm:$0xf]  ;;  %v257_v39 = vld [vmem:[%s1296_s26 + $0x138] sm:$0xf] }
  0x29   : > { %v259_v40 = vld [vmem:[%s1296_s26 + $0x140] sm:$0xf]  ;;  %256 = vst [vmem:[%s1300_s27 + $0x98] sm:$0xf] %v255_v38  ;;  %258 = vst [vmem:[%s1300_s27 + $0x9c] sm:$0xf] %v257_v39 }
  0x2a   : > { %260 = vst [vmem:[%s1300_s27 + $0xa0] sm:$0xf] %v259_v40  ;;  %v261_v41 = vld [vmem:[%s1296_s26 + $0x148] sm:$0xf]  ;;  %v263_v42 = vld [vmem:[%s1296_s26 + $0x150] sm:$0xf] }
  0x2b   : > { %v265_v43 = vld [vmem:[%s1296_s26 + $0x158] sm:$0xf]  ;;  %262 = vst [vmem:[%s1300_s27 + $0xa4] sm:$0xf] %v261_v41  ;;  %264 = vst [vmem:[%s1300_s27 + $0xa8] sm:$0xf] %v263_v42 }
  0x2c   : > { %266 = vst [vmem:[%s1300_s27 + $0xac] sm:$0xf] %v265_v43  ;;  %v267_v44 = vld [vmem:[%s1296_s26 + $0x160] sm:$0xf]  ;;  %v269_v45 = vld [vmem:[%s1296_s26 + $0x168] sm:$0xf] }
  0x2d   : > { %v271_v46 = vld [vmem:[%s1296_s26 + $0x170] sm:$0xf]  ;;  %268 = vst [vmem:[%s1300_s27 + $0xb0] sm:$0xf] %v267_v44  ;;  %270 = vst [vmem:[%s1300_s27 + $0xb4] sm:$0xf] %v269_v45 }
  0x2e   : > { %272 = vst [vmem:[%s1300_s27 + $0xb8] sm:$0xf] %v271_v46  ;;  %v273_v47 = vld [vmem:[%s1296_s26 + $0x178] sm:$0xf]  ;;  %v275_v48 = vld [vmem:[%s1296_s26 + $0x180] sm:$0xf] }
  0x2f   : > { %v277_v49 = vld [vmem:[%s1296_s26 + $0x188] sm:$0xf]  ;;  %274 = vst [vmem:[%s1300_s27 + $0xbc] sm:$0xf] %v273_v47  ;;  %276 = vst [vmem:[%s1300_s27 + $0xc0] sm:$0xf] %v275_v48 }
  0x30   : > { %278 = vst [vmem:[%s1300_s27 + $0xc4] sm:$0xf] %v277_v49  ;;  %v279_v50 = vld [vmem:[%s1296_s26 + $0x190] sm:$0xf]  ;;  %v281_v51 = vld [vmem:[%s1296_s26 + $0x198] sm:$0xf] }
  0x31   : > { %v283_v52 = vld [vmem:[%s1296_s26 + $0x1a0] sm:$0xf]  ;;  %280 = vst [vmem:[%s1300_s27 + $0xc8] sm:$0xf] %v279_v50  ;;  %282 = vst [vmem:[%s1300_s27 + $0xcc] sm:$0xf] %v281_v51 }
  0x32   : > { %284 = vst [vmem:[%s1300_s27 + $0xd0] sm:$0xf] %v283_v52  ;;  %v285_v53 = vld [vmem:[%s1296_s26 + $0x1a8] sm:$0xf]  ;;  %v287_v54 = vld [vmem:[%s1296_s26 + $0x1b0] sm:$0xf] }
  0x33   : > { %v289_v55 = vld [vmem:[%s1296_s26 + $0x1b8] sm:$0xf]  ;;  %286 = vst [vmem:[%s1300_s27 + $0xd4] sm:$0xf] %v285_v53  ;;  %288 = vst [vmem:[%s1300_s27 + $0xd8] sm:$0xf] %v287_v54 }
  0x34   : > { %290 = vst [vmem:[%s1300_s27 + $0xdc] sm:$0xf] %v289_v55  ;;  %v291_v56 = vld [vmem:[%s1296_s26 + $0x1c0] sm:$0xf]  ;;  %v293_v57 = vld [vmem:[%s1296_s26 + $0x1c8] sm:$0xf] }
  0x35   : > { %v295_v58 = vld [vmem:[%s1296_s26 + $0x1d0] sm:$0xf]  ;;  %292 = vst [vmem:[%s1300_s27 + $0xe0] sm:$0xf] %v291_v56  ;;  %294 = vst [vmem:[%s1300_s27 + $0xe4] sm:$0xf] %v293_v57 }
  0x36   : > { %296 = vst [vmem:[%s1300_s27 + $0xe8] sm:$0xf] %v295_v58  ;;  %v297_v59 = vld [vmem:[%s1296_s26 + $0x1d8] sm:$0xf]  ;;  %v299_v60 = vld [vmem:[%s1296_s26 + $0x1e0] sm:$0xf] }
  0x37   : > { %v301_v61 = vld [vmem:[%s1296_s26 + $0x1e8] sm:$0xf]  ;;  %298 = vst [vmem:[%s1300_s27 + $0xec] sm:$0xf] %v297_v59  ;;  %300 = vst [vmem:[%s1300_s27 + $0xf0] sm:$0xf] %v299_v60 }
  0x38   : > { %302 = vst [vmem:[%s1300_s27 + $0xf4] sm:$0xf] %v301_v61  ;;  %v303_v62 = vld [vmem:[%s1296_s26 + $0x1f0] sm:$0xf]  ;;  %v305_v63 = vld [vmem:[%s1296_s26 + $0x1f8] sm:$0xf] }
  0x39   : > { %304 = vst [vmem:[%s1300_s27 + $0xf8] sm:$0xf] %v303_v62  ;;  %306 = vst [vmem:[%s1300_s27 + $0xfc] sm:$0xf] %v305_v63 }
  0x3a PF: > { %p916_p6 = scmp.ge.s32.totalorder %s1231_s16, 1  ;;  %p463_p7 = scmp.lt.s32.totalorder %s1231_s16, 3 }
  0x3c   : > { %p464_p8 = pnand %p916_p6, %p463_p7 }
  0x3d   : > { %s470_s28 = sand.u32 (!%p464_p8), 1, %s1215_s12   ;;  %p509_p9 = scmp.lt.s32.totalorder (!%p464_p8), %s1223_s14, 1 }
  0x3e   : > { %467 = sbr.rel (%p464_p8) target bundleno = 320 (0x140), region = 69  ;;  %s917_s6 = sshll.u32 (!%p464_p8), %s470_s28, 8 }
  0x3f   : > { %s1437_s7 = scalar_lea.vmem (!%p464_p8), [#allocation2], %s917_s6 }
  0x43   : > { %v521_v0 = vld [vmem:[%s1500_s0 + $0x8] sm:$0xff]  ;;  %v523_v1 = vld [vmem:[%s1500_s0 + $0x18] sm:$0xff]  ;;  %v1063_v10 = vld [vmem:[%s1437_s7 + $0x70] sm:$0xff]   ;;  %s1511_s14 = smov (!%p509_p9, %s1223_s14), 1 }
  0x44   : > { %723 = vmatprep.mubr.f32.mxu0 %v521_v0  ;;  %793 = vmatprep.mubr.f32.mxu1 %v523_v1  ;;  %v1064_v2 = vld [vmem:[%s1437_s7 + $0x78] sm:$0xff]   ;;  %v1079_v11 = vld [vmem:[%s1437_s7 + $0xf0] sm:$0xff]   ;;  %v981_v18 = vunpack.c.h.bf16 %v1063_v10  ;;  %v1062_v22 = vld [vmem:[%s1437_s7 + $0x68] sm:$0xff]   ;;  %v980_v24 = vunpack.c.l.bf16 %v1063_v10  ;;  %s511_s19 = scalar_lea.vmem %s1502_s2, %s1511_s14  ;;  %s918_s21 = sshll.u32 %s1511_s14, 3 }
  0x45   : > { %v1080_v3 = vld [vmem:[%s1437_s7 + $0xf8] sm:$0xff]   ;;  %v984_v5 = vunpack.c.l.bf16 %v1064_v2  ;;  %v985_v6 = vunpack.c.h.bf16 %v1064_v2  ;;  %v1055_v16 = vld [vmem:[%s1437_s7 + $0x30] sm:$0xff]   ;;  %v1045_v19 = vunpack.c.h.bf16 %v1079_v11  ;;  %v1078_v23 = vld [vmem:[%s1437_s7 + $0xe8] sm:$0xff]   ;;  %v1044_v25 = vunpack.c.l.bf16 %v1079_v11  ;;  %s519_s24 = scalar_lea.vmem %s1503_s3, %s918_s21 }
  0x46   : > { %v1056_v4 = vld [vmem:[%s1437_s7 + $0x38] sm:$0xff]   ;;  %v1048_v7 = vunpack.c.l.bf16 %v1080_v3  ;;  %v1049_v8 = vunpack.c.h.bf16 %v1080_v3  ;;  %v1071_v17 = vld [vmem:[%s1437_s7 + $0xb0] sm:$0xff]   ;;  %v949_v20 = vunpack.c.h.bf16 %v1055_v16  ;;  %v1054_v26 = vld [vmem:[%s1437_s7 + $0x28] sm:$0xff]   ;;  %v948_v28 = vunpack.c.l.bf16 %v1055_v16 }
  0x47   : > { %v1072_v9 = vld [vmem:[%s1437_s7 + $0xb8] sm:$0xff]   ;;  %v952_v12 = vunpack.c.l.bf16 %v1056_v4  ;;  %v953_v13 = vunpack.c.h.bf16 %v1056_v4  ;;  %1081 = vmatprep.subr.mxu0 %v985_v6  ;;  %v1013_v21 = vunpack.c.h.bf16 %v1071_v17  ;;  %v1070_v27 = vld [vmem:[%s1437_s7 + $0xa8] sm:$0xff]   ;;  %v1012_v29 = vunpack.c.l.bf16 %v1071_v17  ;;  %v1061_v34 = vld [vmem:[%s1437_s7 + $0x60] sm:$0xff]  }
  0x48   : > { %v1016_v14 = vunpack.c.l.bf16 %v1072_v9  ;;  %v1017_v15 = vunpack.c.h.bf16 %v1072_v9  ;;  %1116 = vmatprep.subr.mxu1 %v1049_v8  ;;  %v977_v30 = vunpack.c.h.bf16 %v1062_v22  ;;  %v1041_v31 = vunpack.c.h.bf16 %v1078_v23  ;;  %v1077_v35 = vld [vmem:[%s1437_s7 + $0xe0] sm:$0xff]   ;;  %v1060_v46 = vld [vmem:[%s1437_s7 + $0x58] sm:$0xff]   ;;  %v1059_v58 = vld [vmem:[%s1437_s7 + $0x50] sm:$0xff]  }
  0x49   : > { %1082 = vmatpush3.msra.mxu0 %v953_v13  ;;  %v945_v32 = vunpack.c.h.bf16 %v1054_v26  ;;  %v1009_v33 = vunpack.c.h.bf16 %v1070_v27  ;;  %v976_v36 = vunpack.c.l.bf16 %v1062_v22  ;;  %v1040_v37 = vunpack.c.l.bf16 %v1078_v23  ;;  %v1053_v38 = vld [vmem:[%s1437_s7 + $0x20] sm:$0xff]   ;;  %v1076_v47 = vld [vmem:[%s1437_s7 + $0xd8] sm:$0xff]   ;;  %v1075_v59 = vld [vmem:[%s1437_s7 + $0xd0] sm:$0xff]  }
  0x4a   : > { %1117 = vmatpush3.msra.mxu1 %v1017_v15  ;;  %1083 = vmatprep.subr.mxu0 %v984_v5  ;;  %v1069_v39 = vld [vmem:[%s1437_s7 + $0xa0] sm:$0xff]   ;;  %v944_v40 = vunpack.c.l.bf16 %v1054_v26  ;;  %v1008_v41 = vunpack.c.l.bf16 %v1070_v27  ;;  %v973_v42 = vunpack.c.h.bf16 %v1061_v34  ;;  %v1037_v43 = vunpack.c.h.bf16 %v1077_v35  ;;  %v1052_v50 = vld [vmem:[%s1437_s7 + $0x18] sm:$0xff]   ;;  %v1051_v62 = vld [vmem:[%s1437_s7 + $0x10] sm:$0xff]  }
  0x4b   : > { %1118 = vmatprep.subr.mxu1 %v1048_v7  ;;  %1084 = vmatpush3.msra.mxu0 %v952_v12  ;;  %v941_v44 = vunpack.c.h.bf16 %v1053_v38  ;;  %v1005_v45 = vunpack.c.h.bf16 %v1069_v39  ;;  %v972_v48 = vunpack.c.l.bf16 %v1061_v34  ;;  %v1036_v49 = vunpack.c.l.bf16 %v1077_v35  ;;  %v1068_v51 = vld [vmem:[%s1437_s7 + $0x98] sm:$0xff]   ;;  %v1067_v63 = vld [vmem:[%s1437_s7 + $0x90] sm:$0xff]   ;;  %v1058_v6 = vld [vmem:[%s1437_s7 + $0x48] sm:$0xff]  }
  0x4c   : > { %1119 = vmatpush3.msra.mxu1 %v1016_v14  ;;  %1085 = vmatprep.subr.mxu0 %v981_v18  ;;  %v940_v52 = vunpack.c.l.bf16 %v1053_v38  ;;  %v1004_v53 = vunpack.c.l.bf16 %v1069_v39  ;;  %v969_v54 = vunpack.c.h.bf16 %v1060_v46  ;;  %v1033_v55 = vunpack.c.h.bf16 %v1076_v47  ;;  %v1074_v7 = vld [vmem:[%s1437_s7 + $0xc8] sm:$0xff]   ;;  %v1057_v18 = vld [vmem:[%s1437_s7 + $0x40] sm:$0xff]   ;;  %v522_v35 = vld [vmem:[%s1500_s0 + $0x10] sm:$0xff] }
  0x4d   : > { %1120 = vmatprep.subr.mxu1 %v1045_v19  ;;  %1086 = vmatpush3.msra.mxu0 %v949_v20  ;;  %v937_v56 = vunpack.c.h.bf16 %v1052_v50  ;;  %v1001_v57 = vunpack.c.h.bf16 %v1068_v51  ;;  %v968_v60 = vunpack.c.l.bf16 %v1060_v46  ;;  %v1032_v61 = vunpack.c.l.bf16 %v1076_v47  ;;  %v1050_v10 = vld [vmem:[%s1437_s7 + $0x8] sm:$0xff]   ;;  %v1073_v19 = vld [vmem:[%s1437_s7 + $0xc0] sm:$0xff]  }
  0x4e   : > { %1121 = vmatpush3.msra.mxu1 %v1013_v21  ;;  %1087 = vmatprep.subr.mxu0 %v980_v24  ;;  %v936_v0 = vunpack.c.l.bf16 %v1052_v50  ;;  %v1000_v1 = vunpack.c.l.bf16 %v1068_v51  ;;  %v965_v2 = vunpack.c.h.bf16 %v1059_v58  ;;  %v1029_v3 = vunpack.c.h.bf16 %v1075_v59  ;;  %v1066_v11 = vld [vmem:[%s1437_s7 + $0x88] sm:$0xff]   ;;  %v923_v22 = vld [vmem:[%s1437_s7] sm:$0xff]  }
  0x4f   : > { %1122 = vmatprep.subr.mxu1 %v1044_v25  ;;  %1088 = vmatpush3.msra.mxu0 %v948_v28  ;;  %v933_v4 = vunpack.c.h.bf16 %v1051_v62  ;;  %v997_v5 = vunpack.c.h.bf16 %v1067_v63  ;;  %v964_v8 = vunpack.c.l.bf16 %v1059_v58  ;;  %v1028_v9 = vunpack.c.l.bf16 %v1075_v59  ;;  %v1065_v23 = vld [vmem:[%s1437_s7 + $0x80] sm:$0xff]  }
  0x50   : > { %1123 = vmatpush3.msra.mxu1 %v1012_v29  ;;  %1089 = vmatprep.subr.mxu0 %v977_v30  ;;  %v932_v12 = vunpack.c.l.bf16 %v1051_v62  ;;  %v996_v13 = vunpack.c.l.bf16 %v1067_v63  ;;  %v961_v14 = vunpack.c.h.bf16 %v1058_v6  ;;  %v1025_v15 = vunpack.c.h.bf16 %v1074_v7  ;;  %v520_v34 = vld [vmem:[%s1500_s0] sm:$0xff] }
  0x51   : > { %1124 = vmatprep.subr.mxu1 %v1041_v31  ;;  %1090 = vmatpush3.msra.mxu0 %v945_v32  ;;  %v929_v16 = vunpack.c.h.bf16 %v1050_v10  ;;  %v993_v17 = vunpack.c.h.bf16 %v1066_v11  ;;  %v960_v20 = vunpack.c.l.bf16 %v1058_v6  ;;  %v1024_v21 = vunpack.c.l.bf16 %v1074_v7  ;;  %v919_v38 = vld [vmem:[%s511_s19] ss:$0 sm:$0xff] }
  0x52   : > { %1125 = vmatpush3.msra.mxu1 %v1009_v33  ;;  %1091 = vmatprep.subr.mxu0 %v976_v36  ;;  %v928_v24 = vunpack.c.l.bf16 %v1050_v10  ;;  %v992_v25 = vunpack.c.l.bf16 %v1066_v11  ;;  %v957_v26 = vunpack.c.h.bf16 %v1057_v18  ;;  %v1021_v27 = vunpack.c.h.bf16 %v1073_v19 }
  0x53   : > { %1126 = vmatprep.subr.mxu1 %v1040_v37  ;;  %1092 = vmatpush3.msra.mxu0 %v944_v40  ;;  %v925_v28 = vunpack.c.h.bf16 %v923_v22  ;;  %v989_v29 = vunpack.c.h.bf16 %v1065_v23  ;;  %v956_v30 = vunpack.c.l.bf16 %v1057_v18  ;;  %v1020_v31 = vunpack.c.l.bf16 %v1073_v19 }
  0x54   : > { %1127 = vmatpush3.msra.mxu1 %v1008_v41  ;;  %1093 = vmatprep.subr.mxu0 %v973_v42  ;;  %v924_v32 = vunpack.c.l.bf16 %v923_v22  ;;  %v988_v33 = vunpack.c.l.bf16 %v1065_v23 }
  0x55   : > { %1128 = vmatprep.subr.mxu1 %v1037_v43  ;;  %1094 = vmatpush3.msra.mxu0 %v941_v44 }
  0x56   : > { %1129 = vmatpush3.msra.mxu1 %v1005_v45  ;;  %1095 = vmatprep.subr.mxu0 %v972_v48 }
  0x57   : > { %1130 = vmatprep.subr.mxu1 %v1036_v49  ;;  %1096 = vmatpush3.msra.mxu0 %v940_v52 }
  0x58   : > { %1131 = vmatpush3.msra.mxu1 %v1004_v53  ;;  %1097 = vmatprep.subr.mxu0 %v969_v54 }
  0x59   : > { %1132 = vmatprep.subr.mxu1 %v1033_v55  ;;  %1098 = vmatpush3.msra.mxu0 %v937_v56 }
  0x5a   : > { %1133 = vmatpush3.msra.mxu1 %v1001_v57  ;;  %1099 = vmatprep.subr.mxu0 %v968_v60 }
  0x5b   : > { %1134 = vmatprep.subr.mxu1 %v1032_v61  ;;  %1100 = vmatpush3.msra.mxu0 %v936_v0 }
  0x5c   : > { %1135 = vmatpush3.msra.mxu1 %v1000_v1  ;;  %1101 = vmatprep.subr.mxu0 %v965_v2 }
  0x5d   : > { %1136 = vmatprep.subr.mxu1 %v1029_v3  ;;  %1102 = vmatpush3.msra.mxu0 %v933_v4 }
  0x5e   : > { %1137 = vmatpush3.msra.mxu1 %v997_v5  ;;  %1103 = vmatprep.subr.mxu0 %v964_v8 }
  0x5f   : > { %1138 = vmatprep.subr.mxu1 %v1028_v9  ;;  %1104 = vmatpush3.msra.mxu0 %v932_v12 }
  0x60   : > { %1139 = vmatpush3.msra.mxu1 %v996_v13  ;;  %1105 = vmatprep.subr.mxu0 %v961_v14 }
  0x61   : > { %1140 = vmatprep.subr.mxu1 %v1025_v15  ;;  %1106 = vmatpush3.msra.mxu0 %v929_v16 }
  0x62   : > { %1141 = vmatpush3.msra.mxu1 %v993_v17  ;;  %1107 = vmatprep.subr.mxu0 %v960_v20 }
  0x63   : > { %1142 = vmatprep.subr.mxu1 %v1024_v21  ;;  %1108 = vmatpush3.msra.mxu0 %v928_v24 }
  0x64   : > { %1143 = vmatpush3.msra.mxu1 %v992_v25  ;;  %1109 = vmatprep.subr.mxu0 %v957_v26 }
  0x65   : > { %1144 = vmatprep.subr.mxu1 %v1021_v27  ;;  %1110 = vmatpush3.msra.mxu0 %v925_v28 }
  0x66   : > { %1145 = vmatpush3.msra.mxu1 %v989_v29  ;;  %1111 = vmatprep.subr.mxu0 %v956_v30 }
  0x67   : > { %1146 = vmatprep.subr.mxu1 %v1020_v31  ;;  %1112 = vmatpush3.msra.mxu0 %v924_v32 }
  0x68   : > { %1147 = vmatpush3.msra.mxu1 %v988_v33  ;;  %724 = vmatmul.mubr.f32.vlgmr.msra.gmra.mxu0 %v520_v34 }
  0x69   : > { %794 = vmatmul.mubr.f32.vlgmr.msra.gmra.mxu1 %v522_v35 }
 0x128   : > { %v1113_v36 = vpop.f32.mrf.mxu0 }
 0x129   : > { %v1148_v37 = vpop.f32.mrf.mxu1 }
 0x12a   : > { %v1114_v39 = vpop.f32.mrf.mxu0 }
 0x12b   : > { %v1149_v40 = vpop.f32.mrf.mxu1  ;;  %v1115_v41 = vadd.f32 %v1114_v39, %v1113_v36 }
 0x12c   : > { %v1150_v43 = vadd.f32 %v1149_v40, %v1148_v37 }
 0x12d   : > { %v726_v42 = vadd.f32 %v1115_v41, %v919_v38 }
 0x12f   : > { %v796_v44 = vadd.f32 %v1150_v43, %v726_v42 }
 0x131   : > { %1191 = vtanh.f32 %v796_v44 }
 0x13e   : > { %v1192_v45 = vpop.eup %1191 }
 0x13f   : > { %800 = vst [vmem:[%s519_s24] sm:$0xff] %v1192_v45 }
 0x140 PF: > { %s13_s16 = sadd.s32 1, %s1231_s16   ;;  %s1504_s12 = smov %s1219_s13 }
 0x141   : > { %p10_p10 = scmp.ge.s32.totalorder %s13_s16, 4   ;;  %s1505_s13 = smov %s1288_s20 }
 0x142   : > { %s1506_s14 = smov %s1227_s15  ;;  %s1507_s15 = smov %s1509_s17 }
 0x143   :  { %12 = sbr.rel (!%p10_p10) target bundleno = 3 (0x3), region = 114 }

// kernel: res_generator_forward.19
= control target key start
LH: loop header
LB: loop body
LE: loop exit
PB: predicated region body
PF: predicated region fallthrough
CT: control target
= control target key end

     0   :  { %7 = vsyncpa [#allocation4], 0  ;;  %s1061_s0 = inlined_call_operand.vmem [shape: f32[8,256], index: 0, kind: input, shape index: {}]   ;;  %s1062_s1 = inlined_call_operand.vmem [shape: bf16[256,384], index: 1, kind: input, shape index: {}]   ;;  %s1063_s2 = inlined_call_operand.hbm [shape: f32[8,384], index: 2, kind: output, shape index: {}]  }
   0x1   :  { %9 = vsyncpa [#allocation4 + $0x1], 0  ;;  %s863_s9 = smov 0   ;;  %s865_s10 = smov 0  }
   0x2   :  { %s867_s11 = smov 0   ;;  %s869_s12 = smov 0  }
   0x3   :  { %s871_s13 = smov 0   ;;  %s873_s14 = smov 0  }
   0x4 LB: > { %s586_s15 = sadd.s32 4294967295, %s845_s14   ;;  %s587_s16 = sadd.s32 4294967294, %s845_s14   ;;  %s845_s14 = sphi %s873_s14, %s15_s14   ;;  %s841_s13 = sphi %s871_s13, %s1070_s13   ;;  %s837_s12 = sphi %s869_s12, %s1069_s12   ;;  %s833_s11 = sphi %s867_s11, %s1068_s11   ;;  %s829_s10 = sphi %s865_s10, %s1067_s10   ;;  %s825_s9 = sphi %s863_s9, %s1066_s9  }
   0x5   : > { %s24_s17 = sadd.s32 1, %s841_s13  ;;  %s60_s18 = sadd.s32 1, %s833_s11 }
   0x6   : > { %p25_p0 = scmp.ge.s32.totalorder %s24_s17, 3  ;;  %p67_p1 = scmp.ne.s32.totalorder %s833_s11, %s829_s10 }
   0x7   : > { %p68_p2 = scmp.eq.s32.totalorder %s845_s14, 0  ;;  %p99_p3 = scmp.eq.s32.totalorder %s586_s15, 2 }
   0x8   : > { %s1072_s17 = smov (%p25_p0, %s24_s17), 0  ;;  %p104_p6 = scmp.ne.s32.totalorder %s829_s10, %s825_s9 }
   0x9   : > { %p69_p4 = por %p68_p2, %p67_p1  ;;  %p902_p5 = por %p99_p3, %p67_p1 }
   0xa   : > { %s57_s20 = ssub.s32 %s841_s13, %s1072_s17  ;;  %p105_p8 = scmp.eq.s32.totalorder %s587_s16, 2 }
   0xb   : > { %p58_p7 = scmp.eq.s32.totalorder %s57_s20, 0  ;;  %p590_p10 = scmp.ge.s32.totalorder %s845_s14, 3 }
   0xc   : > { %p913_p9 = por %p105_p8, %p104_p6 }
   0xd   : > { %s911_s21 = scalar_select %p58_p7, %s833_s11, %s60_s18  }
   0xe   : > { %129 = sbr.rel (%p590_p10) target bundleno = 44 (0x2c), region = 20 }
  0x13   : > { %132 = sbr.rel (!%p69_p4) target bundleno = 44 (0x2c), region = 24  ;;  %s134_s23 = sand.u32 (%p69_p4), 1, %s833_s11  }
  0x14   : > { %s592_s24 = sshll.u32 (%p69_p4), %s841_s13, 2  ;;  %s591_s25 = sshll.u32 (%p69_p4), %s134_s23, 7 }
  0x15   : > { %s923_s28 = scalar_lea.vmem (%p69_p4), %s1062_s1, %s592_s24  ;;  %s927_s29 = scalar_lea.vmem (%p69_p4), [#allocation2], %s591_s25 }
  0x16   : > { %v155_v0 = vld [vmem:[%s923_s28] sm:$0xf] (%p69_p4)  ;;  %v157_v1 = vld [vmem:[%s923_s28 + $0xc] sm:$0xf] (%p69_p4)  ;;  %v159_v2 = vld [vmem:[%s923_s28 + $0x18] sm:$0xf] (%p69_p4) }
  0x17   : > { %156 = vst [vmem:[%s927_s29] sm:$0xf] (%p69_p4), %v155_v0  ;;  %158 = vst [vmem:[%s927_s29 + $0x4] sm:$0xf] (%p69_p4), %v157_v1  ;;  %v161_v3 = vld [vmem:[%s923_s28 + $0x24] sm:$0xf] (%p69_p4) }
  0x18   : > { %v163_v4 = vld [vmem:[%s923_s28 + $0x30] sm:$0xf]  ;;  %160 = vst [vmem:[%s927_s29 + $0x8] sm:$0xf] %v159_v2  ;;  %162 = vst [vmem:[%s927_s29 + $0xc] sm:$0xf] %v161_v3 }
  0x19   : > { %164 = vst [vmem:[%s927_s29 + $0x10] sm:$0xf] %v163_v4  ;;  %v165_v5 = vld [vmem:[%s923_s28 + $0x3c] sm:$0xf]  ;;  %v167_v6 = vld [vmem:[%s923_s28 + $0x48] sm:$0xf] }
  0x1a   : > { %v169_v7 = vld [vmem:[%s923_s28 + $0x54] sm:$0xf]  ;;  %166 = vst [vmem:[%s927_s29 + $0x14] sm:$0xf] %v165_v5  ;;  %168 = vst [vmem:[%s927_s29 + $0x18] sm:$0xf] %v167_v6 }
  0x1b   : > { %170 = vst [vmem:[%s927_s29 + $0x1c] sm:$0xf] %v169_v7  ;;  %v171_v8 = vld [vmem:[%s923_s28 + $0x60] sm:$0xf]  ;;  %v173_v9 = vld [vmem:[%s923_s28 + $0x6c] sm:$0xf] }
  0x1c   : > { %v175_v10 = vld [vmem:[%s923_s28 + $0x78] sm:$0xf]  ;;  %172 = vst [vmem:[%s927_s29 + $0x20] sm:$0xf] %v171_v8  ;;  %174 = vst [vmem:[%s927_s29 + $0x24] sm:$0xf] %v173_v9 }
  0x1d   : > { %176 = vst [vmem:[%s927_s29 + $0x28] sm:$0xf] %v175_v10  ;;  %v177_v11 = vld [vmem:[%s923_s28 + $0x84] sm:$0xf]  ;;  %v179_v12 = vld [vmem:[%s923_s28 + $0x90] sm:$0xf] }
  0x1e   : > { %v181_v13 = vld [vmem:[%s923_s28 + $0x9c] sm:$0xf]  ;;  %178 = vst [vmem:[%s927_s29 + $0x2c] sm:$0xf] %v177_v11  ;;  %180 = vst [vmem:[%s927_s29 + $0x30] sm:$0xf] %v179_v12 }
  0x1f   : > { %182 = vst [vmem:[%s927_s29 + $0x34] sm:$0xf] %v181_v13  ;;  %v183_v14 = vld [vmem:[%s923_s28 + $0xa8] sm:$0xf]  ;;  %v185_v15 = vld [vmem:[%s923_s28 + $0xb4] sm:$0xf] }
  0x20   : > { %v187_v16 = vld [vmem:[%s923_s28 + $0xc0] sm:$0xf]  ;;  %184 = vst [vmem:[%s927_s29 + $0x38] sm:$0xf] %v183_v14  ;;  %186 = vst [vmem:[%s927_s29 + $0x3c] sm:$0xf] %v185_v15 }
  0x21   : > { %188 = vst [vmem:[%s927_s29 + $0x40] sm:$0xf] %v187_v16  ;;  %v189_v17 = vld [vmem:[%s923_s28 + $0xcc] sm:$0xf]  ;;  %v191_v18 = vld [vmem:[%s923_s28 + $0xd8] sm:$0xf] }
  0x22   : > { %v193_v19 = vld [vmem:[%s923_s28 + $0xe4] sm:$0xf]  ;;  %190 = vst [vmem:[%s927_s29 + $0x44] sm:$0xf] %v189_v17  ;;  %192 = vst [vmem:[%s927_s29 + $0x48] sm:$0xf] %v191_v18 }
  0x23   : > { %194 = vst [vmem:[%s927_s29 + $0x4c] sm:$0xf] %v193_v19  ;;  %v195_v20 = vld [vmem:[%s923_s28 + $0xf0] sm:$0xf]  ;;  %v197_v21 = vld [vmem:[%s923_s28 + $0xfc] sm:$0xf] }
  0x24   : > { %v199_v22 = vld [vmem:[%s923_s28 + $0x108] sm:$0xf]  ;;  %196 = vst [vmem:[%s927_s29 + $0x50] sm:$0xf] %v195_v20  ;;  %198 = vst [vmem:[%s927_s29 + $0x54] sm:$0xf] %v197_v21 }
  0x25   : > { %200 = vst [vmem:[%s927_s29 + $0x58] sm:$0xf] %v199_v22  ;;  %v201_v23 = vld [vmem:[%s923_s28 + $0x114] sm:$0xf]  ;;  %v203_v24 = vld [vmem:[%s923_s28 + $0x120] sm:$0xf] }
  0x26   : > { %v205_v25 = vld [vmem:[%s923_s28 + $0x12c] sm:$0xf]  ;;  %202 = vst [vmem:[%s927_s29 + $0x5c] sm:$0xf] %v201_v23  ;;  %204 = vst [vmem:[%s927_s29 + $0x60] sm:$0xf] %v203_v24 }
  0x27   : > { %206 = vst [vmem:[%s927_s29 + $0x64] sm:$0xf] %v205_v25  ;;  %v207_v26 = vld [vmem:[%s923_s28 + $0x138] sm:$0xf]  ;;  %v209_v27 = vld [vmem:[%s923_s28 + $0x144] sm:$0xf] }
  0x28   : > { %v211_v28 = vld [vmem:[%s923_s28 + $0x150] sm:$0xf]  ;;  %208 = vst [vmem:[%s927_s29 + $0x68] sm:$0xf] %v207_v26  ;;  %210 = vst [vmem:[%s927_s29 + $0x6c] sm:$0xf] %v209_v27 }
  0x29   : > { %212 = vst [vmem:[%s927_s29 + $0x70] sm:$0xf] %v211_v28  ;;  %v213_v29 = vld [vmem:[%s923_s28 + $0x15c] sm:$0xf]  ;;  %v215_v30 = vld [vmem:[%s923_s28 + $0x168] sm:$0xf] }
  0x2a   : > { %v217_v31 = vld [vmem:[%s923_s28 + $0x174] sm:$0xf]  ;;  %214 = vst [vmem:[%s927_s29 + $0x74] sm:$0xf] %v213_v29  ;;  %216 = vst [vmem:[%s927_s29 + $0x78] sm:$0xf] %v215_v30 }
  0x2b   : > { %218 = vst [vmem:[%s927_s29 + $0x7c] sm:$0xf] %v217_v31 }
  0x2c PF: > { %p593_p11 = scmp.ge.s32.totalorder %s845_s14, 1  ;;  %p305_p12 = scmp.lt.s32.totalorder %s845_s14, 4 }
  0x2e   : > { %p306_p13 = pnand %p593_p11, %p305_p12 }
  0x2f   : > { %s994_s30 = sand.u32 (!%p306_p13), 1, %s829_s10   ;;  %s597_s16 = sshll.u32 (!%p306_p13), %s837_s12, 7 }
  0x30   : > { %309 = sbr.rel (%p306_p13) target bundleno = 298 (0x12a), region = 65  ;;  %s594_s5 = sshll.u32 (!%p306_p13), %s994_s30, 7 }
  0x31   : > { %s1000_s6 = scalar_lea.vmem (!%p306_p13), [#allocation2], %s594_s5  ;;  %s595_s15 = sshll.u32 (!%p306_p13), %s994_s30, 3 }
  0x32   : > { %s337_s18 = scalar_lea.vmem (!%p306_p13), [#allocation3], %s595_s15  ;;  %s494_s25 = scalar_lea.hbm (!%p306_p13), %s1063_s2, %s597_s16 }
  0x33   : > { %s496_s20 = sshll.u32 (!%p306_p13), %s337_s18, 4  ;;  %s481_s26 = scalar_lea.sflag (!%p306_p13), [#allocation4], %s994_s30  ;;  %s497_s20 = int_to_ptr.vmem [resolvable:$true] %s496_s20 }
  0x34   : > { %s769_s27 = scalar_lea.vmem (!%p306_p13), %s497_s20, 128  ;;  %s847_s28 = smov (!%p306_p13), [#allocation3]  }
  0x35   : > { %v344_v32 = vld [vmem:[%s1061_s0 + $0x8] sm:$0xff]  ;;  %v678_v33 = vld [vmem:[%s1000_s6 + $0x78] sm:$0xff]   ;;  %v677_v35 = vld [vmem:[%s1000_s6 + $0x70] sm:$0xff]   ;;  %p770_p0 = scmp.ne.s32.totalorder %s497_s20, %s769_s27  ;;  %s773_s29 = sshll.u32 %s847_s28, 4  ;;  %s774_s29 = int_to_ptr.vmem [resolvable:$false] %s773_s29 }
  0x36   : > { %473 = vmatprep.mubr.f32.mxu0 %v344_v32  ;;  %v670_v34 = vld [vmem:[%s1000_s6 + $0x38] sm:$0xff]   ;;  %v662_v36 = vunpack.c.l.bf16 %v678_v33  ;;  %v663_v37 = vunpack.c.h.bf16 %v678_v33  ;;  %v669_v39 = vld [vmem:[%s1000_s6 + $0x30] sm:$0xff]   ;;  %v659_v41 = vunpack.c.h.bf16 %v677_v35  ;;  %v676_v43 = vld [vmem:[%s1000_s6 + $0x68] sm:$0xff]   ;;  %v658_v44 = vunpack.c.l.bf16 %v677_v35  ;;  %s775_s12 = scalar_lea.vmem %s774_s29, 256  ;;  %p776_p3 = scmp.lt.s32.totalorder %s497_s20, %s774_s29 }
  0x37   : > { %v631_v38 = vunpack.c.h.bf16 %v670_v34  ;;  %v630_v40 = vunpack.c.l.bf16 %v670_v34  ;;  %v627_v42 = vunpack.c.h.bf16 %v669_v39  ;;  %v668_v45 = vld [vmem:[%s1000_s6 + $0x28] sm:$0xff]   ;;  %v626_v46 = vunpack.c.l.bf16 %v669_v39  ;;  %v675_v49 = vld [vmem:[%s1000_s6 + $0x60] sm:$0xff]   ;;  %v674_v55 = vld [vmem:[%s1000_s6 + $0x58] sm:$0xff]   ;;  %p771_p1 = pnand %p770_p0, %p902_p5  ;;  %p777_p4 = scmp.lt.s32.totalorder %s775_s12, %s769_s27 }
  0x38   : > { %679 = vmatprep.subr.mxu0 %v663_v37  ;;  %v655_v47 = vunpack.c.h.bf16 %v676_v43  ;;  %v623_v48 = vunpack.c.h.bf16 %v668_v45  ;;  %v654_v50 = vunpack.c.l.bf16 %v676_v43  ;;  %v667_v51 = vld [vmem:[%s1000_s6 + $0x20] sm:$0xff]   ;;  %v622_v52 = vunpack.c.l.bf16 %v668_v45  ;;  %v666_v57 = vld [vmem:[%s1000_s6 + $0x18] sm:$0xff]   ;;  %v673_v61 = vld [vmem:[%s1000_s6 + $0x50] sm:$0xff]  }
  0x39   : > { %680 = vmatpush3.msra.mxu0 %v631_v38  ;;  %v651_v53 = vunpack.c.h.bf16 %v675_v49  ;;  %v619_v54 = vunpack.c.h.bf16 %v667_v51  ;;  %v650_v56 = vunpack.c.l.bf16 %v675_v49  ;;  %v618_v58 = vunpack.c.l.bf16 %v667_v51  ;;  %v665_v63 = vld [vmem:[%s1000_s6 + $0x10] sm:$0xff]   ;;  %v672_v3 = vld [vmem:[%s1000_s6 + $0x48] sm:$0xff]   ;;  %v671_v9 = vld [vmem:[%s1000_s6 + $0x40] sm:$0xff]   ;;  %p772_p2 = pneg %p771_p1  ;;  %p778_p6 = por %p777_p4, %p776_p3 }
  0x3a   : > { %681 = vmatprep.subr.mxu0 %v662_v36  ;;  %v647_v59 = vunpack.c.h.bf16 %v674_v55  ;;  %v615_v60 = vunpack.c.h.bf16 %v666_v57  ;;  %v646_v62 = vunpack.c.l.bf16 %v674_v55  ;;  %v614_v0 = vunpack.c.l.bf16 %v666_v57  ;;  %v664_v5 = vld [vmem:[%s1000_s6 + $0x8] sm:$0xff]   ;;  %v601_v11 = vld [vmem:[%s1000_s6] sm:$0xff]  }
  0x3b   : > { %682 = vmatpush3.msra.mxu0 %v630_v40  ;;  %v643_v1 = vunpack.c.h.bf16 %v673_v61  ;;  %v611_v2 = vunpack.c.h.bf16 %v665_v63  ;;  %v642_v4 = vunpack.c.l.bf16 %v673_v61  ;;  %v610_v6 = vunpack.c.l.bf16 %v665_v63  ;;  %v343_v17 = vld [vmem:[%s1061_s0] sm:$0xff]  ;;  %p779_p7 = pnand %p778_p6, %p772_p2 }
  0x3c   : > { %683 = vmatprep.subr.mxu0 %v659_v41  ;;  %v639_v7 = vunpack.c.h.bf16 %v672_v3  ;;  %v607_v8 = vunpack.c.h.bf16 %v664_v5  ;;  %v638_v10 = vunpack.c.l.bf16 %v672_v3  ;;  %v606_v12 = vunpack.c.l.bf16 %v664_v5 }
  0x3d   : > { %684 = vmatpush3.msra.mxu0 %v627_v42  ;;  %v635_v13 = vunpack.c.h.bf16 %v671_v9  ;;  %v603_v14 = vunpack.c.h.bf16 %v601_v11  ;;  %v634_v15 = vunpack.c.l.bf16 %v671_v9  ;;  %v602_v16 = vunpack.c.l.bf16 %v601_v11 }
  0x3e   : > { %685 = vmatprep.subr.mxu0 %v658_v44 }
  0x3f   : > { %686 = vmatpush3.msra.mxu0 %v626_v46 }
  0x40   : > { %687 = vmatprep.subr.mxu0 %v655_v47 }
  0x41   : > { %688 = vmatpush3.msra.mxu0 %v623_v48 }
  0x42   : > { %689 = vmatprep.subr.mxu0 %v654_v50 }
  0x43   : > { %690 = vmatpush3.msra.mxu0 %v622_v52 }
  0x44   : > { %691 = vmatprep.subr.mxu0 %v651_v53 }
  0x45   : > { %692 = vmatpush3.msra.mxu0 %v619_v54 }
  0x46   : > { %693 = vmatprep.subr.mxu0 %v650_v56 }
  0x47   : > { %694 = vmatpush3.msra.mxu0 %v618_v58 }
  0x48   : > { %695 = vmatprep.subr.mxu0 %v647_v59 }
  0x49   : > { %696 = vmatpush3.msra.mxu0 %v615_v60 }
  0x4a   : > { %697 = vmatprep.subr.mxu0 %v646_v62 }
  0x4b   : > { %698 = vmatpush3.msra.mxu0 %v614_v0 }
  0x4c   : > { %699 = vmatprep.subr.mxu0 %v643_v1 }
  0x4d   : > { %700 = vmatpush3.msra.mxu0 %v611_v2 }
  0x4e   : > { %701 = vmatprep.subr.mxu0 %v642_v4 }
  0x4f   : > { %702 = vmatpush3.msra.mxu0 %v610_v6 }
  0x50   : > { %703 = vmatprep.subr.mxu0 %v639_v7 }
  0x51   : > { %704 = vmatpush3.msra.mxu0 %v607_v8 }
  0x52   : > { %705 = vmatprep.subr.mxu0 %v638_v10 }
  0x53   : > { %706 = vmatpush3.msra.mxu0 %v606_v12 }
  0x54   : > { %707 = vmatprep.subr.mxu0 %v635_v13 }
  0x55   : > { %708 = vmatpush3.msra.mxu0 %v603_v14 }
  0x56   : > { %709 = vmatprep.subr.mxu0 %v634_v15 }
  0x57   : > { %710 = vmatpush3.msra.mxu0 %v602_v16 }
  0x58   : > { %474 = vmatmul.mubr.f32.vlgmr.msra.gmra.mxu0 %v343_v17 }
 0x118   : > { %v711_v18 = vpop.f32.mrf.mxu0 }
 0x11a   : > { %v712_v19 = vpop.f32.mrf.mxu0 }
 0x11b   : > { %v713_v20 = vadd.f32 %v712_v19, %v711_v18 }
 0x11d   : > { %479 = vst [vmem:[%s337_s18] sm:$0xff] %v713_v20 }
 0x11e   : > { %782 = shalt.err (!%p779_p7)
}
 0x11f   : > { %s783_s3 = scalar_lea.hbm %s494_s25, 128  ;;  %s787_s5 = scalar_lea.hbm %s1063_s2, 384 }
 0x120   : > { %p784_p8 = scmp.ne.s32.totalorder %s494_s25, %s783_s3  ;;  %p788_p12 = scmp.lt.s32.totalorder %s494_s25, %s1063_s2 }
 0x121   : > { %p789_p13 = scmp.lt.s32.totalorder %s787_s5, %s783_s3 }
 0x122   : > { %p785_p10 = pnand %p784_p8, %p902_p5 }
 0x123   : > { %p790_p0 = por %p789_p13, %p788_p12 }
 0x124   : > { %p786_p11 = pneg %p785_p10 }
 0x126   : > { %p791_p1 = pnand %p790_p0, %p786_p11 }
 0x128   : > { %794 = shalt.err (!%p791_p1)
}
 0x129   : > { %714 = dma.vmem_to_hbm [thread:$0]  (%p902_p5), %s497_s20, 128, %s494_s25, %s481_s26  }
 0x12a PF: > { %p720_p2 = scmp.ge.s32.totalorder %s845_s14, 2  ;;  %s508_s8 = sand.u32 1, %s825_s9  }
 0x12b   : > { %s509_s15 = scalar_lea.sflag [#allocation4], %s508_s8 }
 0x12c   : > { %p717_p3 = pnand %p720_p2, %p913_p9 }
 0x12e   : > { %p718_p4 = pneg %p717_p3 }
 0x130   : > { %820 = dma.done.wait (%p718_p4), %s509_s15, 128  }
 0x131   : > { %822 = vsyncadd (%p718_p4), %s509_s15, 4294967168  ;;  %s15_s14 = sadd.s32 1, %s845_s14   ;;  %s1066_s9 = smov %s829_s10 }
 0x132   : > { %p12_p6 = scmp.ge.s32.totalorder %s15_s14, 5   ;;  %s1067_s10 = smov %s833_s11 }
 0x133   : > { %s1068_s11 = smov %s911_s21  ;;  %s1069_s12 = smov %s841_s13 }
 0x134   : > { %s1070_s13 = smov %s1072_s17  ;;  %14 = sbr.rel (!%p12_p6) target bundleno = 4 (0x4), region = 112 }
 0x139   :  { %514 = vsyncpa [#allocation4], 1 }
 0x13a   :  { %516 = vsyncpa [#allocation4 + $0x1], 1 }

</bundles_post_ra>
